<compile_context>
chip_gen: v7x
topology: tpu7x:2x2x1
jax: 0.10.0
libtpu: 0.0.40
codegen_flags: <defaults>
</compile_context>

<pallas_src>
import functools

import jax
import jax.numpy as jnp
import numpy as np
from jax import lax
from jax.experimental import pallas as pl
from jax.experimental.pallas import tpu as pltpu


# ---------------------------------------------------------------------------
# Pallas kernels
# ---------------------------------------------------------------------------
def _conv3x3_stats_kernel(x_ref, s_ref, b_ref, w_ref,
                          o_ref, sum_ref, ssq_ref, xp_ref, *, apply_input_act):
    """(optional per-channel affine+ReLU prologue) -> 3x3 conv (pad=1, no bias)
       -> per-channel sum / sum-of-squares partials for the following BatchNorm.

    x_ref:   (1, H, W, Cin)     one batch element, NHWC
    s_ref:   (1, Cin)           folded BN scale of the previous layer (prologue)
    b_ref:   (1, Cin)           folded BN bias  of the previous layer (prologue)
    w_ref:   (3, 3, Cin, Cout)  HWIO weights
    o_ref:   (1, H, W, Cout)    conv output
    sum_ref: (1, 1, Cout)       sum over (H, W) of the conv output
    ssq_ref: (1, 1, Cout)       sum of squares over (H, W)
    xp_ref:  VMEM scratch (H+2, W+2, Cin), zero-padded input built in-kernel
    """
    H, W, Cin = x_ref.shape[1], x_ref.shape[2], x_ref.shape[3]
    Cout = w_ref.shape[3]

    x = x_ref[0]                                             # (H, W, Cin)
    if apply_input_act:                                      # fused BN+ReLU of prev layer
        x = jnp.maximum(x * s_ref[0, :] + b_ref[0, :], 0.0)

    # Zero-padded tile built in VMEM (replaces wrapper-side jnp.pad -> saves a full
    # HBM round trip of the padded input per conv).
    xp_ref[...] = jnp.zeros(xp_ref.shape, jnp.float32)
    xp_ref[1:H + 1, 1:W + 1, :] = x
    xp = xp_ref[...]                                         # (H+2, W+2, Cin)

    # 9 shifted matmuls on the MXU, f32 accumulation.
    acc = jnp.zeros((H * W, Cout), jnp.float32)
    for dh in range(3):
        for dw in range(3):
            patch = xp[dh:dh + H, dw:dw + W, :].reshape(H * W, Cin)
            acc = acc + jnp.dot(patch, w_ref[dh, dw, :, :],
                                preferred_element_type=jnp.float32)

    o_ref[0] = acc.reshape(H, W, Cout)
    # Batch-stat partials emitted straight from the accumulator: no extra HBM read.
    sum_ref[0] = jnp.sum(acc, axis=0, keepdims=True)          # (1, Cout)
    ssq_ref[0] = jnp.sum(acc * acc, axis=0, keepdims=True)    # (1, Cout)


def _bn_relu_kernel(x_ref, s_ref, b_ref, o_ref):
    """Lane-dense fused (folded) BatchNorm + ReLU.

    x_ref: (1, H, W*C)  scale/bias tiled to (1, W*C)  -> dense 512-lane loads/stores.
    """
    o_ref[...] = jnp.maximum(x_ref[...] * s_ref[0, :] + b_ref[0, :], 0.0)


# ---------------------------------------------------------------------------
# Wrappers
# ---------------------------------------------------------------------------
def conv3x3_fused(x_nhwc, scale, bias, w_hwio, *, apply_input_act):
    N, H, W, Cin = x_nhwc.shape
    Cout = w_hwio.shape[-1]
    kernel = functools.partial(_conv3x3_stats_kernel, apply_input_act=apply_input_act)
    return pl.pallas_call(
        kernel,
        out_shape=(
            jax.ShapeDtypeStruct((N, H, W, Cout), jnp.float32),
            jax.ShapeDtypeStruct((N, 1, Cout), jnp.float32),
            jax.ShapeDtypeStruct((N, 1, Cout), jnp.float32),
        ),
        grid=(N,),
        in_specs=[
            pl.BlockSpec((1, H, W, Cin), lambda n: (n, 0, 0, 0)),
            pl.BlockSpec((1, Cin), lambda n: (0, 0)),
            pl.BlockSpec((1, Cin), lambda n: (0, 0)),
            pl.BlockSpec((3, 3, Cin, Cout), lambda n: (0, 0, 0, 0)),
        ],
        out_specs=(
            pl.BlockSpec((1, H, W, Cout), lambda n: (n, 0, 0, 0)),
            pl.BlockSpec((1, 1, Cout), lambda n: (n, 0, 0)),
            pl.BlockSpec((1, 1, Cout), lambda n: (n, 0, 0)),
        ),
        scratch_shapes=[pltpu.VMEM((H + 2, W + 2, Cin), jnp.float32)],
        compiler_params=pltpu.CompilerParams(dimension_semantics=("parallel",)),
    )(x_nhwc, scale, bias, w_hwio)


def bn_relu_lane_dense(x_flat, scale_flat, bias_flat):
    N, H, WC = x_flat.shape
    return pl.pallas_call(
        _bn_relu_kernel,
        out_shape=jax.ShapeDtypeStruct((N, H, WC), jnp.float32),
        grid=(N,),
        in_specs=[
            pl.BlockSpec((1, H, WC), lambda n: (n, 0, 0)),
            pl.BlockSpec((1, WC), lambda n: (0, 0)),
            pl.BlockSpec((1, WC), lambda n: (0, 0)),
        ],
        out_specs=pl.BlockSpec((1, H, WC), lambda n: (n, 0, 0)),
        compiler_params=pltpu.CompilerParams(dimension_semantics=("parallel",)),
    )(x_flat, scale_flat, bias_flat)


def _finish_bn(sum_nc, ssq_nc, gamma, beta, count, eps=1e-5):
    # Tiny (N,1,C) glue reduction: training-mode (biased) batch stats per channel.
    s = jnp.sum(sum_nc, axis=(0, 1))
    q = jnp.sum(ssq_nc, axis=(0, 1))
    mean = s / count
    var = q / count - mean * mean
    scale = gamma * lax.rsqrt(var + eps)
    bias = beta - mean * scale
    return scale, bias


@jax.jit
def two_conv_bn_relu_back(x_nchw, params):
    """Forward pass of two_ConvBnRule_back. Input is NCHW (PyTorch convention)."""
    x = jnp.transpose(x_nchw, (0, 2, 3, 1))                  # NCHW -> NHWC
    N, H, W, Cin = x.shape
    C1 = params["w1"].shape[-1]
    C2 = params["w2"].shape[-1]
    count = N * H * W

    # Conv biases b1/b2 are skipped in the kernels: a per-channel constant added
    # before training-mode BatchNorm is exactly absorbed by the batch mean.
    ones = jnp.ones((1, Cin), jnp.float32)
    zeros = jnp.zeros((1, Cin), jnp.float32)
    y1, sum1, ssq1 = conv3x3_fused(x, ones, zeros, params["w1"], apply_input_act=False)
    scale1, bias1 = _finish_bn(sum1, ssq1, params["gamma1"], params["beta1"], count)

    # BN1 + ReLU1 fused as the input prologue of conv2 (no intermediate HBM pass).
    y2, sum2, ssq2 = conv3x3_fused(y1, scale1.reshape(1, C1), bias1.reshape(1, C1),
                                   params["w2"], apply_input_act=True)
    scale2, bias2 = _finish_bn(sum2, ssq2, params["gamma2"], params["beta2"], count)

    # Final BN2 + ReLU2: lane-dense elementwise kernel (last dim W*C2 = 512).
    z2 = bn_relu_lane_dense(y2.reshape(N, H, W * C2),
                            jnp.tile(scale2, W).reshape(1, W * C2),
                            jnp.tile(bias2, W).reshape(1, W * C2))
    return jnp.transpose(z2.reshape(N, H, W, C2), (0, 3, 1, 2))   # NHWC -> NCHW


# ---------------------------------------------------------------------------
# Pure-JAX reference (exact module semantics, including the conv biases)
# ---------------------------------------------------------------------------
def reference(x_nchw, params, eps=1e-5):
    x = jnp.transpose(x_nchw, (0, 2, 3, 1))
    dn = ("NHWC", "HWIO", "NHWC")

    def block(h, w, b, g, bt):
        y = lax.conv_general_dilated(h, w, (1, 1), [(1, 1), (1, 1)],
                                     dimension_numbers=dn,
                                     precision=lax.Precision.HIGHEST) + b
        mu = jnp.mean(y, axis=(0, 1, 2))
        var = jnp.mean((y - mu) ** 2, axis=(0, 1, 2))
        y = (y - mu) * lax.rsqrt(var + eps) * g + bt
        return jnp.maximum(y, 0.0)

    h = block(x, params["w1"], params["b1"], params["gamma1"], params["beta1"])
    h = block(h, params["w2"], params["b2"], params["gamma2"], params["beta2"])
    return jnp.transpose(h, (0, 3, 1, 2))


# ---------------------------------------------------------------------------
if __name__ == "__main__":
    # Module fixes in_channels=64; pick out_chan=32, small spatial/batch.
    N, CIN, H, W = 2, 64, 16, 16
    COUT = 32

    key = jax.random.PRNGKey(0)
    k = jax.random.split(key, 7)
    x = jax.random.normal(k[0], (N, CIN, H, W), jnp.float32)  # NCHW like PyTorch

    params = {
        # Weights stored directly in HWIO layout (3, 3, Cin, Cout).
        "w1": jax.random.normal(k[1], (3, 3, CIN, COUT), jnp.float32) * 0.05,
        "b1": jax.random.normal(k[2], (COUT,), jnp.float32) * 0.05,   # absorbed by BN1
        "gamma1": 1.0 + 0.1 * jax.random.normal(k[3], (COUT,), jnp.float32),
        "beta1": 0.1 * jax.random.normal(k[4], (COUT,), jnp.float32),
        "w2": jax.random.normal(k[5], (3, 3, COUT, COUT), jnp.float32) * 0.05,
        "b2": jax.random.normal(k[6], (COUT,), jnp.float32) * 0.05,   # absorbed by BN2
        "gamma2": jnp.ones((COUT,), jnp.float32),
        "beta2": jnp.zeros((COUT,), jnp.float32),
    }

    out = jax.block_until_ready(two_conv_bn_relu_back(x, params))
    ref = jax.block_until_ready(reference(x, params))

    assert out.shape == (N, COUT, H, W), out.shape
    np.testing.assert_allclose(np.asarray(out), np.asarray(ref), rtol=2e-4, atol=2e-4)
    print("KERNEL_OK")
</pallas_src>

<mosaic_0001>
module attributes {stable_mosaic.version = 11 : i64} {
  func.func @_conv3x3_stats_kernel(%arg0: i32, %arg1: memref<1x16x16x64xf32, #tpu.memory_space<vmem>>, %arg2: memref<1x64xf32, #tpu.memory_space<vmem>>, %arg3: memref<1x64xf32, #tpu.memory_space<vmem>>, %arg4: memref<3x3x64x32xf32, #tpu.memory_space<vmem>>, %arg5: memref<1x16x16x32xf32, #tpu.memory_space<vmem>>, %arg6: memref<1x1x32xf32, #tpu.memory_space<vmem>>, %arg7: memref<1x1x32xf32, #tpu.memory_space<vmem>>, %arg8: memref<18x18x64xf32, #tpu.memory_space<vmem>>) attributes {dimension_semantics = [#tpu.dimension_semantics<parallel>], iteration_bounds = array<i64: 2>, scalar_prefetch = 0 : i64, scratch_operands = 1 : i64, tpu.core_type = #tpu.core_type<tc>, window_params = [{transform_indices = @transform_0, window_bounds = array<i64: 1, 16, 16, 64>}, {pipeline_mode = #tpu.pipeline_mode<synchronous>, transform_indices = @transform_1, window_bounds = array<i64: 1, 64>}, {pipeline_mode = #tpu.pipeline_mode<synchronous>, transform_indices = @transform_2, window_bounds = array<i64: 1, 64>}, {pipeline_mode = #tpu.pipeline_mode<synchronous>, transform_indices = @transform_3, window_bounds = array<i64: 3, 3, 64, 32>}, {transform_indices = @transform_4, window_bounds = array<i64: 1, 16, 16, 32>}, {transform_indices = @transform_5, window_bounds = array<i64: 1, 1, 32>}, {transform_indices = @transform_6, window_bounds = array<i64: 1, 1, 32>}]} {
    %c0 = arith.constant 0 : index
    %c0_0 = arith.constant 0 : index
    %c0_1 = arith.constant 0 : index
    %c0_2 = arith.constant 0 : index
    %0 = vector.load %arg1[%c0, %c0_0, %c0_1, %c0_2] : memref<1x16x16x64xf32, #tpu.memory_space<vmem>>, vector<1x16x16x64xf32>
    %1 = vector.shape_cast %0 : vector<1x16x16x64xf32> to vector<16x16x64xf32>
    %cst = arith.constant 0.000000e+00 : f32
    %2 = vector.broadcast %cst : f32 to vector<18x18x64xf32>
    %c0_3 = arith.constant 0 : index
    %c0_4 = arith.constant 0 : index
    %c0_5 = arith.constant 0 : index
    %3 = vector.load %arg8[%c0_3, %c0_4, %c0_5] : memref<18x18x64xf32, #tpu.memory_space<vmem>>, vector<18x18x64xf32>
    tpu.vector_store %arg8[%c0_3, %c0_4, %c0_5], %2 {strides = array<i32>} : memref<18x18x64xf32, #tpu.memory_space<vmem>>, vector<18x18x64xf32>,
    %c1 = arith.constant 1 : index
    %c1_6 = arith.constant 1 : index
    %c0_7 = arith.constant 0 : index
    %4 = vector.load %arg8[%c1, %c1_6, %c0_7] : memref<18x18x64xf32, #tpu.memory_space<vmem>>, vector<16x16x64xf32>
    tpu.vector_store %arg8[%c1, %c1_6, %c0_7], %1 {strides = array<i32>} : memref<18x18x64xf32, #tpu.memory_space<vmem>>, vector<16x16x64xf32>,
    %c0_8 = arith.constant 0 : index
    %c0_9 = arith.constant 0 : index
    %c0_10 = arith.constant 0 : index
    %5 = vector.load %arg8[%c0_8, %c0_9, %c0_10] : memref<18x18x64xf32, #tpu.memory_space<vmem>>, vector<18x18x64xf32>
    %cst_11 = arith.constant 0.000000e+00 : f32
    %6 = vector.broadcast %cst_11 : f32 to vector<256x32xf32>
    %7 = vector.extract_strided_slice %5 {offsets = [0, 0, 0], sizes = [16, 16, 64], strides = [1, 1, 1]} : vector<18x18x64xf32> to vector<16x16x64xf32>
    %8 = vector.shape_cast %7 : vector<16x16x64xf32> to vector<256x64xf32>
    %c0_12 = arith.constant 0 : index
    %c0_13 = arith.constant 0 : index
    %c0_14 = arith.constant 0 : index
    %c0_15 = arith.constant 0 : index
    %9 = vector.load %arg4[%c0_12, %c0_13, %c0_14, %c0_15] : memref<3x3x64x32xf32, #tpu.memory_space<vmem>>, vector<1x1x64x32xf32>
    %10 = vector.shape_cast %9 : vector<1x1x64x32xf32> to vector<64x32xf32>
    %cst_16 = arith.constant dense<0.000000e+00> : vector<256x32xf32>
    %11 = tpu.matmul %8, %10, %cst_16 {dimension_numbers = #tpu.dot_dimension_numbers<[1], [0], [0], [1], [0, 0, 1, 1], [], []>} : vector<256x64xf32>, vector<64x32xf32>, vector<256x32xf32> -> vector<256x32xf32>
    %12 = arith.addf %6, %11 : vector<256x32xf32>
    %13 = vector.extract_strided_slice %5 {offsets = [0, 1, 0], sizes = [16, 16, 64], strides = [1, 1, 1]} : vector<18x18x64xf32> to vector<16x16x64xf32>
    %14 = vector.shape_cast %13 : vector<16x16x64xf32> to vector<256x64xf32>
    %c0_17 = arith.constant 0 : index
    %c1_18 = arith.constant 1 : index
    %c0_19 = arith.constant 0 : index
    %c0_20 = arith.constant 0 : index
    %15 = vector.load %arg4[%c0_17, %c1_18, %c0_19, %c0_20] : memref<3x3x64x32xf32, #tpu.memory_space<vmem>>, vector<1x1x64x32xf32>
    %16 = vector.shape_cast %15 : vector<1x1x64x32xf32> to vector<64x32xf32>
    %cst_21 = arith.constant dense<0.000000e+00> : vector<256x32xf32>
    %17 = tpu.matmul %14, %16, %cst_21 {dimension_numbers = #tpu.dot_dimension_numbers<[1], [0], [0], [1], [0, 0, 1, 1], [], []>} : vector<256x64xf32>, vector<64x32xf32>, vector<256x32xf32> -> vector<256x32xf32>
    %18 = arith.addf %12, %17 : vector<256x32xf32>
    %19 = vector.extract_strided_slice %5 {offsets = [0, 2, 0], sizes = [16, 16, 64], strides = [1, 1, 1]} : vector<18x18x64xf32> to vector<16x16x64xf32>
    %20 = vector.shape_cast %19 : vector<16x16x64xf32> to vector<256x64xf32>
    %c0_22 = arith.constant 0 : index
    %c2 = arith.constant 2 : index
    %c0_23 = arith.constant 0 : index
    %c0_24 = arith.constant 0 : index
    %21 = vector.load %arg4[%c0_22, %c2, %c0_23, %c0_24] : memref<3x3x64x32xf32, #tpu.memory_space<vmem>>, vector<1x1x64x32xf32>
    %22 = vector.shape_cast %21 : vector<1x1x64x32xf32> to vector<64x32xf32>
    %cst_25 = arith.constant dense<0.000000e+00> : vector<256x32xf32>
    %23 = tpu.matmul %20, %22, %cst_25 {dimension_numbers = #tpu.dot_dimension_numbers<[1], [0], [0], [1], [0, 0, 1, 1], [], []>} : vector<256x64xf32>, vector<64x32xf32>, vector<256x32xf32> -> vector<256x32xf32>
    %24 = arith.addf %18, %23 : vector<256x32xf32>
    %25 = vector.extract_strided_slice %5 {offsets = [1, 0, 0], sizes = [16, 16, 64], strides = [1, 1, 1]} : vector<18x18x64xf32> to vector<16x16x64xf32>
    %26 = vector.shape_cast %25 : vector<16x16x64xf32> to vector<256x64xf32>
    %c1_26 = arith.constant 1 : index
    %c0_27 = arith.constant 0 : index
    %c0_28 = arith.constant 0 : index
    %c0_29 = arith.constant 0 : index
    %27 = vector.load %arg4[%c1_26, %c0_27, %c0_28, %c0_29] : memref<3x3x64x32xf32, #tpu.memory_space<vmem>>, vector<1x1x64x32xf32>
    %28 = vector.shape_cast %27 : vector<1x1x64x32xf32> to vector<64x32xf32>
    %cst_30 = arith.constant dense<0.000000e+00> : vector<256x32xf32>
    %29 = tpu.matmul %26, %28, %cst_30 {dimension_numbers = #tpu.dot_dimension_numbers<[1], [0], [0], [1], [0, 0, 1, 1], [], []>} : vector<256x64xf32>, vector<64x32xf32>, vector<256x32xf32> -> vector<256x32xf32>
    %30 = arith.addf %24, %29 : vector<256x32xf32>
    %31 = vector.extract_strided_slice %5 {offsets = [1, 1, 0], sizes = [16, 16, 64], strides = [1, 1, 1]} : vector<18x18x64xf32> to vector<16x16x64xf32>
    %32 = vector.shape_cast %31 : vector<16x16x64xf32> to vector<256x64xf32>
    %c1_31 = arith.constant 1 : index
    %c1_32 = arith.constant 1 : index
    %c0_33 = arith.constant 0 : index
    %c0_34 = arith.constant 0 : index
    %33 = vector.load %arg4[%c1_31, %c1_32, %c0_33, %c0_34] : memref<3x3x64x32xf32, #tpu.memory_space<vmem>>, vector<1x1x64x32xf32>
    %34 = vector.shape_cast %33 : vector<1x1x64x32xf32> to vector<64x32xf32>
    %cst_35 = arith.constant dense<0.000000e+00> : vector<256x32xf32>
    %35 = tpu.matmul %32, %34, %cst_35 {dimension_numbers = #tpu.dot_dimension_numbers<[1], [0], [0], [1], [0, 0, 1, 1], [], []>} : vector<256x64xf32>, vector<64x32xf32>, vector<256x32xf32> -> vector<256x32xf32>
    %36 = arith.addf %30, %35 : vector<256x32xf32>
    %37 = vector.extract_strided_slice %5 {offsets = [1, 2, 0], sizes = [16, 16, 64], strides = [1, 1, 1]} : vector<18x18x64xf32> to vector<16x16x64xf32>
    %38 = vector.shape_cast %37 : vector<16x16x64xf32> to vector<256x64xf32>
    %c1_36 = arith.constant 1 : index
    %c2_37 = arith.constant 2 : index
    %c0_38 = arith.constant 0 : index
    %c0_39 = arith.constant 0 : index
    %39 = vector.load %arg4[%c1_36, %c2_37, %c0_38, %c0_39] : memref<3x3x64x32xf32, #tpu.memory_space<vmem>>, vector<1x1x64x32xf32>
    %40 = vector.shape_cast %39 : vector<1x1x64x32xf32> to vector<64x32xf32>
    %cst_40 = arith.constant dense<0.000000e+00> : vector<256x32xf32>
    %41 = tpu.matmul %38, %40, %cst_40 {dimension_numbers = #tpu.dot_dimension_numbers<[1], [0], [0], [1], [0, 0, 1, 1], [], []>} : vector<256x64xf32>, vector<64x32xf32>, vector<256x32xf32> -> vector<256x32xf32>
    %42 = arith.addf %36, %41 : vector<256x32xf32>
    %43 = vector.extract_strided_slice %5 {offsets = [2, 0, 0], sizes = [16, 16, 64], strides = [1, 1, 1]} : vector<18x18x64xf32> to vector<16x16x64xf32>
    %44 = vector.shape_cast %43 : vector<16x16x64xf32> to vector<256x64xf32>
    %c2_41 = arith.constant 2 : index
    %c0_42 = arith.constant 0 : index
    %c0_43 = arith.constant 0 : index
    %c0_44 = arith.constant 0 : index
    %45 = vector.load %arg4[%c2_41, %c0_42, %c0_43, %c0_44] : memref<3x3x64x32xf32, #tpu.memory_space<vmem>>, vector<1x1x64x32xf32>
    %46 = vector.shape_cast %45 : vector<1x1x64x32xf32> to vector<64x32xf32>
    %cst_45 = arith.constant dense<0.000000e+00> : vector<256x32xf32>
    %47 = tpu.matmul %44, %46, %cst_45 {dimension_numbers = #tpu.dot_dimension_numbers<[1], [0], [0], [1], [0, 0, 1, 1], [], []>} : vector<256x64xf32>, vector<64x32xf32>, vector<256x32xf32> -> vector<256x32xf32>
    %48 = arith.addf %42, %47 : vector<256x32xf32>
    %49 = vector.extract_strided_slice %5 {offsets = [2, 1, 0], sizes = [16, 16, 64], strides = [1, 1, 1]} : vector<18x18x64xf32> to vector<16x16x64xf32>
    %50 = vector.shape_cast %49 : vector<16x16x64xf32> to vector<256x64xf32>
    %c2_46 = arith.constant 2 : index
    %c1_47 = arith.constant 1 : index
    %c0_48 = arith.constant 0 : index
    %c0_49 = arith.constant 0 : index
    %51 = vector.load %arg4[%c2_46, %c1_47, %c0_48, %c0_49] : memref<3x3x64x32xf32, #tpu.memory_space<vmem>>, vector<1x1x64x32xf32>
    %52 = vector.shape_cast %51 : vector<1x1x64x32xf32> to vector<64x32xf32>
    %cst_50 = arith.constant dense<0.000000e+00> : vector<256x32xf32>
    %53 = tpu.matmul %50, %52, %cst_50 {dimension_numbers = #tpu.dot_dimension_numbers<[1], [0], [0], [1], [0, 0, 1, 1], [], []>} : vector<256x64xf32>, vector<64x32xf32>, vector<256x32xf32> -> vector<256x32xf32>
    %54 = arith.addf %48, %53 : vector<256x32xf32>
    %55 = vector.extract_strided_slice %5 {offsets = [2, 2, 0], sizes = [16, 16, 64], strides = [1, 1, 1]} : vector<18x18x64xf32> to vector<16x16x64xf32>
    %56 = vector.shape_cast %55 : vector<16x16x64xf32> to vector<256x64xf32>
    %c2_51 = arith.constant 2 : index
    %c2_52 = arith.constant 2 : index
    %c0_53 = arith.constant 0 : index
    %c0_54 = arith.constant 0 : index
    %57 = vector.load %arg4[%c2_51, %c2_52, %c0_53, %c0_54] : memref<3x3x64x32xf32, #tpu.memory_space<vmem>>, vector<1x1x64x32xf32>
    %58 = vector.shape_cast %57 : vector<1x1x64x32xf32> to vector<64x32xf32>
    %cst_55 = arith.constant dense<0.000000e+00> : vector<256x32xf32>
    %59 = tpu.matmul %56, %58, %cst_55 {dimension_numbers = #tpu.dot_dimension_numbers<[1], [0], [0], [1], [0, 0, 1, 1], [], []>} : vector<256x64xf32>, vector<64x32xf32>, vector<256x32xf32> -> vector<256x32xf32>
    %60 = arith.addf %54, %59 : vector<256x32xf32>
    %61 = vector.shape_cast %60 : vector<256x32xf32> to vector<16x16x32xf32>
    %c0_56 = arith.constant 0 : index
    %c0_57 = arith.constant 0 : index
    %c0_58 = arith.constant 0 : index
    %c0_59 = arith.constant 0 : index
    %62 = vector.load %arg5[%c0_56, %c0_57, %c0_58, %c0_59] : memref<1x16x16x32xf32, #tpu.memory_space<vmem>>, vector<1x16x16x32xf32>
    %63 = vector.shape_cast %62 : vector<1x16x16x32xf32> to vector<16x16x32xf32>
    %64 = vector.shape_cast %61 : vector<16x16x32xf32> to vector<1x16x16x32xf32>
    tpu.vector_store %arg5[%c0_56, %c0_57, %c0_58, %c0_59], %64 {strides = array<i32>} : memref<1x16x16x32xf32, #tpu.memory_space<vmem>>, vector<1x16x16x32xf32>,
    %cst_60 = arith.constant dense<0.000000e+00> : vector<32xf32>
    %65 = vector.multi_reduction <add>, %60, %cst_60 [0] : vector<256x32xf32> to vector<32xf32>
    %66 = vector.shape_cast %65 : vector<32xf32> to vector<1x32xf32>
    %c0_61 = arith.constant 0 : index
    %c0_62 = arith.constant 0 : index
    %c0_63 = arith.constant 0 : index
    %67 = vector.load %arg6[%c0_61, %c0_62, %c0_63] : memref<1x1x32xf32, #tpu.memory_space<vmem>>, vector<1x1x32xf32>
    %68 = vector.shape_cast %67 : vector<1x1x32xf32> to vector<1x32xf32>
    %69 = vector.shape_cast %66 : vector<1x32xf32> to vector<1x1x32xf32>
    tpu.vector_store %arg6[%c0_61, %c0_62, %c0_63], %69 {strides = array<i32>} : memref<1x1x32xf32, #tpu.memory_space<vmem>>, vector<1x1x32xf32>,
    %70 = arith.mulf %60, %60 : vector<256x32xf32>
    %cst_64 = arith.constant dense<0.000000e+00> : vector<32xf32>
    %71 = vector.multi_reduction <add>, %70, %cst_64 [0] : vector<256x32xf32> to vector<32xf32>
    %72 = vector.shape_cast %71 : vector<32xf32> to vector<1x32xf32>
    %c0_65 = arith.constant 0 : index
    %c0_66 = arith.constant 0 : index
    %c0_67 = arith.constant 0 : index
    %73 = vector.load %arg7[%c0_65, %c0_66, %c0_67] : memref<1x1x32xf32, #tpu.memory_space<vmem>>, vector<1x1x32xf32>
    %74 = vector.shape_cast %73 : vector<1x1x32xf32> to vector<1x32xf32>
    %75 = vector.shape_cast %72 : vector<1x32xf32> to vector<1x1x32xf32>
    tpu.vector_store %arg7[%c0_65, %c0_66, %c0_67], %75 {strides = array<i32>} : memref<1x1x32xf32, #tpu.memory_space<vmem>>, vector<1x1x32xf32>,
    return
  }
  func.func @transform_0(%arg0: i32) -> (i32, i32, i32, i32) {
    %c0_i32 = arith.constant 0 : i32
    %c0_i32_0 = arith.constant 0 : i32
    %c0_i32_1 = arith.constant 0 : i32
    %c0_i32_2 = arith.constant 0 : i32
    return %arg0, %c0_i32, %c0_i32_0, %c0_i32_1 : i32, i32, i32, i32
  }
  func.func @transform_1(%arg0: i32) -> (i32, i32) {
    %c0_i32 = arith.constant 0 : i32
    %c0_i32_0 = arith.constant 0 : i32
    %c0_i32_1 = arith.constant 0 : i32
    return %c0_i32, %c0_i32_0 : i32, i32
  }
  func.func @transform_2(%arg0: i32) -> (i32, i32) {
    %c0_i32 = arith.constant 0 : i32
    %c0_i32_0 = arith.constant 0 : i32
    %c0_i32_1 = arith.constant 0 : i32
    return %c0_i32, %c0_i32_0 : i32, i32
  }
  func.func @transform_3(%arg0: i32) -> (i32, i32, i32, i32) {
    %c0_i32 = arith.constant 0 : i32
    %c0_i32_0 = arith.constant 0 : i32
    %c0_i32_1 = arith.constant 0 : i32
    %c0_i32_2 = arith.constant 0 : i32
    %c0_i32_3 = arith.constant 0 : i32
    return %c0_i32, %c0_i32_0, %c0_i32_1, %c0_i32_2 : i32, i32, i32, i32
  }
  func.func @transform_4(%arg0: i32) -> (i32, i32, i32, i32) {
    %c0_i32 = arith.constant 0 : i32
    %c0_i32_0 = arith.constant 0 : i32
    %c0_i32_1 = arith.constant 0 : i32
    %c0_i32_2 = arith.constant 0 : i32
    return %arg0, %c0_i32, %c0_i32_0, %c0_i32_1 : i32, i32, i32, i32
  }
  func.func @transform_5(%arg0: i32) -> (i32, i32, i32) {
    %c0_i32 = arith.constant 0 : i32
    %c0_i32_0 = arith.constant 0 : i32
    %c0_i32_1 = arith.constant 0 : i32
    return %arg0, %c0_i32, %c0_i32_0 : i32, i32, i32
  }
  func.func @transform_6(%arg0: i32) -> (i32, i32, i32) {
    %c0_i32 = arith.constant 0 : i32
    %c0_i32_0 = arith.constant 0 : i32
    %c0_i32_1 = arith.constant 0 : i32
    return %arg0, %c0_i32, %c0_i32_0 : i32, i32, i32
  }
}

module attributes {stable_mosaic.version = 11 : i64} {
  func.func @_conv3x3_stats_kernel(%arg0: i32, %arg1: memref<1x16x16x32xf32, #tpu.memory_space<vmem>>, %arg2: memref<1x32xf32, #tpu.memory_space<vmem>>, %arg3: memref<1x32xf32, #tpu.memory_space<vmem>>, %arg4: memref<3x3x32x32xf32, #tpu.memory_space<vmem>>, %arg5: memref<1x16x16x32xf32, #tpu.memory_space<vmem>>, %arg6: memref<1x1x32xf32, #tpu.memory_space<vmem>>, %arg7: memref<1x1x32xf32, #tpu.memory_space<vmem>>, %arg8: memref<18x18x32xf32, #tpu.memory_space<vmem>>) attributes {dimension_semantics = [#tpu.dimension_semantics<parallel>], iteration_bounds = array<i64: 2>, scalar_prefetch = 0 : i64, scratch_operands = 1 : i64, tpu.core_type = #tpu.core_type<tc>, window_params = [{transform_indices = @transform_0, window_bounds = array<i64: 1, 16, 16, 32>}, {pipeline_mode = #tpu.pipeline_mode<synchronous>, transform_indices = @transform_1, window_bounds = array<i64: 1, 32>}, {pipeline_mode = #tpu.pipeline_mode<synchronous>, transform_indices = @transform_2, window_bounds = array<i64: 1, 32>}, {pipeline_mode = #tpu.pipeline_mode<synchronous>, transform_indices = @transform_3, window_bounds = array<i64: 3, 3, 32, 32>}, {transform_indices = @transform_4, window_bounds = array<i64: 1, 16, 16, 32>}, {transform_indices = @transform_5, window_bounds = array<i64: 1, 1, 32>}, {transform_indices = @transform_6, window_bounds = array<i64: 1, 1, 32>}]} {
    %c0 = arith.constant 0 : index
    %c0_0 = arith.constant 0 : index
    %c0_1 = arith.constant 0 : index
    %c0_2 = arith.constant 0 : index
    %0 = vector.load %arg1[%c0, %c0_0, %c0_1, %c0_2] : memref<1x16x16x32xf32, #tpu.memory_space<vmem>>, vector<1x16x16x32xf32>
    %1 = vector.shape_cast %0 : vector<1x16x16x32xf32> to vector<16x16x32xf32>
    %c0_3 = arith.constant 0 : index
    %c0_4 = arith.constant 0 : index
    %2 = vector.load %arg2[%c0_3, %c0_4] : memref<1x32xf32, #tpu.memory_space<vmem>>, vector<1x32xf32>
    %3 = vector.shape_cast %2 : vector<1x32xf32> to vector<32xf32>
    %4 = vector.shape_cast %3 : vector<32xf32> to vector<1x1x32xf32>
    %5 = vector.broadcast %4 : vector<1x1x32xf32> to vector<16x16x32xf32>
    %6 = arith.mulf %1, %5 : vector<16x16x32xf32>
    %c0_5 = arith.constant 0 : index
    %c0_6 = arith.constant 0 : index
    %7 = vector.load %arg3[%c0_5, %c0_6] : memref<1x32xf32, #tpu.memory_space<vmem>>, vector<1x32xf32>
    %8 = vector.shape_cast %7 : vector<1x32xf32> to vector<32xf32>
    %9 = vector.shape_cast %8 : vector<32xf32> to vector<1x1x32xf32>
    %10 = vector.broadcast %9 : vector<1x1x32xf32> to vector<16x16x32xf32>
    %11 = arith.addf %6, %10 : vector<16x16x32xf32>
    %cst = arith.constant 0.000000e+00 : f32
    %12 = vector.broadcast %cst : f32 to vector<16x16x32xf32>
    %13 = arith.maximumf %11, %12 : vector<16x16x32xf32>
    %cst_7 = arith.constant 0.000000e+00 : f32
    %14 = vector.broadcast %cst_7 : f32 to vector<18x18x32xf32>
    %c0_8 = arith.constant 0 : index
    %c0_9 = arith.constant 0 : index
    %c0_10 = arith.constant 0 : index
    %15 = vector.load %arg8[%c0_8, %c0_9, %c0_10] : memref<18x18x32xf32, #tpu.memory_space<vmem>>, vector<18x18x32xf32>
    tpu.vector_store %arg8[%c0_8, %c0_9, %c0_10], %14 {strides = array<i32>} : memref<18x18x32xf32, #tpu.memory_space<vmem>>, vector<18x18x32xf32>,
    %c1 = arith.constant 1 : index
    %c1_11 = arith.constant 1 : index
    %c0_12 = arith.constant 0 : index
    %16 = vector.load %arg8[%c1, %c1_11, %c0_12] : memref<18x18x32xf32, #tpu.memory_space<vmem>>, vector<16x16x32xf32>
    tpu.vector_store %arg8[%c1, %c1_11, %c0_12], %13 {strides = array<i32>} : memref<18x18x32xf32, #tpu.memory_space<vmem>>, vector<16x16x32xf32>,
    %c0_13 = arith.constant 0 : index
    %c0_14 = arith.constant 0 : index
    %c0_15 = arith.constant 0 : index
    %17 = vector.load %arg8[%c0_13, %c0_14, %c0_15] : memref<18x18x32xf32, #tpu.memory_space<vmem>>, vector<18x18x32xf32>
    %cst_16 = arith.constant 0.000000e+00 : f32
    %18 = vector.broadcast %cst_16 : f32 to vector<256x32xf32>
    %19 = vector.extract_strided_slice %17 {offsets = [0, 0, 0], sizes = [16, 16, 32], strides = [1, 1, 1]} : vector<18x18x32xf32> to vector<16x16x32xf32>
    %20 = vector.shape_cast %19 : vector<16x16x32xf32> to vector<256x32xf32>
    %c0_17 = arith.constant 0 : index
    %c0_18 = arith.constant 0 : index
    %c0_19 = arith.constant 0 : index
    %c0_20 = arith.constant 0 : index
    %21 = vector.load %arg4[%c0_17, %c0_18, %c0_19, %c0_20] : memref<3x3x32x32xf32, #tpu.memory_space<vmem>>, vector<1x1x32x32xf32>
    %22 = vector.shape_cast %21 : vector<1x1x32x32xf32> to vector<32x32xf32>
    %cst_21 = arith.constant dense<0.000000e+00> : vector<256x32xf32>
    %23 = tpu.matmul %20, %22, %cst_21 {dimension_numbers = #tpu.dot_dimension_numbers<[1], [0], [0], [1], [0, 0, 1, 1], [], []>} : vector<256x32xf32>, vector<32x32xf32>, vector<256x32xf32> -> vector<256x32xf32>
    %24 = arith.addf %18, %23 : vector<256x32xf32>
    %25 = vector.extract_strided_slice %17 {offsets = [0, 1, 0], sizes = [16, 16, 32], strides = [1, 1, 1]} : vector<18x18x32xf32> to vector<16x16x32xf32>
    %26 = vector.shape_cast %25 : vector<16x16x32xf32> to vector<256x32xf32>
    %c0_22 = arith.constant 0 : index
    %c1_23 = arith.constant 1 : index
    %c0_24 = arith.constant 0 : index
    %c0_25 = arith.constant 0 : index
    %27 = vector.load %arg4[%c0_22, %c1_23, %c0_24, %c0_25] : memref<3x3x32x32xf32, #tpu.memory_space<vmem>>, vector<1x1x32x32xf32>
    %28 = vector.shape_cast %27 : vector<1x1x32x32xf32> to vector<32x32xf32>
    %cst_26 = arith.constant dense<0.000000e+00> : vector<256x32xf32>
    %29 = tpu.matmul %26, %28, %cst_26 {dimension_numbers = #tpu.dot_dimension_numbers<[1], [0], [0], [1], [0, 0, 1, 1], [], []>} : vector<256x32xf32>, vector<32x32xf32>, vector<256x32xf32> -> vector<256x32xf32>
    %30 = arith.addf %24, %29 : vector<256x32xf32>
    %31 = vector.extract_strided_slice %17 {offsets = [0, 2, 0], sizes = [16, 16, 32], strides = [1, 1, 1]} : vector<18x18x32xf32> to vector<16x16x32xf32>
    %32 = vector.shape_cast %31 : vector<16x16x32xf32> to vector<256x32xf32>
    %c0_27 = arith.constant 0 : index
    %c2 = arith.constant 2 : index
    %c0_28 = arith.constant 0 : index
    %c0_29 = arith.constant 0 : index
    %33 = vector.load %arg4[%c0_27, %c2, %c0_28, %c0_29] : memref<3x3x32x32xf32, #tpu.memory_space<vmem>>, vector<1x1x32x32xf32>
    %34 = vector.shape_cast %33 : vector<1x1x32x32xf32> to vector<32x32xf32>
    %cst_30 = arith.constant dense<0.000000e+00> : vector<256x32xf32>
    %35 = tpu.matmul %32, %34, %cst_30 {dimension_numbers = #tpu.dot_dimension_numbers<[1], [0], [0], [1], [0, 0, 1, 1], [], []>} : vector<256x32xf32>, vector<32x32xf32>, vector<256x32xf32> -> vector<256x32xf32>
    %36 = arith.addf %30, %35 : vector<256x32xf32>
    %37 = vector.extract_strided_slice %17 {offsets = [1, 0, 0], sizes = [16, 16, 32], strides = [1, 1, 1]} : vector<18x18x32xf32> to vector<16x16x32xf32>
    %38 = vector.shape_cast %37 : vector<16x16x32xf32> to vector<256x32xf32>
    %c1_31 = arith.constant 1 : index
    %c0_32 = arith.constant 0 : index
    %c0_33 = arith.constant 0 : index
    %c0_34 = arith.constant 0 : index
    %39 = vector.load %arg4[%c1_31, %c0_32, %c0_33, %c0_34] : memref<3x3x32x32xf32, #tpu.memory_space<vmem>>, vector<1x1x32x32xf32>
    %40 = vector.shape_cast %39 : vector<1x1x32x32xf32> to vector<32x32xf32>
    %cst_35 = arith.constant dense<0.000000e+00> : vector<256x32xf32>
    %41 = tpu.matmul %38, %40, %cst_35 {dimension_numbers = #tpu.dot_dimension_numbers<[1], [0], [0], [1], [0, 0, 1, 1], [], []>} : vector<256x32xf32>, vector<32x32xf32>, vector<256x32xf32> -> vector<256x32xf32>
    %42 = arith.addf %36, %41 : vector<256x32xf32>
    %43 = vector.extract_strided_slice %17 {offsets = [1, 1, 0], sizes = [16, 16, 32], strides = [1, 1, 1]} : vector<18x18x32xf32> to vector<16x16x32xf32>
    %44 = vector.shape_cast %43 : vector<16x16x32xf32> to vector<256x32xf32>
    %c1_36 = arith.constant 1 : index
    %c1_37 = arith.constant 1 : index
    %c0_38 = arith.constant 0 : index
    %c0_39 = arith.constant 0 : index
    %45 = vector.load %arg4[%c1_36, %c1_37, %c0_38, %c0_39] : memref<3x3x32x32xf32, #tpu.memory_space<vmem>>, vector<1x1x32x32xf32>
    %46 = vector.shape_cast %45 : vector<1x1x32x32xf32> to vector<32x32xf32>
    %cst_40 = arith.constant dense<0.000000e+00> : vector<256x32xf32>
    %47 = tpu.matmul %44, %46, %cst_40 {dimension_numbers = #tpu.dot_dimension_numbers<[1], [0], [0], [1], [0, 0, 1, 1], [], []>} : vector<256x32xf32>, vector<32x32xf32>, vector<256x32xf32> -> vector<256x32xf32>
    %48 = arith.addf %42, %47 : vector<256x32xf32>
    %49 = vector.extract_strided_slice %17 {offsets = [1, 2, 0], sizes = [16, 16, 32], strides = [1, 1, 1]} : vector<18x18x32xf32> to vector<16x16x32xf32>
    %50 = vector.shape_cast %49 : vector<16x16x32xf32> to vector<256x32xf32>
    %c1_41 = arith.constant 1 : index
    %c2_42 = arith.constant 2 : index
    %c0_43 = arith.constant 0 : index
    %c0_44 = arith.constant 0 : index
    %51 = vector.load %arg4[%c1_41, %c2_42, %c0_43, %c0_44] : memref<3x3x32x32xf32, #tpu.memory_space<vmem>>, vector<1x1x32x32xf32>
    %52 = vector.shape_cast %51 : vector<1x1x32x32xf32> to vector<32x32xf32>
    %cst_45 = arith.constant dense<0.000000e+00> : vector<256x32xf32>
    %53 = tpu.matmul %50, %52, %cst_45 {dimension_numbers = #tpu.dot_dimension_numbers<[1], [0], [0], [1], [0, 0, 1, 1], [], []>} : vector<256x32xf32>, vector<32x32xf32>, vector<256x32xf32> -> vector<256x32xf32>
    %54 = arith.addf %48, %53 : vector<256x32xf32>
    %55 = vector.extract_strided_slice %17 {offsets = [2, 0, 0], sizes = [16, 16, 32], strides = [1, 1, 1]} : vector<18x18x32xf32> to vector<16x16x32xf32>
    %56 = vector.shape_cast %55 : vector<16x16x32xf32> to vector<256x32xf32>
    %c2_46 = arith.constant 2 : index
    %c0_47 = arith.constant 0 : index
    %c0_48 = arith.constant 0 : index
    %c0_49 = arith.constant 0 : index
    %57 = vector.load %arg4[%c2_46, %c0_47, %c0_48, %c0_49] : memref<3x3x32x32xf32, #tpu.memory_space<vmem>>, vector<1x1x32x32xf32>
    %58 = vector.shape_cast %57 : vector<1x1x32x32xf32> to vector<32x32xf32>
    %cst_50 = arith.constant dense<0.000000e+00> : vector<256x32xf32>
    %59 = tpu.matmul %56, %58, %cst_50 {dimension_numbers = #tpu.dot_dimension_numbers<[1], [0], [0], [1], [0, 0, 1, 1], [], []>} : vector<256x32xf32>, vector<32x32xf32>, vector<256x32xf32> -> vector<256x32xf32>
    %60 = arith.addf %54, %59 : vector<256x32xf32>
    %61 = vector.extract_strided_slice %17 {offsets = [2, 1, 0], sizes = [16, 16, 32], strides = [1, 1, 1]} : vector<18x18x32xf32> to vector<16x16x32xf32>
    %62 = vector.shape_cast %61 : vector<16x16x32xf32> to vector<256x32xf32>
    %c2_51 = arith.constant 2 : index
    %c1_52 = arith.constant 1 : index
    %c0_53 = arith.constant 0 : index
    %c0_54 = arith.constant 0 : index
    %63 = vector.load %arg4[%c2_51, %c1_52, %c0_53, %c0_54] : memref<3x3x32x32xf32, #tpu.memory_space<vmem>>, vector<1x1x32x32xf32>
    %64 = vector.shape_cast %63 : vector<1x1x32x32xf32> to vector<32x32xf32>
    %cst_55 = arith.constant dense<0.000000e+00> : vector<256x32xf32>
    %65 = tpu.matmul %62, %64, %cst_55 {dimension_numbers = #tpu.dot_dimension_numbers<[1], [0], [0], [1], [0, 0, 1, 1], [], []>} : vector<256x32xf32>, vector<32x32xf32>, vector<256x32xf32> -> vector<256x32xf32>
    %66 = arith.addf %60, %65 : vector<256x32xf32>
    %67 = vector.extract_strided_slice %17 {offsets = [2, 2, 0], sizes = [16, 16, 32], strides = [1, 1, 1]} : vector<18x18x32xf32> to vector<16x16x32xf32>
    %68 = vector.shape_cast %67 : vector<16x16x32xf32> to vector<256x32xf32>
    %c2_56 = arith.constant 2 : index
    %c2_57 = arith.constant 2 : index
    %c0_58 = arith.constant 0 : index
    %c0_59 = arith.constant 0 : index
    %69 = vector.load %arg4[%c2_56, %c2_57, %c0_58, %c0_59] : memref<3x3x32x32xf32, #tpu.memory_space<vmem>>, vector<1x1x32x32xf32>
    %70 = vector.shape_cast %69 : vector<1x1x32x32xf32> to vector<32x32xf32>
    %cst_60 = arith.constant dense<0.000000e+00> : vector<256x32xf32>
    %71 = tpu.matmul %68, %70, %cst_60 {dimension_numbers = #tpu.dot_dimension_numbers<[1], [0], [0], [1], [0, 0, 1, 1], [], []>} : vector<256x32xf32>, vector<32x32xf32>, vector<256x32xf32> -> vector<256x32xf32>
    %72 = arith.addf %66, %71 : vector<256x32xf32>
    %73 = vector.shape_cast %72 : vector<256x32xf32> to vector<16x16x32xf32>
    %c0_61 = arith.constant 0 : index
    %c0_62 = arith.constant 0 : index
    %c0_63 = arith.constant 0 : index
    %c0_64 = arith.constant 0 : index
    %74 = vector.load %arg5[%c0_61, %c0_62, %c0_63, %c0_64] : memref<1x16x16x32xf32, #tpu.memory_space<vmem>>, vector<1x16x16x32xf32>
    %75 = vector.shape_cast %74 : vector<1x16x16x32xf32> to vector<16x16x32xf32>
    %76 = vector.shape_cast %73 : vector<16x16x32xf32> to vector<1x16x16x32xf32>
    tpu.vector_store %arg5[%c0_61, %c0_62, %c0_63, %c0_64], %76 {strides = array<i32>} : memref<1x16x16x32xf32, #tpu.memory_space<vmem>>, vector<1x16x16x32xf32>,
    %cst_65 = arith.constant dense<0.000000e+00> : vector<32xf32>
    %77 = vector.multi_reduction <add>, %72, %cst_65 [0] : vector<256x32xf32> to vector<32xf32>
    %78 = vector.shape_cast %77 : vector<32xf32> to vector<1x32xf32>
    %c0_66 = arith.constant 0 : index
    %c0_67 = arith.constant 0 : index
    %c0_68 = arith.constant 0 : index
    %79 = vector.load %arg6[%c0_66, %c0_67, %c0_68] : memref<1x1x32xf32, #tpu.memory_space<vmem>>, vector<1x1x32xf32>
    %80 = vector.shape_cast %79 : vector<1x1x32xf32> to vector<1x32xf32>
    %81 = vector.shape_cast %78 : vector<1x32xf32> to vector<1x1x32xf32>
    tpu.vector_store %arg6[%c0_66, %c0_67, %c0_68], %81 {strides = array<i32>} : memref<1x1x32xf32, #tpu.memory_space<vmem>>, vector<1x1x32xf32>,
    %82 = arith.mulf %72, %72 : vector<256x32xf32>
    %cst_69 = arith.constant dense<0.000000e+00> : vector<32xf32>
    %83 = vector.multi_reduction <add>, %82, %cst_69 [0] : vector<256x32xf32> to vector<32xf32>
    %84 = vector.shape_cast %83 : vector<32xf32> to vector<1x32xf32>
    %c0_70 = arith.constant 0 : index
    %c0_71 = arith.constant 0 : index
    %c0_72 = arith.constant 0 : index
    %85 = vector.load %arg7[%c0_70, %c0_71, %c0_72] : memref<1x1x32xf32, #tpu.memory_space<vmem>>, vector<1x1x32xf32>
    %86 = vector.shape_cast %85 : vector<1x1x32xf32> to vector<1x32xf32>
    %87 = vector.shape_cast %84 : vector<1x32xf32> to vector<1x1x32xf32>
    tpu.vector_store %arg7[%c0_70, %c0_71, %c0_72], %87 {strides = array<i32>} : memref<1x1x32xf32, #tpu.memory_space<vmem>>, vector<1x1x32xf32>,
    return
  }
  func.func @transform_0(%arg0: i32) -> (i32, i32, i32, i32) {
    %c0_i32 = arith.constant 0 : i32
    %c0_i32_0 = arith.constant 0 : i32
    %c0_i32_1 = arith.constant 0 : i32
    %c0_i32_2 = arith.constant 0 : i32
    return %arg0, %c0_i32, %c0_i32_0, %c0_i32_1 : i32, i32, i32, i32
  }
  func.func @transform_1(%arg0: i32) -> (i32, i32) {
    %c0_i32 = arith.constant 0 : i32
    %c0_i32_0 = arith.constant 0 : i32
    %c0_i32_1 = arith.constant 0 : i32
    return %c0_i32, %c0_i32_0 : i32, i32
  }
  func.func @transform_2(%arg0: i32) -> (i32, i32) {
    %c0_i32 = arith.constant 0 : i32
    %c0_i32_0 = arith.constant 0 : i32
    %c0_i32_1 = arith.constant 0 : i32
    return %c0_i32, %c0_i32_0 : i32, i32
  }
  func.func @transform_3(%arg0: i32) -> (i32, i32, i32, i32) {
    %c0_i32 = arith.constant 0 : i32
    %c0_i32_0 = arith.constant 0 : i32
    %c0_i32_1 = arith.constant 0 : i32
    %c0_i32_2 = arith.constant 0 : i32
    %c0_i32_3 = arith.constant 0 : i32
    return %c0_i32, %c0_i32_0, %c0_i32_1, %c0_i32_2 : i32, i32, i32, i32
  }
  func.func @transform_4(%arg0: i32) -> (i32, i32, i32, i32) {
    %c0_i32 = arith.constant 0 : i32
    %c0_i32_0 = arith.constant 0 : i32
    %c0_i32_1 = arith.constant 0 : i32
    %c0_i32_2 = arith.constant 0 : i32
    return %arg0, %c0_i32, %c0_i32_0, %c0_i32_1 : i32, i32, i32, i32
  }
  func.func @transform_5(%arg0: i32) -> (i32, i32, i32) {
    %c0_i32 = arith.constant 0 : i32
    %c0_i32_0 = arith.constant 0 : i32
    %c0_i32_1 = arith.constant 0 : i32
    return %arg0, %c0_i32, %c0_i32_0 : i32, i32, i32
  }
  func.func @transform_6(%arg0: i32) -> (i32, i32, i32) {
    %c0_i32 = arith.constant 0 : i32
    %c0_i32_0 = arith.constant 0 : i32
    %c0_i32_1 = arith.constant 0 : i32
    return %arg0, %c0_i32, %c0_i32_0 : i32, i32, i32
  }
}

module attributes {stable_mosaic.version = 11 : i64} {
  func.func @_bn_relu_kernel(%arg0: i32, %arg1: memref<1x16x512xf32, #tpu.memory_space<vmem>>, %arg2: memref<1x512xf32, #tpu.memory_space<vmem>>, %arg3: memref<1x512xf32, #tpu.memory_space<vmem>>, %arg4: memref<1x16x512xf32, #tpu.memory_space<vmem>>) attributes {dimension_semantics = [#tpu.dimension_semantics<parallel>], iteration_bounds = array<i64: 2>, scalar_prefetch = 0 : i64, scratch_operands = 0 : i64, tpu.core_type = #tpu.core_type<tc>, window_params = [{transform_indices = @transform_0, window_bounds = array<i64: 1, 16, 512>}, {pipeline_mode = #tpu.pipeline_mode<synchronous>, transform_indices = @transform_1, window_bounds = array<i64: 1, 512>}, {pipeline_mode = #tpu.pipeline_mode<synchronous>, transform_indices = @transform_2, window_bounds = array<i64: 1, 512>}, {transform_indices = @transform_3, window_bounds = array<i64: 1, 16, 512>}]} {
    %c0 = arith.constant 0 : index
    %c0_0 = arith.constant 0 : index
    %c0_1 = arith.constant 0 : index
    %0 = vector.load %arg1[%c0, %c0_0, %c0_1] : memref<1x16x512xf32, #tpu.memory_space<vmem>>, vector<1x16x512xf32>
    %c0_2 = arith.constant 0 : index
    %c0_3 = arith.constant 0 : index
    %1 = vector.load %arg2[%c0_2, %c0_3] : memref<1x512xf32, #tpu.memory_space<vmem>>, vector<1x512xf32>
    %2 = vector.shape_cast %1 : vector<1x512xf32> to vector<512xf32>
    %3 = vector.shape_cast %2 : vector<512xf32> to vector<1x1x512xf32>
    %4 = vector.broadcast %3 : vector<1x1x512xf32> to vector<1x16x512xf32>
    %5 = arith.mulf %0, %4 : vector<1x16x512xf32>
    %c0_4 = arith.constant 0 : index
    %c0_5 = arith.constant 0 : index
    %6 = vector.load %arg3[%c0_4, %c0_5] : memref<1x512xf32, #tpu.memory_space<vmem>>, vector<1x512xf32>
    %7 = vector.shape_cast %6 : vector<1x512xf32> to vector<512xf32>
    %8 = vector.shape_cast %7 : vector<512xf32> to vector<1x1x512xf32>
    %9 = vector.broadcast %8 : vector<1x1x512xf32> to vector<1x16x512xf32>
    %10 = arith.addf %5, %9 : vector<1x16x512xf32>
    %cst = arith.constant 0.000000e+00 : f32
    %11 = vector.broadcast %cst : f32 to vector<1x16x512xf32>
    %12 = arith.maximumf %10, %11 : vector<1x16x512xf32>
    %c0_6 = arith.constant 0 : index
    %c0_7 = arith.constant 0 : index
    %c0_8 = arith.constant 0 : index
    %13 = vector.load %arg4[%c0_6, %c0_7, %c0_8] : memref<1x16x512xf32, #tpu.memory_space<vmem>>, vector<1x16x512xf32>
    tpu.vector_store %arg4[%c0_6, %c0_7, %c0_8], %12 {strides = array<i32>} : memref<1x16x512xf32, #tpu.memory_space<vmem>>, vector<1x16x512xf32>,
    return
  }
  func.func @transform_0(%arg0: i32) -> (i32, i32, i32) {
    %c0_i32 = arith.constant 0 : i32
    %c0_i32_0 = arith.constant 0 : i32
    %c0_i32_1 = arith.constant 0 : i32
    return %arg0, %c0_i32, %c0_i32_0 : i32, i32, i32
  }
  func.func @transform_1(%arg0: i32) -> (i32, i32) {
    %c0_i32 = arith.constant 0 : i32
    %c0_i32_0 = arith.constant 0 : i32
    %c0_i32_1 = arith.constant 0 : i32
    return %c0_i32, %c0_i32_0 : i32, i32
  }
  func.func @transform_2(%arg0: i32) -> (i32, i32) {
    %c0_i32 = arith.constant 0 : i32
    %c0_i32_0 = arith.constant 0 : i32
    %c0_i32_1 = arith.constant 0 : i32
    return %c0_i32, %c0_i32_0 : i32, i32
  }
  func.func @transform_3(%arg0: i32) -> (i32, i32, i32) {
    %c0_i32 = arith.constant 0 : i32
    %c0_i32_0 = arith.constant 0 : i32
    %c0_i32_1 = arith.constant 0 : i32
    return %arg0, %c0_i32, %c0_i32_0 : i32, i32, i32
  }
}

</mosaic_0001>

<bundles_post_ra>
// kernel: tile.18
= control target key start
LH: loop header
LB: loop body
LE: loop exit
PB: predicated region body
PF: predicated region fallthrough
CT: control target
= control target key end

     0   :  { %s28_s0 = inlined_call_operand.vmem [shape: f32[32], index: 0, kind: input, shape index: {}]   ;;  %s29_s1 = inlined_call_operand.vmem [shape: f32[16,32], index: 1, kind: output, shape index: {}]  }
   0x1   :  { %v4_v0 = vld [vmem:[%s28_s0] ss:$0 sm:$0xff] }
   0x2   :  { %5 = vst [vmem:[%s29_s1] sm:$0xff] %v4_v0  ;;  %8 = vst [vmem:[%s29_s1 + $0x8] sm:$0xff] %v4_v0 }

// kernel: tile.19
= control target key start
LH: loop header
LB: loop body
LE: loop exit
PB: predicated region body
PF: predicated region fallthrough
CT: control target
= control target key end

     0   :  { %s57_s8 = smov 96   ;;  %vm3_vm0 = vcmask 261120   ;;  %s59_s15 = smov 64   ;;  %vm9_vm1 = vcmask 1048320   ;;  %vm15_vm2 = vcmask 785920   ;;  %vm21_vm3 = vcmask 523520   ;;  %s94_s0 = inlined_call_operand.vmem [shape: f32[16,32], index: 0, kind: input, shape index: {}]   ;;  %s95_s1 = inlined_call_operand.vmem [shape: f32[1,512], index: 1, kind: output, shape index: {}]  }
   0x1   :  { %v48_v0 = vld [vmem:[%s94_s0 + $0x3] ss:$4 sm:$0xf]   ;;  %v49_v1 = vld [vmem:[%s94_s0 + $0x2] ss:$4 sm:$0xf]  }
   0x2   :  { %7 = vrot.lane.b32.xlu0 %v48_v0, %s57_s8  ;;  %v50_v2 = vld [vmem:[%s94_s0 + $0x1] ss:$4 sm:$0xf]   ;;  %v2_v3 = vld [vmem:[%s94_s0] ss:$4 sm:$0xf]  }
   0x3   :  { %s58_s0 = smov 32   ;;  %4 = vst.msk [vmem:[#allocation0] ss:$8 sm:$0xf] %vm3_vm0, %v2_v3  }
   0x4   :  { %19 = vrot.lane.b32.xlu1 %v50_v2, %s58_s0 }
   0x6   :  { %13 = vrot.lane.b32.xlu0 %v49_v1, %s59_s15 }
  0x74   :  { %v8_v4 = vpop.permute.xlu0 %7  }
  0x75   :  { %10 = vst.msk [vmem:[#allocation0] ss:$8 sm:$0xf] %vm9_vm1, %v8_v4  }
  0x76   :  { %v20_v5 = vpop.permute.xlu1 %19  }
  0x78   :  { %v14_v6 = vpop.permute.xlu0 %13  }
  0x79   :  { %16 = vst.msk [vmem:[#allocation0] ss:$8 sm:$0xf] %vm15_vm2, %v14_v6  }
  0x7a   :  { %22 = vst.msk [vmem:[#allocation0] ss:$8 sm:$0xf] %vm21_vm3, %v20_v5  }
  0x81   :  { %v26_v7 = vld [vmem:[#allocation0] sm:$0x1]  ;;  %v30_v8 = vld [vmem:[#allocation0 + $0x8] sm:$0x1]  ;;  %v35_v9 = vld [vmem:[#allocation0 + $0x10] sm:$0x1] }
  0x82   :  { %28 = vst [vmem:[%s95_s1] sm:$0x1] %v26_v7  ;;  %51 = vst [vmem:[%s95_s1 + $0x1] sm:$0x1] %v30_v8  ;;  %v41_v10 = vld [vmem:[#allocation0 + $0x18] sm:$0x1] }
  0x83   :  { %52 = vst [vmem:[%s95_s1 + $0x2] sm:$0x1] %v35_v9  ;;  %53 = vst [vmem:[%s95_s1 + $0x3] sm:$0x1] %v41_v10 }

// kernel: two_conv_bn_relu_back.5
= control target key start
LH: loop header
LB: loop body
LE: loop exit
PB: predicated region body
PF: predicated region fallthrough
CT: control target
= control target key end

     0   :  { %s359_s12 = smov 0   ;;  %s389_s0 = inlined_call_operand.vmem [shape: f32[2,16,512], index: 0, kind: input, shape index: {}]   ;;  %s390_s1 = inlined_call_operand.vmem [shape: f32[1,512], index: 1, kind: input, shape index: {}]   ;;  %s391_s2 = inlined_call_operand.vmem [shape: f32[1,512], index: 2, kind: input, shape index: {}]   ;;  %s392_s3 = inlined_call_operand.vmem [shape: f32[2,16,512], index: 3, kind: output, shape index: {}]  }
   0x1 LB: > { %s310_s13 = sadd.s32 4294967295, %s337_s12   ;;  %p314_p0 = scmp.ge.s32.totalorder %s337_s12, 1  ;;  %s337_s12 = sphi %s359_s12, %s13_s12  }
   0x2   : > { %p137_p1 = scmp.lt.s32.totalorder %s337_s12, 3 }
   0x4   : > { %p138_p2 = pnand %p314_p0, %p137_p1 }
   0x5   : > { %p161_p3 = scmp.lt.s32.totalorder (!%p138_p2), %s310_s13, 1  ;;  %v181_v0 = vlaneseq (!%p138_p2)  ;;  %v179_v2 = vld [vmem:[%s390_s1] sm:$0xf] (!%p138_p2) }
   0x6   : > { %141 = sbr.rel (%p138_p2) target bundleno = 27 (0x1b), region = 32  ;;  %v209_v3 = vld [vmem:[%s391_s2] sm:$0xf] (!%p138_p2) }
   0x7   : > { %v182_v1 = vshrl.u32 (!%p138_p2), %v181_v0, 7 }
   0x9   : > { %v183_v4 = vsub.s32 (!%p138_p2), 0, %v182_v1  ;;  %v187_v5 = vsub.s32 (!%p138_p2), 1, %v182_v1  ;;  %v191_v6 = vsub.s32 (!%p138_p2), 2, %v182_v1  ;;  %v195_v7 = vsub.s32 (!%p138_p2), 3, %v182_v1 }
   0xb   : > { %v184_v9 = vrot.slane (!%p138_p2), %v179_v2, %v183_v4  ;;  %v214_v10 = vrot.slane (!%p138_p2), %v209_v3, %v183_v4  ;;  %v188_v12 = vrot.slane (!%p138_p2), %v179_v2, %v187_v5  ;;  %v218_v13 = vrot.slane (!%p138_p2), %v209_v3, %v187_v5 }
   0xc   : > { %v192_v15 = vrot.slane (!%p138_p2), %v179_v2, %v191_v6  ;;  %v222_v16 = vrot.slane (!%p138_p2), %v209_v3, %v191_v6  ;;  %v196_v18 = vrot.slane (!%p138_p2), %v179_v2, %v195_v7  ;;  %v226_v19 = vrot.slane (!%p138_p2), %v209_v3, %v195_v7 }
   0xd   : > { %s394_s13 = smov (!%p161_p3, %s310_s13), 1 }
   0xe   : > { %s321_s18 = sshll.u32 %s394_s13, 6 }
   0xf   : > { %s165_s21 = scalar_lea.vmem %s389_s0, %s321_s18  ;;  %s170_s24 = scalar_lea.vmem %s392_s3, %s321_s18 }
  0x10   : > { %v171_v8 = vld [vmem:[%s165_s21] sm:$0xff]  ;;  %v172_v11 = vld [vmem:[%s165_s21 + $0x8] sm:$0xff]  ;;  %v173_v14 = vld [vmem:[%s165_s21 + $0x10] sm:$0xff] }
  0x11   : > { %v174_v17 = vld [vmem:[%s165_s21 + $0x18] sm:$0xff]  ;;  %v175_v20 = vld [vmem:[%s165_s21 + $0x20] sm:$0xff]  ;;  %v176_v21 = vld [vmem:[%s165_s21 + $0x28] sm:$0xff]  ;;  %v201_v22 = vmul.f32 %v184_v9, %v171_v8  ;;  %v202_v23 = vmul.f32 %v188_v12, %v172_v11  ;;  %v203_v28 = vmul.f32 %v192_v15, %v173_v14 }
  0x12   : > { %v205_v24 = vmul.f32 %v184_v9, %v175_v20  ;;  %v206_v25 = vmul.f32 %v188_v12, %v176_v21  ;;  %v177_v26 = vld [vmem:[%s165_s21 + $0x30] sm:$0xff]  ;;  %v178_v27 = vld [vmem:[%s165_s21 + $0x38] sm:$0xff]  ;;  %v204_v29 = vmul.f32 %v196_v18, %v174_v17 }
  0x13   : > { %v207_v30 = vmul.f32 %v192_v15, %v177_v26  ;;  %v208_v31 = vmul.f32 %v196_v18, %v178_v27  ;;  %v231_v32 = vadd.f32 %v214_v10, %v201_v22  ;;  %v232_v33 = vadd.f32 %v218_v13, %v202_v23 }
  0x14   : > { %v235_v34 = vadd.f32 %v214_v10, %v205_v24  ;;  %v236_v35 = vadd.f32 %v218_v13, %v206_v25  ;;  %v233_v36 = vadd.f32 %v222_v16, %v203_v28  ;;  %v234_v37 = vadd.f32 %v226_v19, %v204_v29 }
  0x15   : > { %v237_v38 = vadd.f32 %v222_v16, %v207_v30  ;;  %v238_v39 = vadd.f32 %v226_v19, %v208_v31  ;;  %v239_v40 = vmax.f32 %v231_v32, 0.0  ;;  %v240_v41 = vmax.f32 %v232_v33, 0.0 }
  0x16   : > { %v243_v42 = vmax.f32 %v235_v34, 0.0  ;;  %v244_v43 = vmax.f32 %v236_v35, 0.0  ;;  %v241_v44 = vmax.f32 %v233_v36, 0.0  ;;  %v242_v45 = vmax.f32 %v234_v37, 0.0 }
  0x17   : > { %v245_v46 = vmax.f32 %v237_v38, 0.0  ;;  %v246_v47 = vmax.f32 %v238_v39, 0.0  ;;  %247 = vst [vmem:[%s170_s24] sm:$0xff] %v239_v40  ;;  %248 = vst [vmem:[%s170_s24 + $0x8] sm:$0xff] %v240_v41 }
  0x18   : > { %251 = vst [vmem:[%s170_s24 + $0x20] sm:$0xff] %v243_v42  ;;  %252 = vst [vmem:[%s170_s24 + $0x28] sm:$0xff] %v244_v43 }
  0x19   : > { %249 = vst [vmem:[%s170_s24 + $0x10] sm:$0xff] %v241_v44  ;;  %250 = vst [vmem:[%s170_s24 + $0x18] sm:$0xff] %v242_v45 }
  0x1a   : > { %253 = vst [vmem:[%s170_s24 + $0x30] sm:$0xff] %v245_v46  ;;  %254 = vst [vmem:[%s170_s24 + $0x38] sm:$0xff] %v246_v47 }
  0x1b PF: > { %s13_s12 = sadd.s32 1, %s337_s12  }
  0x1c   : > { %p10_p4 = scmp.ge.s32.totalorder %s13_s12, 4  }
  0x1e   :  { %12 = sbr.rel (!%p10_p4) target bundleno = 1 (0x1), region = 62 }

// kernel: two_conv_bn_relu_back.3
= control target key start
LH: loop header
LB: loop body
LE: loop exit
PB: predicated region body
PF: predicated region fallthrough
CT: control target
= control target key end

     0   :  { %s5312_s21 = smov 0   ;;  %s6854_s0 = inlined_call_operand.vmem [shape: f32[2,16,16,64], index: 0, kind: input, shape index: {}]   ;;  %s6855_s1 = inlined_call_operand.vmem [shape: f32[1,64], index: 1, kind: input, shape index: {}]   ;;  %s6856_s2 = inlined_call_operand.vmem [shape: f32[1,64], index: 2, kind: input, shape index: {}]   ;;  %s6857_s3 = inlined_call_operand.vmem [shape: f32[3,3,64,32], index: 3, kind: input, shape index: {}]   ;;  %s6858_s4 = inlined_call_operand.vmem [shape: f32[2,16,16,32], index: 4, kind: output, shape index: {0}]   ;;  %s6859_s5 = inlined_call_operand.vmem [shape: f32[2,1,32], index: 5, kind: output, shape index: {1}]   ;;  %s6860_s6 = inlined_call_operand.vmem [shape: f32[2,1,32], index: 6, kind: output, shape index: {2}]  }
   0x1 LB: > { %s3536_s1 = sadd.s32 4294967295, %s5274_s21   ;;  %p3540_p0 = scmp.ge.s32.totalorder %s5274_s21, 1  ;;  %s5274_s21 = sphi %s5312_s21, %s17_s21  }
   0x2   : > { %p217_p1 = scmp.lt.s32.totalorder %s5274_s21, 3 }
   0x4   : > { %p218_p2 = pnand %p3540_p0, %p217_p1 }
   0x6   : > { %221 = sbr.rel (%p218_p2) target bundleno = 574 (0x23e), region = 36 }
   0xd   : > { %v3545_v0 = vld [vmem:[%s6857_s3 + $0x40] sm:$0xff]  ;;  %v3546_v1 = vld [vmem:[%s6857_s3 + $0x48] sm:$0xff]  ;;  %vm301_vm0 = vcmask 523264   ;;  %v3547_v5 = vld [vmem:[%s6857_s3 + $0x50] sm:$0xff]  ;;  %v5276_v7 = vmov 0.0   ;;  %p5378_p3 = scmp.lt.s32.totalorder %s3536_s1, 1 }
   0xe   : > { %v3697_v2 = vld [vmem:[%s6857_s3 + $0x100] sm:$0xff]  ;;  %v5329_v3 = vpack.c.bf16 %v3546_v1, %v3545_v0  ;;  %v3698_v4 = vld [vmem:[%s6857_s3 + $0x108] sm:$0xff]  ;;  %v3548_v6 = vld [vmem:[%s6857_s3 + $0x58] sm:$0xff]  ;;  %302 = vst.msk [vmem:[#allocation2] sm:$0xff] %vm301_vm0, %v5276_v7  ;;  %vm304_vm1 = vcmask 517120   ;;  %vm500_vm2 = vcmask 1046528  }
   0xf   : > { %303 = vst.msk [vmem:[#allocation2 + $0x8] sm:$0xff] %vm301_vm0, %v5276_v7  ;;  %306 = vst.msk [vmem:[#allocation2 + $0x18] sm:$0xff] %vm301_vm0, %v5276_v7  ;;  %v5382_v8 = vpack.c.bf16 %v3698_v4, %v3697_v2  ;;  %v4841_v9 = vpack.c.bf16 %v3548_v6, %v3547_v5  ;;  %v3699_v10 = vld [vmem:[%s6857_s3 + $0x110] sm:$0xff]  ;;  %v3700_v11 = vld [vmem:[%s6857_s3 + $0x118] sm:$0xff]  ;;  %s7031_s1 = smov (!%p5378_p3, %s3536_s1), 1  ;;  %vm1168_vm3 = vcmask 1045504  }
  0x10   : > { %307 = vst.msk [vmem:[#allocation2 + $0x20] sm:$0xff] %vm301_vm0, %v5276_v7  ;;  %309 = vst.msk [vmem:[#allocation2 + $0x30] sm:$0xff] %vm301_vm0, %v5276_v7  ;;  %v3549_v12 = vld [vmem:[%s6857_s3 + $0x60] sm:$0xff]  ;;  %4838 = vmatprep.subr.bf16.mxu1 %v5329_v3  ;;  %v5412_v13 = vpack.c.bf16 %v3700_v11, %v3699_v10  ;;  %v3550_v14 = vld [vmem:[%s6857_s3 + $0x68] sm:$0xff]  ;;  %s3899_s24 = sshll.u32 %s7031_s1, 8  ;;  %vm3225_vm4 = vcmask 261120   ;;  %s265_s12 = scalar_lea.vmem %s6859_s5, %s7031_s1 }
  0x11   : > { %310 = vst.msk [vmem:[#allocation2 + $0x38] sm:$0xff] %vm301_vm0, %v5276_v7  ;;  %312 = vst.msk [vmem:[#allocation2 + $0x48] sm:$0xff] %vm301_vm0, %v5276_v7  ;;  %v3701_v15 = vld [vmem:[%s6857_s3 + $0x120] sm:$0xff]  ;;  %v3702_v16 = vld [vmem:[%s6857_s3 + $0x128] sm:$0xff]  ;;  %4902 = vmatprep.subr.bf16.mxu0 %v5382_v8  ;;  %4840 = vmatpush3.bf16.msra.mxu1 %v5329_v3  ;;  %v4845_v17 = vpack.c.bf16 %v3550_v14, %v3549_v12  ;;  %s5453_s9 = scalar_lea.vmem %s6854_s0, %s3899_s24  ;;  %s6705_s10 = scalar_lea.vmem %s6858_s4, %s3899_s24  ;;  %vm3327_vm5 = vcmask 253952  }
  0x12   : > { %313 = vst.msk [vmem:[#allocation2 + $0x50] sm:$0xff] %vm301_vm0, %v5276_v7  ;;  %315 = vst.msk [vmem:[#allocation2 + $0x60] sm:$0xff] %vm301_vm0, %v5276_v7  ;;  %4904 = vmatpush3.bf16.msra.mxu0 %v5382_v8  ;;  %4842 = vmatprep.subr.bf16.mxu1 %v4841_v9  ;;  %v3551_v18 = vld [vmem:[%s6857_s3 + $0x70] sm:$0xff]  ;;  %v5437_v19 = vpack.c.bf16 %v3702_v16, %v3701_v15  ;;  %v3552_v20 = vld [vmem:[%s6857_s3 + $0x78] sm:$0xff]  ;;  %s268_s15 = scalar_lea.vmem %s6860_s6, %s7031_s1 }
  0x13   : > { %316 = vst.msk [vmem:[#allocation2 + $0x68] sm:$0xff] %vm301_vm0, %v5276_v7  ;;  %318 = vst.msk [vmem:[#allocation2 + $0x78] sm:$0xff] %vm301_vm0, %v5276_v7  ;;  %4906 = vmatprep.subr.bf16.mxu0 %v5412_v13  ;;  %v3703_v21 = vld [vmem:[%s6857_s3 + $0x130] sm:$0xff]  ;;  %v3704_v22 = vld [vmem:[%s6857_s3 + $0x138] sm:$0xff]  ;;  %v4849_v31 = vpack.c.bf16 %v3552_v20, %v3551_v18 }
  0x14   : > { %319 = vst.msk [vmem:[#allocation2 + $0x80] sm:$0xff] %vm301_vm0, %v5276_v7  ;;  %321 = vst.msk [vmem:[#allocation2 + $0x90] sm:$0xff] %vm301_vm0, %v5276_v7  ;;  %v269_v23 = vld [vmem:[%s5453_s9] sm:$0xff]  ;;  %v270_v24 = vld [vmem:[%s5453_s9 + $0x8] sm:$0xff]  ;;  %v5481_v37 = vpack.c.bf16 %v3704_v22, %v3703_v21 }
  0x15   : > { %322 = vst.msk [vmem:[#allocation2 + $0x98] sm:$0xff] %vm301_vm0, %v5276_v7  ;;  %324 = vst.msk [vmem:[#allocation2 + $0xa8] sm:$0xff] %vm301_vm0, %v5276_v7  ;;  %v271_v25 = vld [vmem:[%s5453_s9 + $0x10] sm:$0xff]  ;;  %4844 = vmatpush3.bf16.msra.mxu1 %v4841_v9  ;;  %v5458_v26 = vld [vmem:[#allocation2] sm:$0xff] }
  0x16   : > { %325 = vst.msk [vmem:[#allocation2 + $0xb0] sm:$0xff] %vm301_vm0, %v5276_v7  ;;  %327 = vst.msk [vmem:[#allocation2 + $0xc0] sm:$0xff] %vm301_vm0, %v5276_v7  ;;  %v5460_v27 = vld [vmem:[#allocation2 + $0x8] sm:$0xff]  ;;  %v444_v28 = vld [vmem:[%s6857_s3] sm:$0xff]  ;;  %4908 = vmatpush3.bf16.msra.mxu0 %v5412_v13  ;;  %4846 = vmatprep.subr.bf16.mxu1 %v4845_v17  ;;  %v501_v32 = vrot.slane %v5458_v26, 1 }
  0x17   : > { %328 = vst.msk [vmem:[#allocation2 + $0xc8] sm:$0xff] %vm301_vm0, %v5276_v7  ;;  %330 = vst.msk [vmem:[#allocation2 + $0xd8] sm:$0xff] %vm301_vm0, %v5276_v7  ;;  %v445_v29 = vld [vmem:[%s6857_s3 + $0x8] sm:$0xff]  ;;  %v272_v30 = vld [vmem:[%s5453_s9 + $0x18] sm:$0xff]  ;;  %v502_v33 = vrot.slane %v5460_v27, 1  ;;  %4910 = vmatprep.subr.bf16.mxu0 %v5437_v19 }
  0x18   : > { %331 = vst.msk [vmem:[#allocation2 + $0xe0] sm:$0xff] %vm301_vm0, %v5276_v7  ;;  %333 = vst.msk [vmem:[#allocation2 + $0xf0] sm:$0xff] %vm301_vm0, %v5276_v7  ;;  %v273_v35 = vld [vmem:[%s5453_s9 + $0x20] sm:$0xff]  ;;  %v274_v36 = vld [vmem:[%s5453_s9 + $0x28] sm:$0xff]  ;;  %v4853_v47 = vpack.c.bf16 %v445_v29, %v444_v28 }
  0x19   : > { %334 = vst.msk [vmem:[#allocation2 + $0xf8] sm:$0xff] %vm301_vm0, %v5276_v7  ;;  %336 = vst.msk [vmem:[#allocation2 + $0x108] sm:$0xff] %vm301_vm0, %v5276_v7  ;;  %v3737_v38 = vld [vmem:[%s6857_s3 + $0x140] sm:$0xff]  ;;  %v275_v39 = vld [vmem:[%s5453_s9 + $0x30] sm:$0xff]  ;;  %v503_v41 = vsel %vm500_vm2, %v501_v32, %v502_v33  ;;  %4848 = vmatpush3.bf16.msra.mxu1 %v4845_v17 }
  0x1a   : > { %337 = vst.msk [vmem:[#allocation2 + $0x110] sm:$0xff] %vm301_vm0, %v5276_v7  ;;  %339 = vst.msk [vmem:[#allocation2 + $0x120] sm:$0xff] %vm301_vm0, %v5276_v7  ;;  %v276_v40 = vld [vmem:[%s5453_s9 + $0x38] sm:$0xff]  ;;  %v3738_v42 = vld [vmem:[%s6857_s3 + $0x148] sm:$0xff]  ;;  %4277 = vmatprep.mubr.msk.f32.mxu1 %vm301_vm0, %v503_v41  ;;  %4912 = vmatpush3.bf16.msra.mxu0 %v5437_v19 }
  0x1b   : > { %340 = vst.msk [vmem:[#allocation2 + $0x128] sm:$0xff] %vm301_vm0, %v5276_v7  ;;  %342 = vst.msk [vmem:[#allocation2 + $0x138] sm:$0xff] %vm301_vm0, %v5276_v7  ;;  %v277_v43 = vld [vmem:[%s5453_s9 + $0x40] sm:$0xff]  ;;  %v278_v44 = vld [vmem:[%s5453_s9 + $0x48] sm:$0xff]  ;;  %4850 = vmatprep.subr.bf16.mxu1 %v4849_v31  ;;  %4914 = vmatprep.subr.bf16.mxu0 %v5481_v37  ;;  %v4917_v51 = vpack.c.bf16 %v3738_v42, %v3737_v38 }
  0x1c   : > { %343 = vst.msk [vmem:[#allocation2 + $0x140] sm:$0xff] %vm301_vm0, %v5276_v7  ;;  %345 = vst.msk [vmem:[#allocation2 + $0x150] sm:$0xff] %vm301_vm0, %v5276_v7  ;;  %v3739_v46 = vld [vmem:[%s6857_s3 + $0x150] sm:$0xff]  ;;  %v280_v49 = vld [vmem:[%s5453_s9 + $0x58] sm:$0xff] }
  0x1d   : > { %346 = vst.msk [vmem:[#allocation2 + $0x158] sm:$0xff] %vm301_vm0, %v5276_v7  ;;  %348 = vst.msk [vmem:[#allocation2 + $0x168] sm:$0xff] %vm301_vm0, %v5276_v7  ;;  %v279_v48 = vld [vmem:[%s5453_s9 + $0x50] sm:$0xff]  ;;  %v281_v50 = vld [vmem:[%s5453_s9 + $0x60] sm:$0xff]  ;;  %4852 = vmatpush3.bf16.msra.mxu1 %v4849_v31 }
  0x1e   : > { %349 = vst.msk [vmem:[#allocation2 + $0x170] sm:$0xff] %vm301_vm0, %v5276_v7  ;;  %351 = vst.msk [vmem:[#allocation2 + $0x180] sm:$0xff] %vm301_vm0, %v5276_v7  ;;  %v3740_v52 = vld [vmem:[%s6857_s3 + $0x158] sm:$0xff]  ;;  %v446_v53 = vld [vmem:[%s6857_s3 + $0x10] sm:$0xff]  ;;  %4916 = vmatpush3.bf16.msra.mxu0 %v5481_v37  ;;  %4854 = vmatprep.subr.bf16.mxu1 %v4853_v47 }
  0x1f   : > { %352 = vst.msk [vmem:[#allocation2 + $0x188] sm:$0xff] %vm301_vm0, %v5276_v7  ;;  %354 = vst.msk [vmem:[#allocation2 + $0x198] sm:$0xff] %vm301_vm0, %v5276_v7  ;;  %v282_v54 = vld [vmem:[%s5453_s9 + $0x68] sm:$0xff]  ;;  %v447_v0 = vld [vmem:[%s6857_s3 + $0x18] sm:$0xff]  ;;  %v4921_v6 = vpack.c.bf16 %v3740_v52, %v3739_v46  ;;  %4918 = vmatprep.subr.bf16.mxu0 %v4917_v51 }
  0x20   : > { %355 = vst.msk [vmem:[#allocation2 + $0x1a0] sm:$0xff] %vm301_vm0, %v5276_v7  ;;  %6933 = vst [vmem:[#allocation3_spill] sm:$0xff] %v5382_v8  ;;  %v3741_v14 = vld [vmem:[%s6857_s3 + $0x160] sm:$0xff]  ;;  %v4857_v20 = vpack.c.bf16 %v447_v0, %v446_v53  ;;  %v3742_v21 = vld [vmem:[%s6857_s3 + $0x168] sm:$0xff] }
  0x21   : > { %308 = vst.msk [vmem:[#allocation2 + $0x28] sm:$0x3] %vm304_vm1, %v5276_v7  ;;  %305 = vst.msk [vmem:[#allocation2 + $0x10] sm:$0x3] %vm304_vm1, %v5276_v7  ;;  %v284_v38 = vld [vmem:[%s5453_s9 + $0x78] sm:$0xff]  ;;  %v449_v42 = vld [vmem:[%s6857_s3 + $0x28] sm:$0xff] }
  0x22   : > { %311 = vst.msk [vmem:[#allocation2 + $0x40] sm:$0x3] %vm304_vm1, %v5276_v7  ;;  %314 = vst.msk [vmem:[#allocation2 + $0x58] sm:$0x3] %vm304_vm1, %v5276_v7  ;;  %v291_v0 = vld [vmem:[%s5453_s9 + $0xb0] sm:$0xff] }
  0x23   : > { %317 = vst.msk [vmem:[#allocation2 + $0x70] sm:$0x3] %vm304_vm1, %v5276_v7  ;;  %320 = vst.msk [vmem:[#allocation2 + $0x88] sm:$0x3] %vm304_vm1, %v5276_v7 }
  0x24   : > { %323 = vst.msk [vmem:[#allocation2 + $0xa0] sm:$0x3] %vm304_vm1, %v5276_v7  ;;  %326 = vst.msk [vmem:[#allocation2 + $0xb8] sm:$0x3] %vm304_vm1, %v5276_v7 }
  0x25   : > { %329 = vst.msk [vmem:[#allocation2 + $0xd0] sm:$0x3] %vm304_vm1, %v5276_v7  ;;  %332 = vst.msk [vmem:[#allocation2 + $0xe8] sm:$0x3] %vm304_vm1, %v5276_v7 }
  0x26   : > { %335 = vst.msk [vmem:[#allocation2 + $0x100] sm:$0x3] %vm304_vm1, %v5276_v7  ;;  %338 = vst.msk [vmem:[#allocation2 + $0x118] sm:$0x3] %vm304_vm1, %v5276_v7 }
  0x27   : > { %341 = vst.msk [vmem:[#allocation2 + $0x130] sm:$0x3] %vm304_vm1, %v5276_v7  ;;  %344 = vst.msk [vmem:[#allocation2 + $0x148] sm:$0x3] %vm304_vm1, %v5276_v7 }
  0x28   : > { %347 = vst.msk [vmem:[#allocation2 + $0x160] sm:$0x3] %vm304_vm1, %v5276_v7  ;;  %350 = vst.msk [vmem:[#allocation2 + $0x178] sm:$0x3] %vm304_vm1, %v5276_v7  ;;  %v5475_v34 = vld [vmem:[#allocation2 + $0x10] sm:$0x3] }
  0x29   : > { %353 = vst.msk [vmem:[#allocation2 + $0x190] sm:$0x3] %vm304_vm1, %v5276_v7  ;;  %356 = vst.msk [vmem:[#allocation2 + $0x1a8] sm:$0x3] %vm304_vm1, %v5276_v7  ;;  %v504_v45 = vrot.slane %v5475_v34, 1 }
  0x2a   : > { %6934 = vst [vmem:[#allocation4_spill] sm:$0xff] %v5412_v13  ;;  %6935 = vst [vmem:[#allocation5_spill] sm:$0xff] %v5437_v19 }
  0x2b   : > { %358 = vst.msk [vmem:[#allocation2 + $0x19] sm:$0xff] %vm301_vm0, %v269_v23  ;;  %359 = vst.msk [vmem:[#allocation2 + $0x21] sm:$0xff] %vm301_vm0, %v270_v24  ;;  %v505_v60 = vsel %vm500_vm2, %v502_v33, %v504_v45  ;;  %v3743_v24 = vld [vmem:[%s6857_s3 + $0x170] sm:$0xff] }
  0x2c   : > { %360 = vst.msk [vmem:[#allocation2 + $0x31] sm:$0xff] %vm301_vm0, %v271_v25  ;;  %361 = vst.msk [vmem:[#allocation2 + $0x39] sm:$0xff] %vm301_vm0, %v272_v30  ;;  %4278 = vmatmul.mubr.msk.f32.vlgmr.msra.gmra.mrb[0].mxu1 %vm301_vm0, %v505_v60  ;;  %v3744_v25 = vld [vmem:[%s6857_s3 + $0x178] sm:$0xff]  ;;  %v289_v60 = vld [vmem:[%s5453_s9 + $0xa0] sm:$0xff] }
  0x2d   : > { %6936 = vst [vmem:[#allocation6_spill] sm:$0xff] %v5481_v37  ;;  %362 = vst.msk [vmem:[#allocation2 + $0x49] sm:$0xff] %vm301_vm0, %v273_v35  ;;  %4856 = vmatpush3.bf16.msra.mxu1 %v4853_v47  ;;  %v4925_v35 = vpack.c.bf16 %v3742_v21, %v3741_v14  ;;  %v3777_v47 = vld [vmem:[%s6857_s3 + $0x180] sm:$0xff] }
  0x2e   : > { %363 = vst.msk [vmem:[#allocation2 + $0x51] sm:$0xff] %vm301_vm0, %v274_v36  ;;  %364 = vst.msk [vmem:[#allocation2 + $0x61] sm:$0xff] %vm301_vm0, %v275_v39  ;;  %4858 = vmatprep.subr.bf16.mxu1 %v4857_v20  ;;  %v283_v36 = vld [vmem:[%s5453_s9 + $0x70] sm:$0xff]  ;;  %v448_v39 = vld [vmem:[%s6857_s3 + $0x20] sm:$0xff] }
  0x2f   : > { %365 = vst.msk [vmem:[#allocation2 + $0x69] sm:$0xff] %vm301_vm0, %v276_v40  ;;  %366 = vst.msk [vmem:[#allocation2 + $0x79] sm:$0xff] %vm301_vm0, %v277_v43  ;;  %v4861_v46 = vpack.c.bf16 %v449_v42, %v448_v39  ;;  %v293_v14 = vld [vmem:[%s5453_s9 + $0xc0] sm:$0xff]  ;;  %v3618_v42 = vld [vmem:[%s6857_s3 + $0x88] sm:$0xff] }
  0x30   : > { %367 = vst.msk [vmem:[#allocation2 + $0x81] sm:$0xff] %vm301_vm0, %v278_v44  ;;  %368 = vst.msk [vmem:[#allocation2 + $0x91] sm:$0xff] %vm301_vm0, %v279_v48  ;;  %v3778_v48 = vld [vmem:[%s6857_s3 + $0x188] sm:$0xff]  ;;  %v3617_v39 = vld [vmem:[%s6857_s3 + $0x80] sm:$0xff] }
  0x31   : > { %369 = vst.msk [vmem:[#allocation2 + $0x99] sm:$0xff] %vm301_vm0, %v280_v49  ;;  %370 = vst.msk [vmem:[#allocation2 + $0xa9] sm:$0xff] %vm301_vm0, %v281_v50  ;;  %v285_v49 = vld [vmem:[%s5453_s9 + $0x80] sm:$0xff]  ;;  %v286_v50 = vld [vmem:[%s5453_s9 + $0x88] sm:$0xff]  ;;  %4860 = vmatpush3.bf16.msra.mxu1 %v4857_v20 }
  0x32   : > { %v5520_v55 = vld [vmem:[#allocation2 + $0x18] sm:$0xff]  ;;  %v5522_v56 = vld [vmem:[#allocation2 + $0x20] sm:$0xff]  ;;  %v5524_v57 = vld [vmem:[#allocation2 + $0x28] sm:$0x3]  ;;  %371 = vst.msk [vmem:[#allocation2 + $0xb1] sm:$0xff] %vm301_vm0, %v282_v54  ;;  %4862 = vmatprep.subr.bf16.mxu1 %v4861_v46 }
  0x33   : > { %v506_v58 = vrot.slane %v5520_v55, 1  ;;  %v507_v59 = vrot.slane %v5522_v56, 1  ;;  %v509_v61 = vrot.slane %v5524_v57, 1  ;;  %v5531_v62 = vld [vmem:[#allocation2 + $0x30] sm:$0xff]  ;;  %v5533_v63 = vld [vmem:[#allocation2 + $0x38] sm:$0xff]  ;;  %372 = vst.msk [vmem:[#allocation2 + $0xc1] sm:$0xff] %vm301_vm0, %v283_v36 }
  0x34   : > { %v511_v1 = vrot.slane %v5531_v62, 1  ;;  %v512_v2 = vrot.slane %v5533_v63, 1  ;;  %v5541_v3 = vld [vmem:[#allocation2 + $0x40] sm:$0x3]  ;;  %v5543_v4 = vld [vmem:[#allocation2 + $0x48] sm:$0xff]  ;;  %373 = vst.msk [vmem:[#allocation2 + $0xc9] sm:$0xff] %vm301_vm0, %v284_v38 }
  0x35   : > { %v5545_v5 = vld [vmem:[#allocation2 + $0x50] sm:$0xff]  ;;  %v508_v7 = vsel %vm500_vm2, %v506_v58, %v507_v59  ;;  %v510_v9 = vsel %vm500_vm2, %v507_v59, %v509_v61  ;;  %v514_v10 = vrot.slane %v5541_v3, 1  ;;  %v516_v11 = vrot.slane %v5543_v4, 1  ;;  %v5551_v12 = vld [vmem:[#allocation2 + $0x58] sm:$0x3]  ;;  %v5562_v17 = vld [vmem:[#allocation2 + $0x60] sm:$0xff]  ;;  %4864 = vmatpush3.bf16.msra.mxu1 %v4861_v46 }
  0x36   : > { %4533 = vmatprep.mubr.msk.f32.mxu0 %vm301_vm0, %v508_v7  ;;  %v5559_v15 = vsel %vm500_vm2, %v511_v1, %v512_v2  ;;  %v517_v16 = vrot.slane %v5545_v5, 1  ;;  %v5564_v18 = vld [vmem:[#allocation2 + $0x68] sm:$0xff]  ;;  %4280 = vmatprep.mubr.msk.f32.mxu1 %vm301_vm0, %v508_v7  ;;  %v519_v23 = vrot.slane %v5551_v12, 1  ;;  %v521_v29 = vrot.slane %v5562_v17, 1  ;;  %v5588_v31 = vld [vmem:[#allocation2 + $0x70] sm:$0x3] }
  0x37   : > { %6937 = vst [vmem:[#allocation7_spill] sm:$0xff] %v5559_v15  ;;  %4534 = vmatmul.mubr.msk.f32.vlgmr.msra.gmra.mrb[0].mxu0 %vm301_vm0, %v510_v9  ;;  %v5572_v22 = vsel %vm500_vm2, %v512_v2, %v514_v10  ;;  %v522_v30 = vrot.slane %v5564_v18, 1  ;;  %v5590_v32 = vld [vmem:[#allocation2 + $0x78] sm:$0xff]  ;;  %v5592_v33 = vld [vmem:[#allocation2 + $0x80] sm:$0xff]  ;;  %4281 = vmatmul.mubr.msk.f32.gmra.mrb[2].mxu1 %vm301_vm0, %v510_v9  ;;  %v5604_v40 = vld [vmem:[#allocation2 + $0x88] sm:$0x3]  ;;  %v4929_v58 = vpack.c.bf16 %v3744_v25, %v3743_v24 }
  0x38   : > { %4920 = vmatpush3.bf16.msra.mxu0 %v4917_v51  ;;  %6938 = vst [vmem:[#allocation8_spill] sm:$0xff] %v5572_v22  ;;  %4536 = vmatprep.mubr.msk.f32.mxu0 %vm301_vm0, %v5559_v15  ;;  %v5584_v28 = vsel %vm500_vm2, %v516_v11, %v517_v16  ;;  %v5606_v41 = vld [vmem:[#allocation2 + $0x90] sm:$0xff]  ;;  %v5616_v43 = vsel %vm500_vm2, %v517_v16, %v519_v23  ;;  %v524_v44 = vrot.slane %v5588_v31, 1  ;;  %v5619_v45 = vld [vmem:[#allocation2 + $0x98] sm:$0xff]  ;;  %v526_v53 = vrot.slane %v5590_v32, 1  ;;  %v290_v61 = vld [vmem:[%s5453_s9 + $0xa8] sm:$0xff] }
  0x39   : > { %6939 = vst [vmem:[#allocation9_spill] sm:$0xff] %v5584_v28  ;;  %4922 = vmatprep.subr.bf16.mxu0 %v4921_v6  ;;  %4283 = vmatprep.mubr.msk.f32.mxu1 %vm301_vm0, %v5559_v15  ;;  %6940 = vst [vmem:[#allocation10_spill] sm:$0xff] %v5616_v43  ;;  %v287_v51 = vld [vmem:[%s5453_s9 + $0x90] sm:$0xff]  ;;  %v5631_v52 = vsel %vm500_vm2, %v521_v29, %v522_v30  ;;  %v527_v54 = vrot.slane %v5592_v33, 1  ;;  %v288_v59 = vld [vmem:[%s5453_s9 + $0x98] sm:$0xff]  ;;  %v529_v10 = vrot.slane %v5604_v40, 1 }
  0x3a   : > { %6941 = vst [vmem:[#allocation11_spill] sm:$0xff] %v5631_v52  ;;  %374 = vst.msk [vmem:[#allocation2 + $0xd9] sm:$0xff] %vm301_vm0, %v285_v49  ;;  %v292_v1 = vld [vmem:[%s5453_s9 + $0xb8] sm:$0xff]  ;;  %v450_v2 = vld [vmem:[%s6857_s3 + $0x30] sm:$0xff]  ;;  %v5665_v9 = vsel %vm500_vm2, %v522_v30, %v524_v44  ;;  %v531_v11 = vrot.slane %v5606_v41, 1  ;;  %v532_v23 = vrot.slane %v5619_v45, 1  ;;  %v5676_v24 = vpack.c.bf16 %v3778_v48, %v3777_v47 }
  0x3b   : > { %4537 = vmatmul.mubr.msk.f32.gmra.mrb[2].mxu0 %vm301_vm0, %v5572_v22  ;;  %375 = vst.msk [vmem:[#allocation2 + $0xe1] sm:$0xff] %vm301_vm0, %v286_v50  ;;  %376 = vst.msk [vmem:[#allocation2 + $0xf1] sm:$0xff] %vm301_vm0, %v287_v51  ;;  %4284 = vmatmul.mubr.msk.f32.gmra.mrb[4].mxu1 %vm301_vm0, %v5572_v22  ;;  %v451_v7 = vld [vmem:[%s6857_s3 + $0x38] sm:$0xff]  ;;  %v294_v16 = vld [vmem:[%s5453_s9 + $0xc8] sm:$0xff]  ;;  %v5673_v21 = vsel %vm500_vm2, %v526_v53, %v527_v54  ;;  %v5706_v44 = vsel %vm500_vm2, %v527_v54, %v529_v10  ;;  %v1197_v15 = vrot.slane %v5604_v40, 2 }
  0x3c   : > { %4539 = vmatprep.mubr.msk.f32.mxu0 %vm301_vm0, %v5584_v28  ;;  %4924 = vmatpush3.bf16.msra.mxu0 %v4921_v6  ;;  %377 = vst.msk [vmem:[#allocation2 + $0xf9] sm:$0xff] %vm301_vm0, %v288_v59  ;;  %378 = vst.msk [vmem:[#allocation2 + $0x109] sm:$0xff] %vm301_vm0, %v289_v60  ;;  %v5655_v6 = vld [vmem:[#allocation2 + $0xa0] sm:$0x3]  ;;  %v295_v20 = vld [vmem:[%s5453_s9 + $0xd0] sm:$0xff]  ;;  %v4865_v25 = vpack.c.bf16 %v451_v7, %v450_v2  ;;  %v5710_v47 = vsel %vm500_vm2, %v531_v11, %v532_v23  ;;  %v1174_v11 = vrot.slane %v5520_v55, 2 }
  0x3d   : > { %4926 = vmatprep.subr.bf16.mxu0 %v4925_v35  ;;  %379 = vst.msk [vmem:[#allocation2 + $0x111] sm:$0xff] %vm301_vm0, %v290_v61  ;;  %4286 = vmatprep.mubr.msk.f32.mxu1 %vm301_vm0, %v5584_v28  ;;  %380 = vst.msk [vmem:[#allocation2 + $0x121] sm:$0xff] %vm301_vm0, %v291_v0  ;;  %v296_v29 = vld [vmem:[%s5453_s9 + $0xd8] sm:$0xff]  ;;  %v297_v30 = vld [vmem:[%s5453_s9 + $0xe0] sm:$0xff]  ;;  %v534_v46 = vrot.slane %v5655_v6, 1  ;;  %v5717_v51 = vpack.c.bf16 %v3618_v42, %v3617_v39 }
  0x3e   : > { %381 = vst.msk [vmem:[#allocation2 + $0x129] sm:$0xff] %vm301_vm0, %v292_v1  ;;  %6942 = vst [vmem:[#allocation12_spill] sm:$0xff] %v5665_v9  ;;  %v5686_v36 = vld [vmem:[#allocation2 + $0xa8] sm:$0xff]  ;;  %v5688_v38 = vld [vmem:[#allocation2 + $0xb0] sm:$0xff]  ;;  %4866 = vmatprep.subr.bf16.mxu1 %v4865_v25 }
  0x3f   : > { %4540 = vmatmul.mubr.msk.f32.gmra.mrb[4].mxu0 %vm301_vm0, %v5616_v43  ;;  %6943 = vst [vmem:[#allocation13_spill] sm:$0xff] %v5673_v21  ;;  %382 = vst.msk [vmem:[#allocation2 + $0x139] sm:$0xff] %vm301_vm0, %v293_v14  ;;  %4287 = vmatmul.mubr.msk.f32.gmra.mrb[6].mxu1 %vm301_vm0, %v5616_v43  ;;  %v536_v48 = vrot.slane %v5686_v36, 1  ;;  %v537_v49 = vrot.slane %v5688_v38, 1  ;;  %v5714_v50 = vld [vmem:[#allocation2 + $0xb8] sm:$0x3] }
  0x40   : > { %4542 = vmatprep.mubr.msk.f32.mxu0 %vm301_vm0, %v5631_v52  ;;  %4928 = vmatpush3.bf16.msra.mxu0 %v4925_v35  ;;  %383 = vst.msk [vmem:[#allocation2 + $0x141] sm:$0xff] %vm301_vm0, %v294_v16  ;;  %384 = vst.msk [vmem:[#allocation2 + $0x151] sm:$0xff] %vm301_vm0, %v295_v20  ;;  %v298_v35 = vld [vmem:[%s5453_s9 + $0xe8] sm:$0xff]  ;;  %v5721_v53 = vld [vmem:[#allocation2 + $0xc0] sm:$0xff]  ;;  %v539_v59 = vrot.slane %v5714_v50, 1  ;;  %v1175_v14 = vrot.slane %v5522_v56, 2 }
  0x41   : > { %4930 = vmatprep.subr.bf16.mxu0 %v4929_v58  ;;  %385 = vst.msk [vmem:[#allocation2 + $0x159] sm:$0xff] %vm301_vm0, %v296_v29  ;;  %386 = vst.msk [vmem:[#allocation2 + $0x169] sm:$0xff] %vm301_vm0, %v297_v30  ;;  %4289 = vmatprep.mubr.msk.f32.mxu1 %vm301_vm0, %v5631_v52  ;;  %v5723_v54 = vld [vmem:[#allocation2 + $0xc8] sm:$0xff]  ;;  %v5736_v60 = vsel %vm500_vm2, %v536_v48, %v537_v49  ;;  %v541_v61 = vrot.slane %v5721_v53, 1  ;;  %v5740_v1 = vld [vmem:[#allocation2 + $0xd0] sm:$0x3] }
  0x42   : > { %387 = vst.msk [vmem:[#allocation2 + $0x171] sm:$0xff] %vm301_vm0, %v298_v35  ;;  %6944 = vst [vmem:[#allocation14_spill] sm:$0xff] %v5706_v44  ;;  %4868 = vmatpush3.bf16.msra.mxu1 %v4865_v25  ;;  %v542_v0 = vrot.slane %v5723_v54, 1  ;;  %v5752_v2 = vsel %vm500_vm2, %v537_v49, %v539_v59  ;;  %v544_v7 = vrot.slane %v5740_v1, 1  ;;  %v5760_v16 = vld [vmem:[#allocation2 + $0xd8] sm:$0xff]  ;;  %v5762_v20 = vld [vmem:[#allocation2 + $0xe0] sm:$0xff] }
  0x43   : > { %4543 = vmatmul.mubr.msk.f32.gmra.mrb[6].mxu0 %vm301_vm0, %v5665_v9  ;;  %6945 = vst [vmem:[#allocation15_spill] sm:$0xff] %v5710_v47  ;;  %4290 = vmatmul.mubr.msk.f32.gmra.mrb[8].mxu1 %vm301_vm0, %v5665_v9  ;;  %6947 = vst [vmem:[#allocation17_spill] sm:$0xff] %v5736_v60  ;;  %v300_v25 = vld [vmem:[%s5453_s9 + $0xf8] sm:$0xff]  ;;  %v1177_v29 = vrot.slane %v5524_v57, 2  ;;  %v546_v35 = vrot.slane %v5760_v16, 1  ;;  %v547_v39 = vrot.slane %v5762_v20, 1  ;;  %v5785_v57 = vsel %vm1168_vm3, %v1174_v11, %v1175_v14 }
  0x44   : > { %4545 = vmatprep.mubr.msk.f32.mxu0 %vm301_vm0, %v5673_v21  ;;  %4932 = vmatpush3.bf16.msra.mxu0 %v4929_v58  ;;  %v5732_v58 = vsel %vm500_vm2, %v532_v23, %v534_v46  ;;  %6948 = vst [vmem:[#allocation18_spill] sm:$0xff] %v5752_v2  ;;  %v5756_v10 = vsel %vm500_vm2, %v541_v61, %v542_v0  ;;  %v299_v23 = vld [vmem:[%s5453_s9 + $0xf0] sm:$0xff]  ;;  %389 = vst.msk [vmem:[#allocation2 + $0x189] sm:$0xff] %vm301_vm0, %v300_v25  ;;  %v5782_v42 = vld [vmem:[#allocation2 + $0xe8] sm:$0x3]  ;;  %v1179_v46 = vrot.slane %v5531_v62, 2 }
  0x45   : > { %4934 = vmatprep.subr.bf16.mxu0 %v5676_v24  ;;  %4292 = vmatprep.mubr.msk.f32.mxu1 %vm301_vm0, %v5673_v21  ;;  %6946 = vst [vmem:[#allocation16_spill] sm:$0xff] %v5732_v58  ;;  %6949 = vst [vmem:[#allocation19_spill] sm:$0xff] %v5756_v10  ;;  %v5778_v30 = vsel %vm500_vm2, %v542_v0, %v544_v7  ;;  %v1180_v48 = vrot.slane %v5533_v63, 2  ;;  %v5789_v49 = vld [vmem:[#allocation2 + $0xf0] sm:$0xff]  ;;  %v5791_v59 = vld [vmem:[#allocation2 + $0xf8] sm:$0xff]  ;;  %v5806_v7 = vsel %vm1168_vm3, %v1175_v14, %v1177_v29 }
  0x46   : > { %4870 = vmatprep.subr.bf16.mxu1 %v5717_v51  ;;  %388 = vst.msk [vmem:[#allocation2 + $0x181] sm:$0xff] %vm301_vm0, %v299_v23  ;;  %6950 = vst [vmem:[#allocation20_spill] sm:$0xff] %v5778_v30  ;;  %v3779_v61 = vld [vmem:[%s6857_s3 + $0x190] sm:$0xff]  ;;  %v3780_v0 = vld [vmem:[%s6857_s3 + $0x198] sm:$0xff]  ;;  %v549_v11 = vrot.slane %v5782_v42, 1  ;;  %v5812_v23 = vsel %vm500_vm2, %v546_v35, %v547_v39  ;;  %v1182_v25 = vrot.slane %v5541_v3, 2 }
  0x47   : > { %4546 = vmatmul.mubr.msk.f32.gmra.mrb[8].mxu0 %vm301_vm0, %v5706_v44  ;;  %4293 = vmatmul.mubr.msk.f32.gmra.mrb[10].mxu1 %vm301_vm0, %v5706_v44  ;;  %6951 = vst [vmem:[#allocation21_spill] sm:$0xff] %v5812_v23  ;;  %v551_v37 = vrot.slane %v5789_v49, 1  ;;  %v552_v19 = vrot.slane %v5791_v59, 1  ;;  %v5817_v13 = vld [vmem:[#allocation2 + $0x100] sm:$0x3]  ;;  %v1184_v14 = vrot.slane %v5543_v4, 2  ;;  %v4937_v35 = vpack.c.bf16 %v3780_v0, %v3779_v61 }
  0x48   : > { %4548 = vmatprep.mubr.msk.f32.mxu0 %vm301_vm0, %v5710_v47  ;;  %4295 = vmatprep.mubr.msk.f32.mxu1 %vm301_vm0, %v5710_v47  ;;  %v1185_v29 = vrot.slane %v5545_v5, 2  ;;  %v3781_v3 = vld [vmem:[%s6857_s3 + $0x1a0] sm:$0xff]  ;;  %v554_v61 = vrot.slane %v5817_v13, 1  ;;  %v1187_v0 = vrot.slane %v5551_v12, 2  ;;  %v1189_v12 = vrot.slane %v5562_v17, 2  ;;  %v5901_v22 = vld [vmem:[#allocation2 + $0x138] sm:$0xff] }
  0x49   : > { %v5852_v47 = vsel %vm500_vm2, %v551_v37, %v552_v19  ;;  %v5863_v21 = vld [vmem:[#allocation2 + $0x120] sm:$0xff]  ;;  %v5894_v28 = vld [vmem:[#allocation2 + $0x130] sm:$0x3]  ;;  %v566_v8 = vrot.slane %v5901_v22, 1 }
  0x4a   : > { %6953 = vst [vmem:[#allocation23_spill] sm:$0xff] %v5852_v47  ;;  %v5859_v44 = vsel %vm1168_vm3, %v1184_v14, %v1185_v29  ;;  %v3784_v14 = vld [vmem:[%s6857_s3 + $0x1b8] sm:$0xff]  ;;  %v5880_v9 = vsel %vm500_vm2, %v552_v19, %v554_v61  ;;  %v561_v43 = vrot.slane %v5863_v21, 1  ;;  %v1195_v61 = vrot.slane %v5592_v33, 2 }
  0x4b   : > { %4549 = vmatmul.mubr.msk.f32.gmra.mrb[10].mxu0 %vm301_vm0, %v5732_v58  ;;  %4296 = vmatmul.mubr.msk.f32.gmra.mrb[12].mxu1 %vm301_vm0, %v5732_v58  ;;  %v5841_v58 = vsel %vm500_vm2, %v547_v39, %v549_v11  ;;  %v5856_v11 = vld [vmem:[#allocation2 + $0x118] sm:$0x3]  ;;  %6954 = vst [vmem:[#allocation24_spill] sm:$0xff] %v5859_v44  ;;  %6955 = vst [vmem:[#allocation25_spill] sm:$0xff] %v5880_v9 }
  0x4c   : > { %4551 = vmatprep.mubr.msk.f32.mxu0 %vm301_vm0, %v5736_v60  ;;  %4298 = vmatprep.mubr.msk.f32.mxu1 %vm301_vm0, %v5736_v60  ;;  %v5826_v60 = vld [vmem:[#allocation2 + $0x110] sm:$0xff]  ;;  %6952 = vst [vmem:[#allocation22_spill] sm:$0xff] %v5841_v58 }
  0x4d   : > { %v557_v39 = vrot.slane %v5826_v60, 1 }
  0x4f   : > { %4552 = vmatmul.mubr.msk.f32.gmra.mrb[12].mxu0 %vm301_vm0, %v5752_v2  ;;  %4299 = vmatmul.mubr.msk.f32.gmra.mrb[14].mxu1 %vm301_vm0, %v5752_v2  ;;  %v5824_v2 = vld [vmem:[#allocation2 + $0x108] sm:$0xff] }
  0x50   : > { %4554 = vmatprep.mubr.msk.f32.mxu0 %vm301_vm0, %v5756_v10  ;;  %4301 = vmatprep.mubr.msk.f32.mxu1 %vm301_vm0, %v5756_v10  ;;  %v5820_v10 = vsel %vm1168_vm3, %v1179_v46, %v1180_v48  ;;  %v3782_v46 = vld [vmem:[%s6857_s3 + $0x1a8] sm:$0xff] }
  0x51   : > { %v4941_v37 = vpack.c.bf16 %v3782_v46, %v3781_v3  ;;  %v559_v3 = vrot.slane %v5856_v11, 1  ;;  %v1192_v46 = vrot.slane %v5588_v31, 2  ;;  %v1194_v31 = vrot.slane %v5590_v32, 2 }
  0x53   : > { %4555 = vmatmul.mubr.msk.f32.gmra.mrb[14].mxu0 %vm301_vm0, %v5778_v30  ;;  %4302 = vmatmul.mubr.msk.f32.gmra.mrb[16].mxu1 %vm301_vm0, %v5778_v30  ;;  %v5849_v30 = vsel %vm1168_vm3, %v1180_v48, %v1182_v25  ;;  %v5865_v48 = vld [vmem:[#allocation2 + $0x128] sm:$0xff]  ;;  %v3783_v25 = vld [vmem:[%s6857_s3 + $0x1b0] sm:$0xff] }
  0x54   : > { %4597 = vmatprep.mubr.msk.f32.mxu0 %vm301_vm0, %v5785_v57  ;;  %4304 = vmatprep.mubr.msk.f32.mxu1 %vm301_vm0, %v5812_v23  ;;  %v556_v23 = vrot.slane %v5824_v2, 1 }
  0x56   : > { %v5890_v52 = vsel %vm500_vm2, %v556_v23, %v557_v39  ;;  %v4945_v23 = vpack.c.bf16 %v3784_v14, %v3783_v25  ;;  %v564_v14 = vrot.slane %v5894_v28, 1 }
  0x57   : > { %4598 = vmatmul.mubr.msk.f32.vlgmr.msra.gmra.mrb[0].mxu0 %vm301_vm0, %v5806_v7  ;;  %4305 = vmatmul.mubr.msk.f32.gmra.mrb[18].mxu1 %vm301_vm0, %v5841_v58  ;;  %v5887_v58 = vsel %vm1168_vm3, %v1185_v29, %v1187_v0  ;;  %6957 = vst [vmem:[#allocation27_spill] sm:$0xff] %v5890_v52  ;;  %v5903_v29 = vld [vmem:[#allocation2 + $0x140] sm:$0xff]  ;;  %v3818_v0 = vld [vmem:[%s6857_s3 + $0x1c8] sm:$0xff] }
  0x58   : > { %4936 = vmatpush3.bf16.msra.mxu0 %v5676_v24  ;;  %4600 = vmatprep.mubr.msk.f32.mxu0 %vm301_vm0, %v5820_v10  ;;  %v1190_v24 = vrot.slane %v5564_v18, 2  ;;  %6956 = vst [vmem:[#allocation26_spill] sm:$0xff] %v5887_v58 }
  0x59   : > { %4938 = vmatprep.subr.bf16.mxu0 %v4937_v35  ;;  %4307 = vmatprep.mubr.msk.f32.mxu1 %vm301_vm0, %v5852_v47  ;;  %v562_v47 = vrot.slane %v5865_v48, 1 }
  0x5a   : > { %v5897_v19 = vsel %vm1168_vm3, %v1189_v12, %v1190_v24  ;;  %v5918_v12 = vsel %vm500_vm2, %v557_v39, %v559_v3  ;;  %v5921_v25 = vsel %vm1168_vm3, %v1190_v24, %v1192_v46  ;;  %v5935_v39 = vsel %vm1168_vm3, %v1194_v31, %v1195_v61  ;;  %v5939_v46 = vld [vmem:[#allocation2 + $0x150] sm:$0xff] }
  0x5b   : > { %4601 = vmatmul.mubr.msk.f32.gmra.mrb[2].mxu0 %vm301_vm0, %v5849_v30  ;;  %6958 = vst [vmem:[#allocation28_spill] sm:$0xff] %v5897_v19  ;;  %4308 = vmatmul.mubr.msk.f32.gmra.mrb[20].mxu1 %vm301_vm0, %v5880_v9  ;;  %6959 = vst [vmem:[#allocation29_spill] sm:$0xff] %v5918_v12  ;;  %v5927_v9 = vsel %vm500_vm2, %v561_v43, %v562_v47  ;;  %v1199_v24 = vrot.slane %v5606_v41, 2  ;;  %v1200_v3 = vrot.slane %v5619_v45, 2  ;;  %v5941_v43 = vld [vmem:[#allocation2 + $0x158] sm:$0xff] }
  0x5c   : > { %4603 = vmatprep.mubr.msk.f32.mxu0 %vm301_vm0, %v5859_v44  ;;  %4940 = vmatpush3.bf16.msra.mxu0 %v4937_v35  ;;  %v3817_v35 = vld [vmem:[%s6857_s3 + $0x1c0] sm:$0xff]  ;;  %6960 = vst [vmem:[#allocation30_spill] sm:$0xff] %v5921_v25  ;;  %6961 = vst [vmem:[#allocation31_spill] sm:$0xff] %v5927_v9  ;;  %v5999_v44 = vld [vmem:[#allocation2 + $0x178] sm:$0x3] }
  0x5d   : > { %4942 = vmatprep.subr.bf16.mxu0 %v4941_v37  ;;  %4310 = vmatprep.mubr.msk.f32.mxu1 %vm301_vm0, %v5890_v52  ;;  %v567_v52 = vrot.slane %v5903_v29, 1  ;;  %6962 = vst [vmem:[#allocation32_spill] sm:$0xff] %v5935_v39  ;;  %v5943_v40 = vpack.c.bf16 %v3818_v0, %v3817_v35  ;;  %v5959_v35 = vsel %vm1168_vm3, %v1195_v61, %v1197_v15  ;;  %v5975_v15 = vld [vmem:[#allocation2 + $0x170] sm:$0xff] }
  0x5e   : > { %6964 = vst [vmem:[#allocation34_spill] sm:$0xff] %v5959_v35 }
  0x5f   : > { %4604 = vmatmul.mubr.msk.f32.gmra.mrb[4].mxu0 %vm301_vm0, %v5887_v58  ;;  %v5932_v58 = vld [vmem:[#allocation2 + $0x148] sm:$0x3]  ;;  %4311 = vmatmul.mubr.msk.f32.gmra.mrb[22].mxu1 %vm301_vm0, %v5918_v12  ;;  %v5962_v0 = vsel %vm500_vm2, %v566_v8, %v567_v52  ;;  %v571_v12 = vrot.slane %v5939_v46, 1 }
  0x60   : > { %4606 = vmatprep.mubr.msk.f32.mxu0 %vm301_vm0, %v5897_v19  ;;  %4944 = vmatpush3.bf16.msra.mxu0 %v4941_v37  ;;  %v5952_v37 = vsel %vm500_vm2, %v562_v47, %v564_v14  ;;  %v569_v31 = vrot.slane %v5932_v58, 1  ;;  %v1202_v19 = vrot.slane %v5655_v6, 2  ;;  %6965 = vst [vmem:[#allocation35_spill] sm:$0xff] %v5962_v0  ;;  %v5969_v47 = vsel %vm1168_vm3, %v1199_v24, %v1200_v3 }
  0x61   : > { %4946 = vmatprep.subr.bf16.mxu0 %v4945_v23  ;;  %4313 = vmatprep.mubr.msk.f32.mxu1 %vm301_vm0, %v5927_v9  ;;  %6963 = vst [vmem:[#allocation33_spill] sm:$0xff] %v5952_v37  ;;  %v572_v9 = vrot.slane %v5941_v43, 1  ;;  %v1204_v6 = vrot.slane %v5686_v36, 2  ;;  %v1205_v14 = vrot.slane %v5688_v38, 2 }
  0x62   : > { %v5985_v8 = vsel %vm500_vm2, %v567_v52, %v569_v31  ;;  %v5988_v61 = vsel %vm1168_vm3, %v1200_v3, %v1202_v19  ;;  %v1209_v19 = vrot.slane %v5721_v53, 2  ;;  %v1210_v3 = vrot.slane %v5723_v54, 2 }
  0x63   : > { %4607 = vmatmul.mubr.msk.f32.gmra.mrb[6].mxu0 %vm301_vm0, %v5921_v25  ;;  %v5966_v25 = vld [vmem:[#allocation2 + $0x160] sm:$0x3]  ;;  %4314 = vmatmul.mubr.msk.f32.gmra.mrb[24].mxu1 %vm301_vm0, %v5952_v37  ;;  %6966 = vst [vmem:[#allocation36_spill] sm:$0xff] %v5985_v8  ;;  %6967 = vst [vmem:[#allocation37_spill] sm:$0xff] %v5988_v61  ;;  %v5994_v24 = vsel %vm500_vm2, %v571_v12, %v572_v9  ;;  %v1207_v37 = vrot.slane %v5714_v50, 2  ;;  %v6002_v52 = vsel %vm1168_vm3, %v1204_v6, %v1205_v14 }
  0x64   : > { %4609 = vmatprep.mubr.msk.f32.mxu0 %vm301_vm0, %v5935_v39  ;;  %4948 = vmatpush3.bf16.msra.mxu0 %v4945_v23  ;;  %v5973_v39 = vld [vmem:[#allocation2 + $0x168] sm:$0xff]  ;;  %v574_v23 = vrot.slane %v5966_v25, 1  ;;  %6968 = vst [vmem:[#allocation38_spill] sm:$0xff] %v5994_v24  ;;  %v579_v12 = vrot.slane %v5999_v44, 1 }
  0x65   : > { %4950 = vmatprep.subr.bf16.mxu0 %v5943_v40  ;;  %4316 = vmatprep.mubr.msk.f32.mxu1 %vm301_vm0, %v5962_v0  ;;  %v577_v0 = vrot.slane %v5975_v15, 1  ;;  %v6019_v31 = vsel %vm1168_vm3, %v1205_v14, %v1207_v37 }
  0x66   : > { %v6013_v50 = vsel %vm500_vm2, %v572_v9, %v574_v23  ;;  %v1215_v9 = vrot.slane %v5762_v20, 2  ;;  %v1219_v23 = vrot.slane %v5789_v49, 2 }
  0x67   : > { %4610 = vmatmul.mubr.msk.f32.gmra.mrb[8].mxu0 %vm301_vm0, %v5959_v35  ;;  %v576_v35 = vrot.slane %v5973_v39, 1  ;;  %4317 = vmatmul.mubr.msk.f32.gmra.mrb[26].mxu1 %vm301_vm0, %v5985_v8  ;;  %6969 = vst [vmem:[#allocation39_spill] sm:$0xff] %v6013_v50  ;;  %v1212_v8 = vrot.slane %v5740_v1, 2  ;;  %v6037_v37 = vsel %vm500_vm2, %v577_v0, %v579_v12  ;;  %v1224_v12 = vrot.slane %v5824_v2, 2 }
  0x68   : > { %4612 = vmatprep.mubr.msk.f32.mxu0 %vm301_vm0, %v5969_v47  ;;  %4319 = vmatprep.mubr.msk.f32.mxu1 %vm301_vm0, %v5994_v24  ;;  %v1214_v24 = vrot.slane %v5760_v16, 2  ;;  %6971 = vst [vmem:[#allocation41_spill] sm:$0xff] %v6037_v37 }
  0x69   : > { %v6022_v6 = vsel %vm500_vm2, %v576_v35, %v577_v0  ;;  %v6042_v1 = vsel %vm1168_vm3, %v1210_v3, %v1212_v8  ;;  %v1217_v35 = vrot.slane %v5782_v42, 2  ;;  %v3619_v0 = vld [vmem:[%s6857_s3 + $0x90] sm:$0xff]  ;;  %v3620_v8 = vld [vmem:[%s6857_s3 + $0x98] sm:$0xff] }
  0x6a   : > { %6970 = vst [vmem:[#allocation40_spill] sm:$0xff] %v6022_v6  ;;  %v6046_v14 = vsel %vm1168_vm3, %v1214_v24, %v1215_v9  ;;  %v1222_v24 = vrot.slane %v5817_v13, 2 }
  0x6b   : > { %4613 = vmatmul.mubr.msk.f32.gmra.mrb[10].mxu0 %vm301_vm0, %v5988_v61  ;;  %v6026_v61 = vsel %vm1168_vm3, %v1209_v19, %v1210_v3  ;;  %4320 = vmatmul.mubr.msk.f32.gmra.mrb[28].mxu1 %vm301_vm0, %v6013_v50  ;;  %v1220_v19 = vrot.slane %v5791_v59, 2  ;;  %v6065_v42 = vsel %vm1168_vm3, %v1215_v9, %v1217_v35  ;;  %v3622_v9 = vld [vmem:[%s6857_s3 + $0xa8] sm:$0xff]  ;;  %v6184_v50 = vld [vmem:[#allocation2 + $0x190] sm:$0x3] }
  0x6c   : > { %4615 = vmatprep.mubr.msk.f32.mxu0 %vm301_vm0, %v6002_v52  ;;  %4322 = vmatprep.mubr.msk.f32.mxu1 %vm301_vm0, %v6022_v6  ;;  %v4873_v6 = vpack.c.bf16 %v3620_v8, %v3619_v0  ;;  %v1230_v0 = vrot.slane %v5865_v48, 2 }
  0x6d   : > { %v6069_v3 = vsel %vm1168_vm3, %v1219_v23, %v1220_v19  ;;  %v6089_v13 = vsel %vm1168_vm3, %v1220_v19, %v1222_v24  ;;  %v1229_v23 = vrot.slane %v5863_v21, 2  ;;  %v1234_v24 = vrot.slane %v5901_v22, 2 }
  0x6f   : > { %4616 = vmatmul.mubr.msk.f32.gmra.mrb[12].mxu0 %vm301_vm0, %v6019_v31  ;;  %4323 = vmatmul.mubr.msk.f32.gmra.mrb[30].mxu1 %vm301_vm0, %v6037_v37  ;;  %v1225_v37 = vrot.slane %v5826_v60, 2  ;;  %v6116_v8 = vsel %vm1168_vm3, %v1229_v23, %v1230_v0  ;;  %v1239_v23 = vrot.slane %v5939_v46, 2 }
  0x70   : > { %4618 = vmatprep.mubr.msk.f32.mxu0 %vm301_vm0, %v6026_v61  ;;  %4341 = vmatprep.mubr.msk.f32.mxu1 %vm301_vm0, %v5458_v26  ;;  %v3621_v26 = vld [vmem:[%s6857_s3 + $0xa0] sm:$0xff] }
  0x71   : > { %v6093_v35 = vsel %vm1168_vm3, %v1224_v12, %v1225_v37  ;;  %v1235_v12 = vrot.slane %v5903_v29, 2 }
  0x73   : > { %4619 = vmatmul.mubr.msk.f32.gmra.mrb[14].mxu0 %vm301_vm0, %v6042_v1  ;;  %4342 = vmatmul.mubr.msk.f32.vlgmr.msra.gmra.mrb[0].mxu1 %vm301_vm0, %v5460_v27  ;;  %v1227_v27 = vrot.slane %v5856_v11, 2  ;;  %v3624_v11 = vld [vmem:[%s6857_s3 + $0xb8] sm:$0xff] }
  0x74   : > { %4621 = vmatprep.mubr.msk.f32.mxu0 %vm301_vm0, %v6046_v14  ;;  %4872 = vmatpush3.bf16.msra.mxu1 %v5717_v51  ;;  %v4877_v51 = vpack.c.bf16 %v3622_v9, %v3621_v26  ;;  %v1237_v9 = vrot.slane %v5932_v58, 2 }
  0x75   : > { %4344 = vmatprep.mubr.msk.f32.mxu1 %vm301_vm0, %v5520_v55  ;;  %4874 = vmatprep.subr.bf16.mxu1 %v4873_v6  ;;  %v3623_v55 = vld [vmem:[%s6857_s3 + $0xb0] sm:$0xff]  ;;  %v6112_v19 = vsel %vm1168_vm3, %v1225_v37, %v1227_v27  ;;  %v3657_v37 = vld [vmem:[%s6857_s3 + $0xc0] sm:$0xff]  ;;  %v6139_v27 = vsel %vm1168_vm3, %v1234_v24, %v1235_v12  ;;  %v1245_v24 = vrot.slane %v5975_v15, 2 }
  0x76   : > { %v4881_v26 = vpack.c.bf16 %v3624_v11, %v3623_v55  ;;  %v1240_v55 = vrot.slane %v5941_v43, 2  ;;  %v6154_v58 = vsel %vm1168_vm3, %v1235_v12, %v1237_v9  ;;  %v1247_v12 = vrot.slane %v5999_v44, 2 }
  0x77   : > { %4622 = vmatmul.mubr.msk.f32.gmra.mrb[16].mxu0 %vm301_vm0, %v6065_v42  ;;  %4345 = vmatmul.mubr.msk.f32.gmra.mrb[2].mxu1 %vm301_vm0, %v5522_v56  ;;  %v1232_v56 = vrot.slane %v5894_v28, 2  ;;  %v3658_v28 = vld [vmem:[%s6857_s3 + $0xc8] sm:$0xff]  ;;  %6972 = vst [vmem:[#allocation42_spill] sm:$0xff] %v6154_v58 }
  0x78   : > { %4624 = vmatprep.mubr.msk.f32.mxu0 %vm301_vm0, %v6069_v3  ;;  %4347 = vmatprep.mubr.msk.f32.mxu1 %vm301_vm0, %v5531_v62  ;;  %v6143_v11 = vpack.c.bf16 %v3658_v28, %v3657_v37  ;;  %v6165_v37 = vld [vmem:[#allocation2 + $0x180] sm:$0xff]  ;;  %v6167_v28 = vld [vmem:[#allocation2 + $0x188] sm:$0xff]  ;;  %v6195_v44 = vsel %vm1168_vm3, %v1245_v24, %v1247_v12  ;;  %v3820_v12 = vld [vmem:[%s6857_s3 + $0x1d8] sm:$0xff] }
  0x79   : > { %4876 = vmatpush3.bf16.msra.mxu1 %v4873_v6  ;;  %v6135_v6 = vsel %vm1168_vm3, %v1230_v0, %v1232_v56  ;;  %v1242_v0 = vrot.slane %v5966_v25, 2  ;;  %v1244_v56 = vrot.slane %v5973_v39, 2  ;;  %v2127_v9 = vrot.slane %v6165_v37, 2  ;;  %6976 = vst [vmem:[#allocation46_spill] sm:$0xff] %v6195_v44 }
  0x7a   : > { %4878 = vmatprep.subr.bf16.mxu1 %v4877_v51 }
  0x7b   : > { %4625 = vmatmul.mubr.msk.f32.gmra.mrb[18].mxu0 %vm301_vm0, %v6089_v13  ;;  %4348 = vmatmul.mubr.msk.f32.gmra.mrb[4].mxu1 %vm301_vm0, %v5533_v63  ;;  %v6176_v25 = vsel %vm1168_vm3, %v1240_v55, %v1242_v0 }
  0x7c   : > { %4627 = vmatprep.mubr.msk.f32.mxu0 %vm301_vm0, %v6093_v35  ;;  %4350 = vmatprep.mubr.msk.f32.mxu1 %vm301_vm0, %v5543_v4  ;;  %6974 = vst [vmem:[#allocation44_spill] sm:$0xff] %v6176_v25 }
  0x7d   : > { %4880 = vmatpush3.bf16.msra.mxu1 %v4877_v51  ;;  %v6158_v51 = vsel %vm1168_vm3, %v1239_v23, %v1240_v55  ;;  %v2128_v23 = vrot.slane %v6167_v28, 2  ;;  %v2130_v55 = vrot.slane %v6184_v50, 2 }
  0x7e   : > { %4882 = vmatprep.subr.bf16.mxu1 %v4881_v26  ;;  %6973 = vst [vmem:[#allocation43_spill] sm:$0xff] %v6158_v51 }
  0x7f   : > { %4628 = vmatmul.mubr.msk.f32.gmra.mrb[20].mxu0 %vm301_vm0, %v6112_v19  ;;  %4351 = vmatmul.mubr.msk.f32.gmra.mrb[6].mxu1 %vm301_vm0, %v5545_v5  ;;  %v6199_v0 = vsel %vm1168_vm3, %v2127_v9, %v2128_v23 }
  0x80   : > { %4630 = vmatprep.mubr.msk.f32.mxu0 %vm301_vm0, %v6116_v8  ;;  %4353 = vmatprep.mubr.msk.f32.mxu1 %vm301_vm0, %v5562_v17  ;;  %6977 = vst [vmem:[#allocation47_spill] sm:$0xff] %v6199_v0 }
  0x81   : > { %4884 = vmatpush3.bf16.msra.mxu1 %v4881_v26  ;;  %v6180_v26 = vsel %vm1168_vm3, %v1244_v56, %v1245_v24  ;;  %v6210_v56 = vsel %vm1168_vm3, %v2128_v23, %v2130_v55  ;;  %v3819_v24 = vld [vmem:[%s6857_s3 + $0x1d0] sm:$0xff]  ;;  %v3821_v23 = vld [vmem:[%s6857_s3 + $0x1e0] sm:$0xff]  ;;  %v3822_v55 = vld [vmem:[%s6857_s3 + $0x1e8] sm:$0xff] }
  0x82   : > { %4886 = vmatprep.subr.bf16.mxu1 %v6143_v11  ;;  %6975 = vst [vmem:[#allocation45_spill] sm:$0xff] %v6180_v26  ;;  %6978 = vst [vmem:[#allocation48_spill] sm:$0xff] %v6210_v56  ;;  %v4953_v9 = vpack.c.bf16 %v3820_v12, %v3819_v24  ;;  %v3823_v24 = vld [vmem:[%s6857_s3 + $0x1f0] sm:$0xff] }
  0x83   : > { %4631 = vmatmul.mubr.msk.f32.gmra.mrb[22].mxu0 %vm301_vm0, %v6135_v6  ;;  %4354 = vmatmul.mubr.msk.f32.gmra.mrb[8].mxu1 %vm301_vm0, %v5564_v18 }
  0x84   : > { %4633 = vmatprep.mubr.msk.f32.mxu0 %vm301_vm0, %v6139_v27  ;;  %4356 = vmatprep.mubr.msk.f32.mxu1 %vm301_vm0, %v5590_v32 }
  0x87   : > { %4634 = vmatmul.mubr.msk.f32.gmra.mrb[24].mxu0 %vm301_vm0, %v6154_v58  ;;  %4357 = vmatmul.mubr.msk.f32.gmra.mrb[10].mxu1 %vm301_vm0, %v5592_v33 }
  0x88   : > { %4636 = vmatprep.mubr.msk.f32.mxu0 %vm301_vm0, %v6158_v51  ;;  %4359 = vmatprep.mubr.msk.f32.mxu1 %vm301_vm0, %v5606_v41 }
  0x8b   : > { %4637 = vmatmul.mubr.msk.f32.gmra.mrb[26].mxu0 %vm301_vm0, %v6176_v25  ;;  %4360 = vmatmul.mubr.msk.f32.gmra.mrb[12].mxu1 %vm301_vm0, %v5619_v45 }
  0x8c   : > { %4639 = vmatprep.mubr.msk.f32.mxu0 %vm301_vm0, %v6180_v26  ;;  %4362 = vmatprep.mubr.msk.f32.mxu1 %vm301_vm0, %v5686_v36 }
  0x8f   : > { %4640 = vmatmul.mubr.msk.f32.gmra.mrb[28].mxu0 %vm301_vm0, %v6195_v44  ;;  %4363 = vmatmul.mubr.msk.f32.gmra.mrb[14].mxu1 %vm301_vm0, %v5688_v38 }
  0x90   : > { %4642 = vmatprep.mubr.msk.f32.mxu0 %vm301_vm0, %v6199_v0  ;;  %4365 = vmatprep.mubr.msk.f32.mxu1 %vm301_vm0, %v5721_v53  ;;  %v7010_v0 = vld [vmem:[#allocation33_spill] sm:$0xff] }
  0x93   : > { %4643 = vmatmul.mubr.msk.f32.gmra.mrb[30].mxu0 %vm301_vm0, %v6210_v56  ;;  %4366 = vmatmul.mubr.msk.f32.gmra.mrb[16].mxu1 %vm301_vm0, %v5723_v54  ;;  %v7008_v56 = vld [vmem:[#allocation31_spill] sm:$0xff] }
  0x94   : > { %4661 = vmatprep.mubr.msk.f32.mxu0 %vm301_vm0, %v5531_v62  ;;  %4368 = vmatprep.mubr.msk.f32.mxu1 %vm301_vm0, %v5760_v16  ;;  %v4957_v62 = vpack.c.bf16 %v3822_v55, %v3821_v23 }
  0x97   : > { %4662 = vmatmul.mubr.msk.f32.vlgmr.msra.gmra.mrb[0].mxu0 %vm301_vm0, %v5533_v63  ;;  %4369 = vmatmul.mubr.msk.f32.gmra.mrb[18].mxu1 %vm301_vm0, %v5762_v20  ;;  %v3824_v63 = vld [vmem:[%s6857_s3 + $0x1f8] sm:$0xff] }
  0x98   : > { %4952 = vmatpush3.bf16.msra.mxu0 %v5943_v40  ;;  %4664 = vmatprep.mubr.msk.f32.mxu0 %vm301_vm0, %v5543_v4  ;;  %v4961_v4 = vpack.c.bf16 %v3824_v63, %v3823_v24  ;;  %v3857_v40 = vld [vmem:[%s6857_s3 + $0x200] sm:$0xff]  ;;  %v3662_v24 = vld [vmem:[%s6857_s3 + $0xe8] sm:$0xff] }
  0x99   : > { %4954 = vmatprep.subr.bf16.mxu0 %v4953_v9  ;;  %4371 = vmatprep.mubr.msk.f32.mxu1 %vm301_vm0, %v5789_v49 }
  0x9b   : > { %4665 = vmatmul.mubr.msk.f32.gmra.mrb[2].mxu0 %vm301_vm0, %v5545_v5  ;;  %4372 = vmatmul.mubr.msk.f32.gmra.mrb[20].mxu1 %vm301_vm0, %v5791_v59  ;;  %v3858_v5 = vld [vmem:[%s6857_s3 + $0x208] sm:$0xff] }
  0x9c   : > { %4667 = vmatprep.mubr.msk.f32.mxu0 %vm301_vm0, %v5562_v17  ;;  %4956 = vmatpush3.bf16.msra.mxu0 %v4953_v9  ;;  %v6269_v17 = vpack.c.bf16 %v3858_v5, %v3857_v40  ;;  %v3659_v9 = vld [vmem:[%s6857_s3 + $0xd0] sm:$0xff]  ;;  %v3664_v40 = vld [vmem:[%s6857_s3 + $0xf8] sm:$0xff] }
  0x9d   : > { %4958 = vmatprep.subr.bf16.mxu0 %v4957_v62  ;;  %4374 = vmatprep.mubr.msk.f32.mxu1 %vm301_vm0, %v5824_v2  ;;  %v6981_v5 = vld [vmem:[#allocation28_spill] sm:$0xff] }
  0x9f   : > { %4668 = vmatmul.mubr.msk.f32.gmra.mrb[4].mxu0 %vm301_vm0, %v5564_v18  ;;  %4375 = vmatmul.mubr.msk.f32.gmra.mrb[22].mxu1 %vm301_vm0, %v5826_v60  ;;  %v5254_v18 = vld [vmem:[#allocation2] sm:$0xff] }
  0xa0   : > { %4670 = vmatprep.mubr.msk.f32.mxu0 %vm301_vm0, %v5590_v32  ;;  %4960 = vmatpush3.bf16.msra.mxu0 %v4957_v62  ;;  %v1169_v32 = vrot.slane %v5254_v18, 2  ;;  %v3661_v62 = vld [vmem:[%s6857_s3 + $0xe0] sm:$0xff]  ;;  %v6982_v18 = vld [vmem:[#allocation3_spill] sm:$0xff] }
  0xa1   : > { %4962 = vmatprep.subr.bf16.mxu0 %v4961_v4  ;;  %4377 = vmatprep.mubr.msk.f32.mxu1 %vm301_vm0, %v5863_v21  ;;  %v4893_v63 = vpack.c.bf16 %v3662_v24, %v3661_v62  ;;  %v3861_v24 = vld [vmem:[%s6857_s3 + $0x220] sm:$0xff] }
  0xa3   : > { %4671 = vmatmul.mubr.msk.f32.gmra.mrb[6].mxu0 %vm301_vm0, %v5592_v33  ;;  %4378 = vmatmul.mubr.msk.f32.gmra.mrb[24].mxu1 %vm301_vm0, %v5865_v48  ;;  %v5255_v33 = vld [vmem:[#allocation2 + $0x8] sm:$0xff] }
  0xa4   : > { %4673 = vmatprep.mubr.msk.f32.mxu0 %vm301_vm0, %v5606_v41  ;;  %4964 = vmatpush3.bf16.msra.mxu0 %v4961_v4  ;;  %v1170_v41 = vrot.slane %v5255_v33, 2  ;;  %v3663_v4 = vld [vmem:[%s6857_s3 + $0xf0] sm:$0xff]  ;;  %v6984_v33 = vld [vmem:[#allocation32_spill] sm:$0xff] }
  0xa5   : > { %4966 = vmatprep.subr.bf16.mxu0 %v6269_v17  ;;  %4380 = vmatprep.mubr.msk.f32.mxu1 %vm301_vm0, %v5901_v22 }
  0xa6   : > { %v1171_v12 = vsel %vm1168_vm3, %v1169_v32, %v1170_v41  ;;  %v6983_v32 = vld [vmem:[#allocation30_spill] sm:$0xff] }
  0xa7   : > { %4674 = vmatmul.mubr.msk.f32.gmra.mrb[8].mxu0 %vm301_vm0, %v5619_v45  ;;  %4381 = vmatmul.mubr.msk.f32.gmra.mrb[26].mxu1 %vm301_vm0, %v5903_v29  ;;  %v1172_v45 = vrot.slane %v5475_v34, 2  ;;  %v3660_v34 = vld [vmem:[%s6857_s3 + $0xd8] sm:$0xff] }
  0xa8   : > { %4676 = vmatprep.mubr.msk.f32.mxu0 %vm301_vm0, %v5686_v36  ;;  %4383 = vmatprep.mubr.msk.f32.mxu1 %vm301_vm0, %v5939_v46  ;;  %v4889_v55 = vpack.c.bf16 %v3660_v34, %v3659_v9  ;;  %v6391_v9 = vld [vmem:[#allocation2 + $0x1a0] sm:$0xff]  ;;  %v3859_v34 = vld [vmem:[%s6857_s3 + $0x210] sm:$0xff] }
  0xa9   : > { %v1173_v23 = vsel %vm1168_vm3, %v1170_v41, %v1172_v45  ;;  %v6985_v41 = vld [vmem:[#allocation34_spill] sm:$0xff]  ;;  %v6381_v45 = vld [vmem:[#allocation2 + $0x198] sm:$0xff] }
  0xab   : > { %4677 = vmatmul.mubr.msk.f32.gmra.mrb[10].mxu0 %vm301_vm0, %v5688_v38  ;;  %4384 = vmatmul.mubr.msk.f32.gmra.mrb[28].mxu1 %vm301_vm0, %v5941_v43 }
  0xac   : > { %4679 = vmatprep.mubr.msk.f32.mxu0 %vm301_vm0, %v5721_v53  ;;  %4386 = vmatprep.mubr.msk.f32.mxu1 %vm301_vm0, %v5973_v39 }
  0xaf   : > { %4680 = vmatmul.mubr.msk.f32.gmra.mrb[12].mxu0 %vm301_vm0, %v5723_v54  ;;  %4387 = vmatmul.mubr.msk.f32.gmra.mrb[30].mxu1 %vm301_vm0, %v5975_v15 }
  0xb0   : > { %4682 = vmatprep.mubr.msk.f32.mxu0 %vm301_vm0, %v5760_v16  ;;  %4405 = vmatprep.mubr.msk.f32.mxu1 %vm301_vm0, %v1171_v12  ;;  %v6986_v12 = vld [vmem:[#allocation37_spill] sm:$0xff] }
  0xb3   : > { %4683 = vmatmul.mubr.msk.f32.gmra.mrb[14].mxu0 %vm301_vm0, %v5762_v20  ;;  %4406 = vmatmul.mubr.msk.f32.vlgmr.msra.gmra.mrb[0].mxu1 %vm301_vm0, %v1173_v23  ;;  %v3860_v23 = vld [vmem:[%s6857_s3 + $0x218] sm:$0xff] }
  0xb4   : > { %4685 = vmatprep.mubr.msk.f32.mxu0 %vm301_vm0, %v5789_v49  ;;  %4888 = vmatpush3.bf16.msra.mxu1 %v6143_v11  ;;  %v6980_v11 = vld [vmem:[#allocation26_spill] sm:$0xff]  ;;  %v4969_v62 = vpack.c.bf16 %v3860_v23, %v3859_v34  ;;  %v3863_v34 = vld [vmem:[%s6857_s3 + $0x230] sm:$0xff]  ;;  %v3864_v23 = vld [vmem:[%s6857_s3 + $0x238] sm:$0xff] }
  0xb5   : > { %4408 = vmatprep.mubr.msk.f32.mxu1 %vm301_vm0, %v5785_v57  ;;  %4890 = vmatprep.subr.bf16.mxu1 %v4889_v55  ;;  %v4897_v57 = vpack.c.bf16 %v3664_v40, %v3663_v4  ;;  %v6988_v4 = vld [vmem:[#allocation8_spill] sm:$0xff]  ;;  %v6989_v40 = vld [vmem:[#allocation9_spill] sm:$0xff] }
  0xb7   : > { %4686 = vmatmul.mubr.msk.f32.gmra.mrb[16].mxu0 %vm301_vm0, %v5791_v59  ;;  %4409 = vmatmul.mubr.msk.f32.gmra.mrb[2].mxu1 %vm301_vm0, %v5806_v7  ;;  %v6979_v7 = vld [vmem:[#allocation24_spill] sm:$0xff] }
  0xb8   : > { %4688 = vmatprep.mubr.msk.f32.mxu0 %vm301_vm0, %v5824_v2  ;;  %4411 = vmatprep.mubr.msk.f32.mxu1 %vm301_vm0, %v5820_v10 }
  0xb9   : > { %4892 = vmatpush3.bf16.msra.mxu1 %v4889_v55  ;;  %v6987_v55 = vld [vmem:[#allocation7_spill] sm:$0xff] }
  0xba   : > { %4894 = vmatprep.subr.bf16.mxu1 %v4893_v63 }
  0xbb   : > { %4689 = vmatmul.mubr.msk.f32.gmra.mrb[18].mxu0 %vm301_vm0, %v5826_v60  ;;  %4412 = vmatmul.mubr.msk.f32.gmra.mrb[4].mxu1 %vm301_vm0, %v5849_v30 }
  0xbc   : > { %4691 = vmatprep.mubr.msk.f32.mxu0 %vm301_vm0, %v5863_v21  ;;  %4414 = vmatprep.mubr.msk.f32.mxu1 %vm301_vm0, %v6979_v7 }
  0xbd   : > { %4896 = vmatpush3.bf16.msra.mxu1 %v4893_v63  ;;  %v3862_v63 = vld [vmem:[%s6857_s3 + $0x228] sm:$0xff] }
  0xbe   : > { %4898 = vmatprep.subr.bf16.mxu1 %v4897_v57 }
  0xbf   : > { %4692 = vmatmul.mubr.msk.f32.gmra.mrb[20].mxu0 %vm301_vm0, %v5865_v48  ;;  %4415 = vmatmul.mubr.msk.f32.gmra.mrb[6].mxu1 %vm301_vm0, %v6980_v11 }
  0xc0   : > { %4694 = vmatprep.mubr.msk.f32.mxu0 %vm301_vm0, %v5901_v22  ;;  %4417 = vmatprep.mubr.msk.f32.mxu1 %vm301_vm0, %v6981_v5 }
  0xc1   : > { %4900 = vmatpush3.bf16.msra.mxu1 %v4897_v57  ;;  %v4973_v57 = vpack.c.bf16 %v3862_v63, %v3861_v24  ;;  %v4977_v24 = vpack.c.bf16 %v3864_v23, %v3863_v34  ;;  %v6992_v63 = vld [vmem:[#allocation12_spill] sm:$0xff]  ;;  %v6998_v23 = vld [vmem:[#allocation18_spill] sm:$0xff] }
  0xc2   : > { %4981 = vmatprep.subr.bf16.mxu1 %v6982_v18  ;;  %v6996_v34 = vld [vmem:[#allocation16_spill] sm:$0xff] }
  0xc3   : > { %4695 = vmatmul.mubr.msk.f32.gmra.mrb[22].mxu0 %vm301_vm0, %v5903_v29  ;;  %4418 = vmatmul.mubr.msk.f32.gmra.mrb[8].mxu1 %vm301_vm0, %v6983_v32 }
  0xc4   : > { %4697 = vmatprep.mubr.msk.f32.mxu0 %vm301_vm0, %v5939_v46  ;;  %4420 = vmatprep.mubr.msk.f32.mxu1 %vm301_vm0, %v6984_v33 }
  0xc7   : > { %4698 = vmatmul.mubr.msk.f32.gmra.mrb[24].mxu0 %vm301_vm0, %v5941_v43  ;;  %4421 = vmatmul.mubr.msk.f32.gmra.mrb[10].mxu1 %vm301_vm0, %v6985_v41 }
  0xc8   : > { %4700 = vmatprep.mubr.msk.f32.mxu0 %vm301_vm0, %v5973_v39  ;;  %4423 = vmatprep.mubr.msk.f32.mxu1 %vm301_vm0, %v5969_v47 }
  0xcb   : > { %4701 = vmatmul.mubr.msk.f32.gmra.mrb[26].mxu0 %vm301_vm0, %v5975_v15  ;;  %4424 = vmatmul.mubr.msk.f32.gmra.mrb[12].mxu1 %vm301_vm0, %v6986_v12 }
  0xcc   : > { %4703 = vmatprep.mubr.msk.f32.mxu0 %vm301_vm0, %v6165_v37  ;;  %4426 = vmatprep.mubr.msk.f32.mxu1 %vm301_vm0, %v6002_v52 }
  0xcf   : > { %4704 = vmatmul.mubr.msk.f32.gmra.mrb[28].mxu0 %vm301_vm0, %v6167_v28  ;;  %4427 = vmatmul.mubr.msk.f32.gmra.mrb[14].mxu1 %vm301_vm0, %v6019_v31 }
  0xd0   : > { %4706 = vmatprep.mubr.msk.f32.mxu0 %vm301_vm0, %v6381_v45  ;;  %4429 = vmatprep.mubr.msk.f32.mxu1 %vm301_vm0, %v6026_v61 }
  0xd3   : > { %4707 = vmatmul.mubr.msk.f32.gmra.mrb[30].mxu0 %vm301_vm0, %v6391_v9  ;;  %4430 = vmatmul.mubr.msk.f32.gmra.mrb[16].mxu1 %vm301_vm0, %v6042_v1 }
  0xd4   : > { %4725 = vmatprep.mubr.msk.f32.mxu0 %vm301_vm0, %v6987_v55  ;;  %4432 = vmatprep.mubr.msk.f32.mxu1 %vm301_vm0, %v6046_v14  ;;  %v6990_v55 = vld [vmem:[#allocation10_spill] sm:$0xff] }
  0xd7   : > { %4726 = vmatmul.mubr.msk.f32.vlgmr.msra.gmra.mrb[0].mxu0 %vm301_vm0, %v6988_v4  ;;  %4433 = vmatmul.mubr.msk.f32.gmra.mrb[18].mxu1 %vm301_vm0, %v6065_v42  ;;  %v6993_v4 = vld [vmem:[#allocation13_spill] sm:$0xff] }
  0xd8   : > { %4968 = vmatpush3.bf16.msra.mxu0 %v6269_v17  ;;  %4728 = vmatprep.mubr.msk.f32.mxu0 %vm301_vm0, %v6989_v40  ;;  %v6991_v17 = vld [vmem:[#allocation11_spill] sm:$0xff] }
  0xd9   : > { %4970 = vmatprep.subr.bf16.mxu0 %v4969_v62  ;;  %4435 = vmatprep.mubr.msk.f32.mxu1 %vm301_vm0, %v6069_v3  ;;  %v6995_v40 = vld [vmem:[#allocation15_spill] sm:$0xff] }
  0xdb   : > { %4729 = vmatmul.mubr.msk.f32.gmra.mrb[2].mxu0 %vm301_vm0, %v6990_v55  ;;  %4436 = vmatmul.mubr.msk.f32.gmra.mrb[20].mxu1 %vm301_vm0, %v6089_v13  ;;  %v6999_v55 = vld [vmem:[#allocation19_spill] sm:$0xff] }
  0xdc   : > { %4731 = vmatprep.mubr.msk.f32.mxu0 %vm301_vm0, %v6991_v17  ;;  %4972 = vmatpush3.bf16.msra.mxu0 %v4969_v62  ;;  %v6994_v62 = vld [vmem:[#allocation14_spill] sm:$0xff]  ;;  %v7000_v17 = vld [vmem:[#allocation20_spill] sm:$0xff] }
  0xdd   : > { %4974 = vmatprep.subr.bf16.mxu0 %v4973_v57  ;;  %4438 = vmatprep.mubr.msk.f32.mxu1 %vm301_vm0, %v6093_v35 }
  0xdf   : > { %4732 = vmatmul.mubr.msk.f32.gmra.mrb[4].mxu0 %vm301_vm0, %v6992_v63  ;;  %4439 = vmatmul.mubr.msk.f32.gmra.mrb[22].mxu1 %vm301_vm0, %v6112_v19  ;;  %v7002_v63 = vld [vmem:[#allocation22_spill] sm:$0xff] }
  0xe0   : > { %4734 = vmatprep.mubr.msk.f32.mxu0 %vm301_vm0, %v6993_v4  ;;  %4976 = vmatpush3.bf16.msra.mxu0 %v4973_v57  ;;  %v6997_v57 = vld [vmem:[#allocation17_spill] sm:$0xff]  ;;  %v5256_v4 = vld [vmem:[#allocation2 + $0x18] sm:$0xff] }
  0xe1   : > { %4978 = vmatprep.subr.bf16.mxu0 %v4977_v24  ;;  %4441 = vmatprep.mubr.msk.f32.mxu1 %vm301_vm0, %v6116_v8 }
  0xe3   : > { %4735 = vmatmul.mubr.msk.f32.gmra.mrb[6].mxu0 %vm301_vm0, %v6994_v62  ;;  %4442 = vmatmul.mubr.msk.f32.gmra.mrb[24].mxu1 %vm301_vm0, %v6135_v6  ;;  %v7003_v62 = vld [vmem:[#allocation23_spill] sm:$0xff] }
  0xe4   : > { %4737 = vmatprep.mubr.msk.f32.mxu0 %vm301_vm0, %v6995_v40  ;;  %4980 = vmatpush3.bf16.msra.mxu0 %v4977_v24  ;;  %v7001_v24 = vld [vmem:[#allocation21_spill] sm:$0xff] }
  0xe5   : > { %4444 = vmatprep.mubr.msk.f32.mxu1 %vm301_vm0, %v6139_v27  ;;  %v5257_v40 = vld [vmem:[#allocation2 + $0x20] sm:$0xff] }
  0xe7   : > { %4738 = vmatmul.mubr.msk.f32.gmra.mrb[8].mxu0 %vm301_vm0, %v6996_v34  ;;  %4445 = vmatmul.mubr.msk.f32.gmra.mrb[26].mxu1 %vm301_vm0, %v6154_v58  ;;  %v7004_v34 = vld [vmem:[#allocation25_spill] sm:$0xff] }
  0xe8   : > { %4740 = vmatprep.mubr.msk.f32.mxu0 %vm301_vm0, %v6997_v57  ;;  %4447 = vmatprep.mubr.msk.f32.mxu1 %vm301_vm0, %v6158_v51  ;;  %v5258_v57 = vld [vmem:[#allocation2 + $0x30] sm:$0xff]  ;;  %v5265_v51 = vld [vmem:[#allocation2 + $0x80] sm:$0xff] }
  0xeb   : > { %4741 = vmatmul.mubr.msk.f32.gmra.mrb[10].mxu0 %vm301_vm0, %v6998_v23  ;;  %4448 = vmatmul.mubr.msk.f32.gmra.mrb[28].mxu1 %vm301_vm0, %v6176_v25  ;;  %v7005_v23 = vld [vmem:[#allocation27_spill] sm:$0xff]  ;;  %v7014_v25 = vld [vmem:[#allocation38_spill] sm:$0xff] }
  0xec   : > { %4743 = vmatprep.mubr.msk.f32.mxu0 %vm301_vm0, %v6999_v55  ;;  %4450 = vmatprep.mubr.msk.f32.mxu1 %vm301_vm0, %v6180_v26  ;;  %v7006_v55 = vld [vmem:[#allocation4_spill] sm:$0xff]  ;;  %v5263_v26 = vld [vmem:[#allocation2 + $0x68] sm:$0xff] }
  0xef   : > { %4744 = vmatmul.mubr.msk.f32.gmra.mrb[12].mxu0 %vm301_vm0, %v7000_v17  ;;  %4451 = vmatmul.mubr.msk.f32.gmra.mrb[30].mxu1 %vm301_vm0, %v6195_v44  ;;  %v5259_v17 = vld [vmem:[#allocation2 + $0x38] sm:$0xff]  ;;  %v7011_v44 = vld [vmem:[#allocation35_spill] sm:$0xff] }
  0xf0   : > { %4746 = vmatprep.mubr.msk.f32.mxu0 %vm301_vm0, %v7001_v24  ;;  %4469 = vmatprep.mubr.msk.f32.mxu1 %vm301_vm0, %v5256_v4  ;;  %v7007_v4 = vld [vmem:[#allocation29_spill] sm:$0xff] }
  0xf3   : > { %4747 = vmatmul.mubr.msk.f32.gmra.mrb[14].mxu0 %vm301_vm0, %v7002_v63  ;;  %4470 = vmatmul.mubr.msk.f32.vlgmr.msra.gmra.mrb[0].mxu1 %vm301_vm0, %v5257_v40  ;;  %v5260_v40 = vld [vmem:[#allocation2 + $0x48] sm:$0xff] }
  0xf4   : > { %4749 = vmatprep.mubr.msk.f32.mxu0 %vm301_vm0, %v7003_v62  ;;  %4985 = vmatpush3.bf16.msra.mxu1 %v6982_v18  ;;  %v7009_v18 = vld [vmem:[#allocation5_spill] sm:$0xff] }
  0xf5   : > { %4472 = vmatprep.mubr.msk.f32.mxu1 %vm301_vm0, %v5258_v57  ;;  %4982 = vmatprep.subr.bf16.mxu1 %v7006_v55  ;;  %v5261_v57 = vld [vmem:[#allocation2 + $0x50] sm:$0xff] }
  0xf7   : > { %4750 = vmatmul.mubr.msk.f32.gmra.mrb[16].mxu0 %vm301_vm0, %v7004_v34  ;;  %4473 = vmatmul.mubr.msk.f32.gmra.mrb[2].mxu1 %vm301_vm0, %v5259_v17  ;;  %v5262_v17 = vld [vmem:[#allocation2 + $0x60] sm:$0xff] }
  0xf8   : > { %4752 = vmatprep.mubr.msk.f32.mxu0 %vm301_vm0, %v7005_v23  ;;  %4475 = vmatprep.mubr.msk.f32.mxu1 %vm301_vm0, %v5260_v40  ;;  %v7012_v40 = vld [vmem:[#allocation6_spill] sm:$0xff] }
  0xf9   : > { %4986 = vmatpush3.bf16.msra.mxu1 %v7006_v55  ;;  %v7013_v55 = vld [vmem:[#allocation36_spill] sm:$0xff] }
  0xfa   : > { %4983 = vmatprep.subr.bf16.mxu1 %v7009_v18 }
  0xfb   : > { %4753 = vmatmul.mubr.msk.f32.gmra.mrb[18].mxu0 %vm301_vm0, %v7007_v4  ;;  %4476 = vmatmul.mubr.msk.f32.gmra.mrb[4].mxu1 %vm301_vm0, %v5261_v57  ;;  %v5264_v57 = vld [vmem:[#allocation2 + $0x78] sm:$0xff] }
  0xfc   : > { %4755 = vmatprep.mubr.msk.f32.mxu0 %vm301_vm0, %v7008_v56  ;;  %4478 = vmatprep.mubr.msk.f32.mxu1 %vm301_vm0, %v5262_v17  ;;  %v1852_v17 = vrot.slane %v6165_v37, 1 }
  0xfd   : > { %4987 = vmatpush3.bf16.msra.mxu1 %v7009_v18  ;;  %v1853_v18 = vrot.slane %v6167_v28, 1 }
  0xfe   : > { %4984 = vmatprep.subr.bf16.mxu1 %v7012_v40 }
  0xff   : > { %4756 = vmatmul.mubr.msk.f32.gmra.mrb[20].mxu0 %vm301_vm0, %v7010_v0  ;;  %4479 = vmatmul.mubr.msk.f32.gmra.mrb[6].mxu1 %vm301_vm0, %v5263_v26  ;;  %v5266_v26 = vld [vmem:[#allocation2 + $0x90] sm:$0xff]  ;;  %v6526_v58 = vsel %vm500_vm2, %v1852_v17, %v1853_v18  ;;  %v6528_v0 = vld [vmem:[#allocation2 + $0x1a8] sm:$0x3] }
 0x100   : > { %4758 = vmatprep.mubr.msk.f32.mxu0 %vm301_vm0, %v7011_v44  ;;  %4481 = vmatprep.mubr.msk.f32.mxu1 %vm301_vm0, %v5264_v57  ;;  %v7015_v44 = vld [vmem:[#allocation39_spill] sm:$0xff]  ;;  %v1855_v57 = vrot.slane %v6184_v50, 1  ;;  %v2678_v17 = vrot.slane %v6528_v0, 1 }
 0x101   : > { %4988 = vmatpush3.bf16.msra.mxu1 %v7012_v40  ;;  %v2675_v40 = vrot.slane %v6381_v45, 1 }
 0x102   : > { %v6538_v50 = vsel %vm500_vm2, %v1853_v18, %v1855_v57 }
 0x103   : > { %4759 = vmatmul.mubr.msk.f32.gmra.mrb[22].mxu0 %vm301_vm0, %v7013_v55  ;;  %4482 = vmatmul.mubr.msk.f32.gmra.mrb[8].mxu1 %vm301_vm0, %v5265_v51  ;;  %v7016_v55 = vld [vmem:[#allocation40_spill] sm:$0xff] }
 0x104   : > { %4761 = vmatprep.mubr.msk.f32.mxu0 %vm301_vm0, %v7014_v25  ;;  %4484 = vmatprep.mubr.msk.f32.mxu1 %vm301_vm0, %v5266_v26  ;;  %v2676_v25 = vrot.slane %v6391_v9, 1  ;;  %v5267_v51 = vld [vmem:[#allocation2 + $0x98] sm:$0xff] }
 0x106   : > { %v2677_v26 = vsel %vm500_vm2, %v2675_v40, %v2676_v25 }
 0x107   : > { %4762 = vmatmul.mubr.msk.f32.gmra.mrb[24].mxu0 %vm301_vm0, %v7015_v44  ;;  %4485 = vmatmul.mubr.msk.f32.gmra.mrb[10].mxu1 %vm301_vm0, %v5267_v51  ;;  %v7017_v44 = vld [vmem:[#allocation41_spill] sm:$0xff] }
 0x108   : > { %4764 = vmatprep.mubr.msk.f32.mxu0 %vm301_vm0, %v7016_v55  ;;  %4487 = vmatprep.mubr.msk.f32.mxu1 %vm301_vm0, %v5686_v36  ;;  %v2679_v36 = vsel %vm500_vm2, %v2676_v25, %v2678_v17 }
 0x10b   : > { %4765 = vmatmul.mubr.msk.f32.gmra.mrb[26].mxu0 %vm301_vm0, %v7017_v44  ;;  %4488 = vmatmul.mubr.msk.f32.gmra.mrb[12].mxu1 %vm301_vm0, %v5688_v38  ;;  %v7020_v38 = vld [vmem:[#allocation35_spill] sm:$0xff] }
 0x10c   : > { %4767 = vmatprep.mubr.msk.f32.mxu0 %vm301_vm0, %v6526_v58  ;;  %4490 = vmatprep.mubr.msk.f32.mxu1 %vm301_vm0, %v5721_v53  ;;  %v7021_v53 = vld [vmem:[#allocation43_spill] sm:$0xff] }
 0x10f   : > { %4768 = vmatmul.mubr.msk.f32.gmra.mrb[28].mxu0 %vm301_vm0, %v6538_v50  ;;  %4491 = vmatmul.mubr.msk.f32.gmra.mrb[14].mxu1 %vm301_vm0, %v5723_v54  ;;  %v7022_v54 = vld [vmem:[#allocation36_spill] sm:$0xff] }
 0x110   : > { %4770 = vmatprep.mubr.msk.f32.mxu0 %vm301_vm0, %v2677_v26  ;;  %4493 = vmatprep.mubr.msk.f32.mxu1 %vm301_vm0, %v5760_v16  ;;  %v2950_v16 = vrot.slane %v6381_v45, 2 }
 0x113   : > { %4771 = vmatmul.mubr.msk.f32.gmra.mrb[30].mxu0 %vm301_vm0, %v2679_v36  ;;  %4494 = vmatmul.mubr.msk.f32.gmra.mrb[16].mxu1 %vm301_vm0, %v5762_v20  ;;  %v2951_v20 = vrot.slane %v6391_v9, 2 }
 0x114   : > { %4789 = vmatprep.mubr.msk.f32.mxu0 %vm301_vm0, %v5820_v10  ;;  %4496 = vmatprep.mubr.msk.f32.mxu1 %vm301_vm0, %v5789_v49  ;;  %v7025_v10 = vld [vmem:[#allocation45_spill] sm:$0xff]  ;;  %v7027_v49 = vld [vmem:[#allocation46_spill] sm:$0xff] }
 0x117   : > { %4790 = vmatmul.mubr.msk.f32.vlgmr.msra.gmra.mrb[0].mxu0 %vm301_vm0, %v5849_v30  ;;  %4497 = vmatmul.mubr.msk.f32.gmra.mrb[18].mxu1 %vm301_vm0, %v5791_v59  ;;  %v7026_v30 = vld [vmem:[#allocation39_spill] sm:$0xff] }
 0x118   : > { %4792 = vmatprep.mubr.msk.f32.mxu0 %vm301_vm0, %v6979_v7  ;;  %4499 = vmatprep.mubr.msk.f32.mxu1 %vm301_vm0, %v5824_v2  ;;  %v7024_v2 = vld [vmem:[#allocation38_spill] sm:$0xff]  ;;  %v7028_v59 = vld [vmem:[#allocation47_spill] sm:$0xff] }
 0x11b   : > { %4793 = vmatmul.mubr.msk.f32.gmra.mrb[2].mxu0 %vm301_vm0, %v6980_v11  ;;  %4500 = vmatmul.mubr.msk.f32.gmra.mrb[20].mxu1 %vm301_vm0, %v5826_v60  ;;  %v7023_v60 = vld [vmem:[#allocation44_spill] sm:$0xff] }
 0x11c   : > { %4795 = vmatprep.mubr.msk.f32.mxu0 %vm301_vm0, %v6981_v5  ;;  %4502 = vmatprep.mubr.msk.f32.mxu1 %vm301_vm0, %v5863_v21  ;;  %v7019_v21 = vld [vmem:[#allocation42_spill] sm:$0xff] }
 0x11f   : > { %4796 = vmatmul.mubr.msk.f32.gmra.mrb[4].mxu0 %vm301_vm0, %v6983_v32  ;;  %4503 = vmatmul.mubr.msk.f32.gmra.mrb[22].mxu1 %vm301_vm0, %v5865_v48  ;;  %v2953_v48 = vrot.slane %v6528_v0, 2 }
 0x120   : > { %4798 = vmatprep.mubr.msk.f32.mxu0 %vm301_vm0, %v6984_v33  ;;  %4505 = vmatprep.mubr.msk.f32.mxu1 %vm301_vm0, %v5901_v22  ;;  %v7018_v22 = vld [vmem:[#allocation33_spill] sm:$0xff] }
 0x123   : > { %4799 = vmatmul.mubr.msk.f32.gmra.mrb[6].mxu0 %vm301_vm0, %v6985_v41  ;;  %4506 = vmatmul.mubr.msk.f32.gmra.mrb[24].mxu1 %vm301_vm0, %v5903_v29  ;;  %v2952_v29 = vsel %vm1168_vm3, %v2950_v16, %v2951_v20 }
 0x124   : > { %4801 = vmatprep.mubr.msk.f32.mxu0 %vm301_vm0, %v5969_v47  ;;  %4508 = vmatprep.mubr.msk.f32.mxu1 %vm301_vm0, %v5939_v46  ;;  %v2954_v46 = vsel %vm1168_vm3, %v2951_v20, %v2953_v48 }
 0x127   : > { %4802 = vmatmul.mubr.msk.f32.gmra.mrb[8].mxu0 %vm301_vm0, %v6986_v12  ;;  %4509 = vmatmul.mubr.msk.f32.gmra.mrb[26].mxu1 %vm301_vm0, %v5941_v43 }
 0x128   : > { %4804 = vmatprep.mubr.msk.f32.mxu0 %vm301_vm0, %v6002_v52  ;;  %4511 = vmatprep.mubr.msk.f32.mxu1 %vm301_vm0, %v5973_v39  ;;  %v7029_v39 = vld [vmem:[#allocation48_spill] sm:$0xff] }
 0x12b   : > { %4805 = vmatmul.mubr.msk.f32.gmra.mrb[10].mxu0 %vm301_vm0, %v6019_v31  ;;  %4512 = vmatmul.mubr.msk.f32.gmra.mrb[28].mxu1 %vm301_vm0, %v5975_v15 }
 0x12c   : > { %4807 = vmatprep.mubr.msk.f32.mxu0 %vm301_vm0, %v6026_v61  ;;  %4514 = vmatprep.mubr.msk.f32.mxu1 %vm301_vm0, %v6165_v37 }
 0x12f   : > { %4808 = vmatmul.mubr.msk.f32.gmra.mrb[12].mxu0 %vm301_vm0, %v6042_v1  ;;  %4515 = vmatmul.mubr.msk.f32.gmra.mrb[30].mxu1 %vm301_vm0, %v6167_v28 }
 0x130   : > { %4810 = vmatprep.mubr.msk.f32.mxu0 %vm301_vm0, %v6046_v14  ;;  %4557 = vmatprep.mubr.msk.f32.mxu1 %vm301_vm0, %v7001_v24 }
 0x133   : > { %4811 = vmatmul.mubr.msk.f32.gmra.mrb[14].mxu0 %vm301_vm0, %v6065_v42  ;;  %4558 = vmatmul.mubr.msk.f32.vlgmr.msra.gmra.mrb[16].mxu1 %vm301_vm0, %v7002_v63 }
 0x134   : > { %4813 = vmatprep.mubr.msk.f32.mxu0 %vm301_vm0, %v6069_v3  ;;  %4560 = vmatprep.mubr.msk.f32.mxu1 %vm301_vm0, %v7003_v62 }
 0x137   : > { %4814 = vmatmul.mubr.msk.f32.gmra.mrb[16].mxu0 %vm301_vm0, %v6089_v13  ;;  %4561 = vmatmul.mubr.msk.f32.gmra.mrb[18].mxu1 %vm301_vm0, %v7004_v34 }
 0x138   : > { %4816 = vmatprep.mubr.msk.f32.mxu0 %vm301_vm0, %v6093_v35  ;;  %4563 = vmatprep.mubr.msk.f32.mxu1 %vm301_vm0, %v7005_v23 }
 0x13b   : > { %4817 = vmatmul.mubr.msk.f32.gmra.mrb[18].mxu0 %vm301_vm0, %v6112_v19  ;;  %4564 = vmatmul.mubr.msk.f32.gmra.mrb[20].mxu1 %vm301_vm0, %v7007_v4 }
 0x13c   : > { %4819 = vmatprep.mubr.msk.f32.mxu0 %vm301_vm0, %v6116_v8  ;;  %4566 = vmatprep.mubr.msk.f32.mxu1 %vm301_vm0, %v7008_v56 }
 0x13f   : > { %4820 = vmatmul.mubr.msk.f32.gmra.mrb[20].mxu0 %vm301_vm0, %v6135_v6  ;;  %4567 = vmatmul.mubr.msk.f32.gmra.mrb[22].mxu1 %vm301_vm0, %v7018_v22 }
 0x140   : > { %4822 = vmatprep.mubr.msk.f32.mxu0 %vm301_vm0, %v6139_v27  ;;  %4569 = vmatprep.mubr.msk.f32.mxu1 %vm301_vm0, %v7020_v38 }
 0x143   : > { %4823 = vmatmul.mubr.msk.f32.gmra.mrb[22].mxu0 %vm301_vm0, %v7019_v21  ;;  %4570 = vmatmul.mubr.msk.f32.gmra.mrb[24].mxu1 %vm301_vm0, %v7022_v54 }
 0x144   : > { %4825 = vmatprep.mubr.msk.f32.mxu0 %vm301_vm0, %v7021_v53  ;;  %4572 = vmatprep.mubr.msk.f32.mxu1 %vm301_vm0, %v7024_v2 }
 0x147   : > { %4826 = vmatmul.mubr.msk.f32.gmra.mrb[24].mxu0 %vm301_vm0, %v7023_v60  ;;  %4573 = vmatmul.mubr.msk.f32.gmra.mrb[26].mxu1 %vm301_vm0, %v7026_v30 }
 0x148   : > { %4828 = vmatprep.mubr.msk.f32.mxu0 %vm301_vm0, %v7025_v10  ;;  %4575 = vmatprep.mubr.msk.f32.mxu1 %vm301_vm0, %v7016_v55 }
 0x14b   : > { %4829 = vmatmul.mubr.msk.f32.gmra.mrb[26].mxu0 %vm301_vm0, %v7027_v49  ;;  %4576 = vmatmul.mubr.msk.f32.gmra.mrb[28].mxu1 %vm301_vm0, %v7017_v44 }
 0x14c   : > { %4831 = vmatprep.mubr.msk.f32.mxu0 %vm301_vm0, %v7028_v59  ;;  %4578 = vmatprep.mubr.msk.f32.mxu1 %vm301_vm0, %v6526_v58 }
 0x14f   : > { %4832 = vmatmul.mubr.msk.f32.gmra.mrb[28].mxu0 %vm301_vm0, %v7029_v39  ;;  %4579 = vmatmul.mubr.msk.f32.gmra.mrb[30].mxu1 %vm301_vm0, %v6538_v50 }
 0x150   : > { %4834 = vmatprep.mubr.msk.f32.mxu0 %vm301_vm0, %v2952_v29 }
 0x153   : > { %4835 = vmatmul.mubr.msk.f32.gmra.mrb[30].mxu0 %vm301_vm0, %v2954_v46 }
 0x1c6   : > { %v4471_v43 = vpop.f32.mrb[0].mxu1 }
 0x1c7   : > { %v1660_v47 = vpop.f32.mrb[1].mxu1 }
 0x1ca   : > { %v4474_v15 = vpop.f32.mrb[2].mxu1 }
 0x1cb   : > { %v1670_v61 = vpop.f32.mrb[3].mxu1 }
 0x1ce   : > { %v4477_v52 = vpop.f32.mrb[4].mxu1 }
 0x1cf   : > { %v1680_v31 = vpop.f32.mrb[5].mxu1 }
 0x1d2   : > { %v4480_v1 = vpop.f32.mrb[6].mxu1 }
 0x1d3   : > { %v1690_v14 = vpop.f32.mrb[7].mxu1 }
 0x1d6   : > { %v6684_v42 = vpop.f32.mrb[8].mxu1 }
 0x1d7   : > { %v6686_v3 = vpop.f32.mrb[9].mxu1 }
 0x1da   : > { %v6688_v13 = vpop.f32.mrb[10].mxu1 }
 0x1db   : > { %v6690_v35 = vpop.f32.mrb[11].mxu1 }
 0x1de   : > { %v6692_v19 = vpop.f32.mrb[12].mxu1 }
 0x1df   : > { %v6694_v8 = vpop.f32.mrb[13].mxu1 }
 0x1e2   : > { %v6696_v6 = vpop.f32.mrb[14].mxu1 }
 0x1e3   : > { %v6698_v27 = vpop.f32.mrb[15].mxu1 }
 0x1ea   : > { %v4791_v58 = vpop.f32.mrb[0].mxu0 }
 0x1eb   : > { %v4989_v37 = vadd.f32 %v4791_v58, %v4471_v43  ;;  %v3034_v28 = vpop.f32.mrb[1].mxu0 }
 0x1ec   : > { %v4990_v25 = vadd.f32 %v3034_v28, %v1660_v47 }
 0x1ed   : > { %3227 = vst.msk [vmem:[%s6705_s10 + $0x8] sm:$0xff] %vm3225_vm4, %v4989_v37  ;;  %v3259_v44 = vsel %vm3225_vm4, %v4989_v37, 0.0  ;;  %v3330_v0 = vmul.f32 %v4989_v37, %v4989_v37 }
 0x1ee   : > { %3226 = vst.msk [vmem:[%s6705_s10] sm:$0xff] %vm3225_vm4, %v4990_v25  ;;  %v3258_v56 = vsel %vm3225_vm4, %v4990_v25, 0.0  ;;  %v3329_v7 = vmul.f32 %v4990_v25, %v4990_v25  ;;  %v4794_v11 = vpop.f32.mrb[2].mxu0 }
 0x1ef   : > { %v3362_v5 = vsel %vm3225_vm4, %v3330_v0, 0.0  ;;  %v3260_v32 = vadd.f32 %v3259_v44, %v3258_v56  ;;  %v4991_v33 = vadd.f32 %v4794_v11, %v4474_v15  ;;  %v3044_v41 = vpop.f32.mrb[3].mxu0 }
 0x1f0   : > { %v3361_v45 = vsel %vm3225_vm4, %v3329_v7, 0.0  ;;  %v4992_v12 = vadd.f32 %v3044_v41, %v1670_v61 }
 0x1f1   : > { %v3363_v9 = vadd.f32 %v3362_v5, %v3361_v45  ;;  %3229 = vst.msk [vmem:[%s6705_s10 + $0x18] sm:$0xff] %vm3225_vm4, %v4991_v33  ;;  %v3332_v24 = vmul.f32 %v4991_v33, %v4991_v33  ;;  %v3263_v18 = vsel %vm3225_vm4, %v4991_v33, 0.0 }
 0x1f2   : > { %3228 = vst.msk [vmem:[%s6705_s10 + $0x10] sm:$0xff] %vm3225_vm4, %v4992_v12  ;;  %v3261_v63 = vsel %vm3225_vm4, %v4992_v12, 0.0  ;;  %v3331_v62 = vmul.f32 %v4992_v12, %v4992_v12  ;;  %v4797_v34 = vpop.f32.mrb[4].mxu0 }
 0x1f3   : > { %v3262_v23 = vadd.f32 %v3261_v63, %v3260_v32  ;;  %v4993_v4 = vadd.f32 %v4797_v34, %v4477_v52  ;;  %v3054_v55 = vpop.f32.mrb[5].mxu0  ;;  %v3366_v17 = vsel %vm3225_vm4, %v3332_v24, 0.0 }
 0x1f4   : > { %v3364_v57 = vsel %vm3225_vm4, %v3331_v62, 0.0  ;;  %v4994_v40 = vadd.f32 %v3054_v55, %v1680_v31 }
 0x1f5   : > { %v3365_v51 = vadd.f32 %v3364_v57, %v3363_v9  ;;  %3231 = vst.msk [vmem:[%s6705_s10 + $0x28] sm:$0xff] %vm3225_vm4, %v4993_v4  ;;  %v3264_v50 = vadd.f32 %v3263_v18, %v3262_v23  ;;  %v3334_v26 = vmul.f32 %v4993_v4, %v4993_v4  ;;  %v3267_v2 = vsel %vm3225_vm4, %v4993_v4, 0.0 }
 0x1f6   : > { %3230 = vst.msk [vmem:[%s6705_s10 + $0x20] sm:$0xff] %vm3225_vm4, %v4994_v40  ;;  %v3265_v36 = vsel %vm3225_vm4, %v4994_v40, 0.0  ;;  %v3333_v22 = vmul.f32 %v4994_v40, %v4994_v40  ;;  %v4800_v21 = vpop.f32.mrb[6].mxu0 }
 0x1f7   : > { %v3266_v38 = vadd.f32 %v3265_v36, %v3264_v50  ;;  %v3367_v53 = vadd.f32 %v3366_v17, %v3365_v51  ;;  %v4995_v54 = vadd.f32 %v4800_v21, %v4480_v1  ;;  %v3064_v60 = vpop.f32.mrb[7].mxu0  ;;  %v3370_v49 = vsel %vm3225_vm4, %v3334_v26, 0.0 }
 0x1f8   : > { %v3368_v10 = vsel %vm3225_vm4, %v3333_v22, 0.0  ;;  %v4996_v16 = vadd.f32 %v3064_v60, %v1690_v14 }
 0x1f9   : > { %v3369_v20 = vadd.f32 %v3368_v10, %v3367_v53  ;;  %3233 = vst.msk [vmem:[%s6705_s10 + $0x38] sm:$0xff] %vm3225_vm4, %v4995_v54  ;;  %v3268_v30 = vadd.f32 %v3267_v2, %v3266_v38  ;;  %v3336_v59 = vmul.f32 %v4995_v54, %v4995_v54  ;;  %v3271_v61 = vsel %vm3225_vm4, %v4995_v54, 0.0 }
 0x1fa   : > { %3232 = vst.msk [vmem:[%s6705_s10 + $0x30] sm:$0xff] %vm3225_vm4, %v4996_v16  ;;  %v3269_v48 = vsel %vm3225_vm4, %v4996_v16, 0.0  ;;  %v3335_v29 = vmul.f32 %v4996_v16, %v4996_v16  ;;  %v4803_v39 = vpop.f32.mrb[8].mxu0 }
 0x1fb   : > { %v3270_v46 = vadd.f32 %v3269_v48, %v3268_v30  ;;  %v3371_v43 = vadd.f32 %v3370_v49, %v3369_v20  ;;  %v4997_v47 = vadd.f32 %v4803_v39, %v6684_v42  ;;  %v3074_v15 = vpop.f32.mrb[9].mxu0  ;;  %v3374_v58 = vsel %vm3225_vm4, %v3336_v59, 0.0 }
 0x1fc   : > { %v3372_v52 = vsel %vm3225_vm4, %v3335_v29, 0.0  ;;  %v4998_v31 = vadd.f32 %v3074_v15, %v6686_v3 }
 0x1fd   : > { %v3373_v1 = vadd.f32 %v3372_v52, %v3371_v43  ;;  %3235 = vst.msk [vmem:[%s6705_s10 + $0x48] sm:$0xff] %vm3225_vm4, %v4997_v47  ;;  %v3272_v14 = vadd.f32 %v3271_v61, %v3270_v46  ;;  %v3338_v37 = vmul.f32 %v4997_v47, %v4997_v47  ;;  %v3275_v7 = vsel %vm3225_vm4, %v4997_v47, 0.0 }
 0x1fe   : > { %3234 = vst.msk [vmem:[%s6705_s10 + $0x40] sm:$0xff] %vm3225_vm4, %v4998_v31  ;;  %v3273_v42 = vsel %vm3225_vm4, %v4998_v31, 0.0  ;;  %v3337_v28 = vmul.f32 %v4998_v31, %v4998_v31  ;;  %v4806_v25 = vpop.f32.mrb[10].mxu0 }
 0x1ff   : > { %v3274_v44 = vadd.f32 %v3273_v42, %v3272_v14  ;;  %v3375_v0 = vadd.f32 %v3374_v58, %v3373_v1  ;;  %v4999_v56 = vadd.f32 %v4806_v25, %v6688_v13  ;;  %v3084_v3 = vpop.f32.mrb[11].mxu0  ;;  %v3378_v41 = vsel %vm3225_vm4, %v3338_v37, 0.0 }
 0x200   : > { %v3376_v11 = vsel %vm3225_vm4, %v3337_v28, 0.0  ;;  %v5000_v5 = vadd.f32 %v3084_v3, %v6690_v35 }
 0x201   : > { %v3377_v32 = vadd.f32 %v3376_v11, %v3375_v0  ;;  %3237 = vst.msk [vmem:[%s6705_s10 + $0x58] sm:$0xff] %vm3225_vm4, %v4999_v56  ;;  %v3276_v33 = vadd.f32 %v3275_v7, %v3274_v44  ;;  %v3340_v45 = vmul.f32 %v4999_v56, %v4999_v56  ;;  %v3279_v34 = vsel %vm3225_vm4, %v4999_v56, 0.0 }
 0x202   : > { %3236 = vst.msk [vmem:[%s6705_s10 + $0x50] sm:$0xff] %vm3225_vm4, %v5000_v5  ;;  %v3277_v13 = vsel %vm3225_vm4, %v5000_v5, 0.0  ;;  %v3339_v12 = vmul.f32 %v5000_v5, %v5000_v5  ;;  %v4809_v9 = vpop.f32.mrb[12].mxu0 }
 0x203   : > { %v3278_v24 = vadd.f32 %v3277_v13, %v3276_v33  ;;  %v3379_v63 = vadd.f32 %v3378_v41, %v3377_v32  ;;  %v5001_v62 = vadd.f32 %v4809_v9, %v6692_v19  ;;  %v3094_v35 = vpop.f32.mrb[13].mxu0  ;;  %v3382_v57 = vsel %vm3225_vm4, %v3340_v45, 0.0 }
 0x204   : > { %v3380_v23 = vsel %vm3225_vm4, %v3339_v12, 0.0  ;;  %v5002_v4 = vadd.f32 %v3094_v35, %v6694_v8 }
 0x205   : > { %v3381_v55 = vadd.f32 %v3380_v23, %v3379_v63  ;;  %3239 = vst.msk [vmem:[%s6705_s10 + $0x68] sm:$0xff] %vm3225_vm4, %v5001_v62  ;;  %v3280_v18 = vadd.f32 %v3279_v34, %v3278_v24  ;;  %v3342_v40 = vmul.f32 %v5001_v62, %v5001_v62  ;;  %v3283_v22 = vsel %vm3225_vm4, %v5001_v62, 0.0 }
 0x206   : > { %3238 = vst.msk [vmem:[%s6705_s10 + $0x60] sm:$0xff] %vm3225_vm4, %v5002_v4  ;;  %v3281_v51 = vsel %vm3225_vm4, %v5002_v4, 0.0  ;;  %v3341_v19 = vmul.f32 %v5002_v4, %v5002_v4  ;;  %v4812_v50 = vpop.f32.mrb[14].mxu0  ;;  %v4559_v60 = vpop.f32.mrb[16].mxu1 }
 0x207   : > { %v3282_v17 = vadd.f32 %v3281_v51, %v3280_v18  ;;  %v3383_v26 = vadd.f32 %v3382_v57, %v3381_v55  ;;  %v5003_v36 = vadd.f32 %v4812_v50, %v6696_v6  ;;  %v3104_v8 = vpop.f32.mrb[15].mxu0  ;;  %v3386_v2 = vsel %vm3225_vm4, %v3342_v40, 0.0  ;;  %v2016_v30 = vpop.f32.mrb[17].mxu1 }
 0x208   : > { %v3384_v21 = vsel %vm3225_vm4, %v3341_v19, 0.0  ;;  %v5004_v38 = vadd.f32 %v3104_v8, %v6698_v27 }
 0x209   : > { %v3385_v53 = vadd.f32 %v3384_v21, %v3383_v26  ;;  %3241 = vst.msk [vmem:[%s6705_s10 + $0x78] sm:$0xff] %vm3225_vm4, %v5003_v36  ;;  %v3284_v54 = vadd.f32 %v3283_v22, %v3282_v17  ;;  %v3344_v10 = vmul.f32 %v5003_v36, %v5003_v36  ;;  %v3287_v29 = vsel %vm3225_vm4, %v5003_v36, 0.0 }
 0x20a   : > { %3240 = vst.msk [vmem:[%s6705_s10 + $0x70] sm:$0xff] %vm3225_vm4, %v5004_v38  ;;  %v3285_v6 = vsel %vm3225_vm4, %v5004_v38, 0.0  ;;  %v3343_v16 = vmul.f32 %v5004_v38, %v5004_v38  ;;  %v4815_v20 = vpop.f32.mrb[16].mxu0  ;;  %v4562_v15 = vpop.f32.mrb[18].mxu1 }
 0x20b   : > { %v3286_v49 = vadd.f32 %v3285_v6, %v3284_v54  ;;  %v3387_v59 = vadd.f32 %v3386_v2, %v3385_v53  ;;  %v5005_v27 = vadd.f32 %v4815_v20, %v4559_v60  ;;  %v3114_v48 = vpop.f32.mrb[17].mxu0  ;;  %v3390_v61 = vsel %vm3225_vm4, %v3344_v10, 0.0  ;;  %v2026_v58 = vpop.f32.mrb[19].mxu1 }
 0x20c   : > { %v3388_v39 = vsel %vm3225_vm4, %v3343_v16, 0.0  ;;  %v5006_v46 = vadd.f32 %v3114_v48, %v2016_v30 }
 0x20d   : > { %v3389_v43 = vadd.f32 %v3388_v39, %v3387_v59  ;;  %3243 = vst.msk [vmem:[%s6705_s10 + $0x88] sm:$0xff] %vm3225_vm4, %v5005_v27  ;;  %v3288_v47 = vadd.f32 %v3287_v29, %v3286_v49  ;;  %v3346_v52 = vmul.f32 %v5005_v27, %v5005_v27  ;;  %v3291_v44 = vsel %vm3225_vm4, %v5005_v27, 0.0 }
 0x20e   : > { %3242 = vst.msk [vmem:[%s6705_s10 + $0x80] sm:$0xff] %vm3225_vm4, %v5006_v46  ;;  %v3289_v31 = vsel %vm3225_vm4, %v5006_v46, 0.0  ;;  %v3345_v1 = vmul.f32 %v5006_v46, %v5006_v46  ;;  %v4818_v14 = vpop.f32.mrb[18].mxu0  ;;  %v4565_v11 = vpop.f32.mrb[20].mxu1 }
 0x20f   : > { %v3290_v37 = vadd.f32 %v3289_v31, %v3288_v47  ;;  %v3391_v42 = vadd.f32 %v3390_v61, %v3389_v43  ;;  %v5007_v28 = vadd.f32 %v4818_v14, %v4562_v15  ;;  %v3124_v25 = vpop.f32.mrb[19].mxu0  ;;  %v3394_v5 = vsel %vm3225_vm4, %v3346_v52, 0.0  ;;  %v2036_v13 = vpop.f32.mrb[21].mxu1 }
 0x210   : > { %v3392_v0 = vsel %vm3225_vm4, %v3345_v1, 0.0  ;;  %v5008_v56 = vadd.f32 %v3124_v25, %v2026_v58 }
 0x211   : > { %v3393_v3 = vadd.f32 %v3392_v0, %v3391_v42  ;;  %3245 = vst.msk [vmem:[%s6705_s10 + $0x98] sm:$0xff] %vm3225_vm4, %v5007_v28  ;;  %v3292_v7 = vadd.f32 %v3291_v44, %v3290_v37  ;;  %v3348_v32 = vmul.f32 %v5007_v28, %v5007_v28  ;;  %v3295_v62 = vsel %vm3225_vm4, %v5007_v28, 0.0 }
 0x212   : > { %3244 = vst.msk [vmem:[%s6705_s10 + $0x90] sm:$0xff] %vm3225_vm4, %v5008_v56  ;;  %v3293_v33 = vsel %vm3225_vm4, %v5008_v56, 0.0  ;;  %v3347_v41 = vmul.f32 %v5008_v56, %v5008_v56  ;;  %v4821_v45 = vpop.f32.mrb[20].mxu0  ;;  %v4568_v55 = vpop.f32.mrb[22].mxu1 }
 0x213   : > { %v3294_v12 = vadd.f32 %v3293_v33, %v3292_v7  ;;  %v3395_v9 = vadd.f32 %v3394_v5, %v3393_v3  ;;  %v5009_v24 = vadd.f32 %v4821_v45, %v4565_v11  ;;  %v3134_v63 = vpop.f32.mrb[21].mxu0  ;;  %v3398_v18 = vsel %vm3225_vm4, %v3348_v32, 0.0  ;;  %v2046_v50 = vpop.f32.mrb[23].mxu1 }
 0x214   : > { %v3396_v35 = vsel %vm3225_vm4, %v3347_v41, 0.0  ;;  %v5010_v34 = vadd.f32 %v3134_v63, %v2036_v13 }
 0x215   : > { %v3397_v23 = vadd.f32 %v3396_v35, %v3395_v9  ;;  %3247 = vst.msk [vmem:[%s6705_s10 + $0xa8] sm:$0xff] %vm3225_vm4, %v5009_v24  ;;  %v3296_v4 = vadd.f32 %v3295_v62, %v3294_v12  ;;  %v3350_v57 = vmul.f32 %v5009_v24, %v5009_v24  ;;  %v3299_v22 = vsel %vm3225_vm4, %v5009_v24, 0.0 }
 0x216   : > { %3246 = vst.msk [vmem:[%s6705_s10 + $0xa0] sm:$0xff] %vm3225_vm4, %v5010_v34  ;;  %v3297_v40 = vsel %vm3225_vm4, %v5010_v34, 0.0  ;;  %v3349_v51 = vmul.f32 %v5010_v34, %v5010_v34  ;;  %v4824_v19 = vpop.f32.mrb[22].mxu0  ;;  %v4571_v60 = vpop.f32.mrb[24].mxu1 }
 0x217   : > { %v3298_v17 = vadd.f32 %v3297_v40, %v3296_v4  ;;  %v3399_v26 = vadd.f32 %v3398_v18, %v3397_v23  ;;  %v5011_v36 = vadd.f32 %v4824_v19, %v4568_v55  ;;  %v3144_v8 = vpop.f32.mrb[23].mxu0  ;;  %v3402_v2 = vsel %vm3225_vm4, %v3350_v57, 0.0  ;;  %v2056_v30 = vpop.f32.mrb[25].mxu1 }
 0x218   : > { %v3400_v21 = vsel %vm3225_vm4, %v3349_v51, 0.0  ;;  %v5012_v38 = vadd.f32 %v3144_v8, %v2046_v50 }
 0x219   : > { %v3401_v53 = vadd.f32 %v3400_v21, %v3399_v26  ;;  %3249 = vst.msk [vmem:[%s6705_s10 + $0xb8] sm:$0xff] %vm3225_vm4, %v5011_v36  ;;  %v3300_v54 = vadd.f32 %v3299_v22, %v3298_v17  ;;  %v3352_v10 = vmul.f32 %v5011_v36, %v5011_v36  ;;  %v3303_v29 = vsel %vm3225_vm4, %v5011_v36, 0.0 }
 0x21a   : > { %3248 = vst.msk [vmem:[%s6705_s10 + $0xb0] sm:$0xff] %vm3225_vm4, %v5012_v38  ;;  %v3301_v6 = vsel %vm3225_vm4, %v5012_v38, 0.0  ;;  %v3351_v16 = vmul.f32 %v5012_v38, %v5012_v38  ;;  %v4827_v20 = vpop.f32.mrb[24].mxu0  ;;  %v4574_v15 = vpop.f32.mrb[26].mxu1 }
 0x21b   : > { %v3302_v49 = vadd.f32 %v3301_v6, %v3300_v54  ;;  %v3403_v59 = vadd.f32 %v3402_v2, %v3401_v53  ;;  %v5013_v27 = vadd.f32 %v4827_v20, %v4571_v60  ;;  %v3154_v48 = vpop.f32.mrb[25].mxu0  ;;  %v3406_v61 = vsel %vm3225_vm4, %v3352_v10, 0.0  ;;  %v2066_v58 = vpop.f32.mrb[27].mxu1 }
 0x21c   : > { %v3404_v39 = vsel %vm3225_vm4, %v3351_v16, 0.0  ;;  %v5014_v46 = vadd.f32 %v3154_v48, %v2056_v30 }
 0x21d   : > { %v3405_v43 = vadd.f32 %v3404_v39, %v3403_v59  ;;  %3251 = vst.msk [vmem:[%s6705_s10 + $0xc8] sm:$0xff] %vm3225_vm4, %v5013_v27  ;;  %v3304_v47 = vadd.f32 %v3303_v29, %v3302_v49  ;;  %v3354_v52 = vmul.f32 %v5013_v27, %v5013_v27  ;;  %v3307_v44 = vsel %vm3225_vm4, %v5013_v27, 0.0 }
 0x21e   : > { %3250 = vst.msk [vmem:[%s6705_s10 + $0xc0] sm:$0xff] %vm3225_vm4, %v5014_v46  ;;  %v3305_v31 = vsel %vm3225_vm4, %v5014_v46, 0.0  ;;  %v3353_v1 = vmul.f32 %v5014_v46, %v5014_v46  ;;  %v4830_v14 = vpop.f32.mrb[26].mxu0  ;;  %v4577_v11 = vpop.f32.mrb[28].mxu1 }
 0x21f   : > { %v3306_v37 = vadd.f32 %v3305_v31, %v3304_v47  ;;  %v3407_v42 = vadd.f32 %v3406_v61, %v3405_v43  ;;  %v5015_v28 = vadd.f32 %v4830_v14, %v4574_v15  ;;  %v3164_v25 = vpop.f32.mrb[27].mxu0  ;;  %v3410_v5 = vsel %vm3225_vm4, %v3354_v52, 0.0  ;;  %v2076_v13 = vpop.f32.mrb[29].mxu1 }
 0x220   : > { %v3408_v0 = vsel %vm3225_vm4, %v3353_v1, 0.0  ;;  %v5016_v56 = vadd.f32 %v3164_v25, %v2066_v58 }
 0x221   : > { %v3409_v3 = vadd.f32 %v3408_v0, %v3407_v42  ;;  %3253 = vst.msk [vmem:[%s6705_s10 + $0xd8] sm:$0xff] %vm3225_vm4, %v5015_v28  ;;  %v3308_v7 = vadd.f32 %v3307_v44, %v3306_v37  ;;  %v3356_v32 = vmul.f32 %v5015_v28, %v5015_v28  ;;  %v3311_v62 = vsel %vm3225_vm4, %v5015_v28, 0.0 }
 0x222   : > { %3252 = vst.msk [vmem:[%s6705_s10 + $0xd0] sm:$0xff] %vm3225_vm4, %v5016_v56  ;;  %v3309_v33 = vsel %vm3225_vm4, %v5016_v56, 0.0  ;;  %v3355_v41 = vmul.f32 %v5016_v56, %v5016_v56  ;;  %v4833_v45 = vpop.f32.mrb[28].mxu0  ;;  %v4580_v55 = vpop.f32.mrb[30].mxu1 }
 0x223   : > { %v3310_v12 = vadd.f32 %v3309_v33, %v3308_v7  ;;  %v3411_v9 = vadd.f32 %v3410_v5, %v3409_v3  ;;  %v5017_v24 = vadd.f32 %v4833_v45, %v4577_v11  ;;  %v3174_v63 = vpop.f32.mrb[29].mxu0  ;;  %v3414_v18 = vsel %vm3225_vm4, %v3356_v32, 0.0  ;;  %v2086_v50 = vpop.f32.mrb[31].mxu1 }
 0x224   : > { %v3412_v35 = vsel %vm3225_vm4, %v3355_v41, 0.0  ;;  %v5018_v34 = vadd.f32 %v3174_v63, %v2076_v13 }
 0x225   : > { %v3413_v23 = vadd.f32 %v3412_v35, %v3411_v9  ;;  %3255 = vst.msk [vmem:[%s6705_s10 + $0xe8] sm:$0xff] %vm3225_vm4, %v5017_v24  ;;  %v3312_v4 = vadd.f32 %v3311_v62, %v3310_v12  ;;  %v3358_v57 = vmul.f32 %v5017_v24, %v5017_v24  ;;  %v3315_v22 = vsel %vm3225_vm4, %v5017_v24, 0.0 }
 0x226   : > { %3254 = vst.msk [vmem:[%s6705_s10 + $0xe0] sm:$0xff] %vm3225_vm4, %v5018_v34  ;;  %v3313_v40 = vsel %vm3225_vm4, %v5018_v34, 0.0  ;;  %v3357_v51 = vmul.f32 %v5018_v34, %v5018_v34  ;;  %v4836_v19 = vpop.f32.mrb[30].mxu0 }
 0x227   : > { %v3314_v17 = vadd.f32 %v3313_v40, %v3312_v4  ;;  %v3415_v26 = vadd.f32 %v3414_v18, %v3413_v23  ;;  %v5019_v36 = vadd.f32 %v4836_v19, %v4580_v55  ;;  %v3184_v8 = vpop.f32.mrb[31].mxu0  ;;  %v3418_v2 = vsel %vm3225_vm4, %v3358_v57, 0.0 }
 0x228   : > { %v3416_v21 = vsel %vm3225_vm4, %v3357_v51, 0.0  ;;  %v5020_v38 = vadd.f32 %v3184_v8, %v2086_v50 }
 0x229   : > { %v3417_v53 = vadd.f32 %v3416_v21, %v3415_v26  ;;  %3257 = vst.msk [vmem:[%s6705_s10 + $0xf8] sm:$0xff] %vm3225_vm4, %v5019_v36  ;;  %v3360_v54 = vmul.f32 %v5019_v36, %v5019_v36  ;;  %v3316_v60 = vadd.f32 %v3315_v22, %v3314_v17  ;;  %v3319_v49 = vsel %vm3225_vm4, %v5019_v36, 0.0 }
 0x22a   : > { %3256 = vst.msk [vmem:[%s6705_s10 + $0xf0] sm:$0xff] %vm3225_vm4, %v5020_v38  ;;  %v3317_v10 = vsel %vm3225_vm4, %v5020_v38, 0.0  ;;  %v3359_v6 = vmul.f32 %v5020_v38, %v5020_v38 }
 0x22b   : > { %v3422_v16 = vsel %vm3225_vm4, %v3360_v54, 0.0  ;;  %v3318_v20 = vadd.f32 %v3317_v10, %v3316_v60  ;;  %v3419_v30 = vadd.f32 %v3418_v2, %v3417_v53 }
 0x22c   : > { %v3420_v59 = vsel %vm3225_vm4, %v3359_v6, 0.0 }
 0x22d   : > { %v3320_v27 = vadd.f32 %v3319_v49, %v3318_v20  ;;  %v3421_v48 = vadd.f32 %v3420_v59, %v3419_v30 }
 0x22f   : > { %v3321_v29 = vrot.slane %v3320_v27, 4  ;;  %v3423_v39 = vadd.f32 %v3422_v16, %v3421_v48 }
 0x231   : > { %v3322_v46 = vadd.f32 %v3321_v29, %v3320_v27  ;;  %v3424_v43 = vrot.slane %v3423_v39, 4 }
 0x233   : > { %v3323_v47 = vrot.slane %v3322_v46, 2  ;;  %v3425_v15 = vadd.f32 %v3424_v43, %v3423_v39 }
 0x235   : > { %v3324_v61 = vadd.f32 %v3323_v47, %v3322_v46  ;;  %v3426_v52 = vrot.slane %v3425_v15, 2 }
 0x237   : > { %v3325_v31 = vrot.slane %v3324_v61, 1  ;;  %v3427_v1 = vadd.f32 %v3426_v52, %v3425_v15 }
 0x239   : > { %v3326_v14 = vadd.f32 %v3325_v31, %v3324_v61  ;;  %v3428_v58 = vrot.slane %v3427_v1, 1 }
 0x23b   : > { %3328 = vst.msk [vmem:[%s265_s12] sm:$0x1] %vm3327_vm5, %v3326_v14  ;;  %v3429_v37 = vadd.f32 %v3428_v58, %v3427_v1 }
 0x23d   : > { %3430 = vst.msk [vmem:[%s268_s15] sm:$0x1] %vm3327_vm5, %v3429_v37 }
 0x23e PF: > { %s17_s21 = sadd.s32 1, %s5274_s21  }
 0x23f   : > { %p14_p4 = scmp.ge.s32.totalorder %s17_s21, 4  }
 0x241   :  { %16 = sbr.rel (!%p14_p4) target bundleno = 1 (0x1), region = 99 }

// kernel: two_conv_bn_relu_back.4
= control target key start
LH: loop header
LB: loop body
LE: loop exit
PB: predicated region body
PF: predicated region fallthrough
CT: control target
= control target key end

     0   :  { %s5167_s21 = smov 0   ;;  %s6672_s0 = inlined_call_operand.vmem [shape: f32[2,16,16,32], index: 0, kind: input, shape index: {}]   ;;  %s6673_s1 = inlined_call_operand.vmem [shape: f32[1,32], index: 1, kind: input, shape index: {}]   ;;  %s6674_s2 = inlined_call_operand.vmem [shape: f32[1,32], index: 2, kind: input, shape index: {}]   ;;  %s6675_s3 = inlined_call_operand.vmem [shape: f32[3,3,32,32], index: 3, kind: input, shape index: {}]   ;;  %s6676_s4 = inlined_call_operand.vmem [shape: f32[2,16,16,32], index: 4, kind: output, shape index: {0}]   ;;  %s6677_s5 = inlined_call_operand.vmem [shape: f32[2,1,32], index: 5, kind: output, shape index: {1}]   ;;  %s6678_s6 = inlined_call_operand.vmem [shape: f32[2,1,32], index: 6, kind: output, shape index: {2}]  }
   0x1 LB: > { %s3609_s22 = sadd.s32 4294967295, %s5129_s21   ;;  %p3613_p0 = scmp.ge.s32.totalorder %s5129_s21, 1  ;;  %s5129_s21 = sphi %s5167_s21, %s17_s21  }
   0x2   : > { %p217_p1 = scmp.lt.s32.totalorder %s5129_s21, 3 }
   0x4   : > { %p218_p2 = pnand %p3613_p0, %p217_p1 }
   0x6   : > { %221 = sbr.rel (%p218_p2) target bundleno = 574 (0x23e), region = 36 }
   0xd   : > { %v3620_v0 = vld [vmem:[%s6675_s3 + $0x20] sm:$0xff]  ;;  %v3621_v1 = vld [vmem:[%s6675_s3 + $0x28] sm:$0xff]  ;;  %vm411_vm0 = vcmask 261120   ;;  %v3622_v5 = vld [vmem:[%s6675_s3 + $0x30] sm:$0xff]  ;;  %v5131_v7 = vmov 0.0   ;;  %vm414_vm1 = vcmask 254976  }
   0xe   : > { %v3760_v2 = vld [vmem:[%s6675_s3 + $0x80] sm:$0xff]  ;;  %v5184_v3 = vpack.c.bf16 %v3621_v1, %v3620_v0  ;;  %v3761_v4 = vld [vmem:[%s6675_s3 + $0x88] sm:$0xff]  ;;  %v3623_v6 = vld [vmem:[%s6675_s3 + $0x38] sm:$0xff]  ;;  %412 = vst.msk [vmem:[#allocation2] sm:$0xff] %vm411_vm0, %v5131_v7  ;;  %p5233_p3 = scmp.lt.s32.totalorder %s3609_s22, 1  ;;  %vm606_vm2 = vcmask 1046528  }
   0xf   : > { %413 = vst.msk [vmem:[#allocation2 + $0x8] sm:$0xff] %vm411_vm0, %v5131_v7  ;;  %416 = vst.msk [vmem:[#allocation2 + $0x18] sm:$0xff] %vm411_vm0, %v5131_v7  ;;  %v5237_v8 = vpack.c.bf16 %v3761_v4, %v3760_v2  ;;  %v4776_v9 = vpack.c.bf16 %v3623_v6, %v3622_v5  ;;  %v3762_v10 = vld [vmem:[%s6675_s3 + $0x90] sm:$0xff]  ;;  %v3763_v11 = vld [vmem:[%s6675_s3 + $0x98] sm:$0xff]  ;;  %vm1270_vm3 = vcmask 1045504   ;;  %vm3400_vm4 = vcmask 253952  }
  0x10   : > { %417 = vst.msk [vmem:[#allocation2 + $0x20] sm:$0xff] %vm411_vm0, %v5131_v7  ;;  %419 = vst.msk [vmem:[#allocation2 + $0x30] sm:$0xff] %vm411_vm0, %v5131_v7  ;;  %4773 = vmatprep.subr.bf16.mxu1 %v5184_v3  ;;  %v5264_v12 = vpack.c.bf16 %v3763_v11, %v3762_v10  ;;  %s6843_s22 = smov (!%p5233_p3, %s3609_s22), 1  ;;  %v554_v13 = vld [vmem:[%s6675_s3] sm:$0xff]  ;;  %v555_v14 = vld [vmem:[%s6675_s3 + $0x8] sm:$0xff] }
  0x11   : > { %420 = vst.msk [vmem:[#allocation2 + $0x38] sm:$0xff] %vm411_vm0, %v5131_v7  ;;  %422 = vst.msk [vmem:[#allocation2 + $0x48] sm:$0xff] %vm411_vm0, %v5131_v7  ;;  %4775 = vmatpush3.bf16.msra.mxu1 %v5184_v3  ;;  %4805 = vmatprep.subr.bf16.mxu0 %v5237_v8  ;;  %v3796_v15 = vld [vmem:[%s6675_s3 + $0xa0] sm:$0xff]  ;;  %v3797_v16 = vld [vmem:[%s6675_s3 + $0xa8] sm:$0xff]  ;;  %s3942_s26 = sshll.u32 %s6843_s22, 8  ;;  %v4780_v18 = vpack.c.bf16 %v555_v14, %v554_v13  ;;  %s265_s20 = scalar_lea.vmem %s6677_s5, %s6843_s22 }
  0x12   : > { %423 = vst.msk [vmem:[#allocation2 + $0x50] sm:$0xff] %vm411_vm0, %v5131_v7  ;;  %425 = vst.msk [vmem:[#allocation2 + $0x60] sm:$0xff] %vm411_vm0, %v5131_v7  ;;  %4777 = vmatprep.subr.bf16.mxu1 %v4776_v9  ;;  %4807 = vmatpush3.bf16.msra.mxu0 %v5237_v8  ;;  %v5291_v17 = vld [vmem:[%s6673_s1] ss:$0 sm:$0xff]  ;;  %s5299_s7 = scalar_lea.vmem %s6672_s0, %s3942_s26  ;;  %v5306_v20 = vpack.c.bf16 %v3797_v16, %v3796_v15  ;;  %v556_v21 = vld [vmem:[%s6675_s3 + $0x10] sm:$0xff]  ;;  %s6523_s18 = scalar_lea.vmem %s6676_s4, %s3942_s26 }
  0x13   : > { %426 = vst.msk [vmem:[#allocation2 + $0x68] sm:$0xff] %vm411_vm0, %v5131_v7  ;;  %428 = vst.msk [vmem:[#allocation2 + $0x78] sm:$0xff] %vm411_vm0, %v5131_v7  ;;  %4809 = vmatprep.subr.bf16.mxu0 %v5264_v12  ;;  %v5304_v19 = vld [vmem:[%s6674_s2] ss:$0 sm:$0xff]  ;;  %v557_v22 = vld [vmem:[%s6675_s3 + $0x18] sm:$0xff]  ;;  %s268_s25 = scalar_lea.vmem %s6678_s6, %s6843_s22 }
  0x14   : > { %429 = vst.msk [vmem:[#allocation2 + $0x80] sm:$0xff] %vm411_vm0, %v5131_v7  ;;  %431 = vst.msk [vmem:[#allocation2 + $0x90] sm:$0xff] %vm411_vm0, %v5131_v7  ;;  %v269_v23 = vld [vmem:[%s5299_s7] sm:$0xff]  ;;  %v270_v24 = vld [vmem:[%s5299_s7 + $0x8] sm:$0xff]  ;;  %v4784_v42 = vpack.c.bf16 %v557_v22, %v556_v21 }
  0x15   : > { %432 = vst.msk [vmem:[#allocation2 + $0x98] sm:$0xff] %vm411_vm0, %v5131_v7  ;;  %434 = vst.msk [vmem:[#allocation2 + $0xa8] sm:$0xff] %vm411_vm0, %v5131_v7  ;;  %v271_v25 = vld [vmem:[%s5299_s7 + $0x10] sm:$0xff]  ;;  %4779 = vmatpush3.bf16.msra.mxu1 %v4776_v9  ;;  %v5317_v26 = vld [vmem:[#allocation2] sm:$0xff]  ;;  %v308_v28 = vmul.f32 %v5291_v17, %v269_v23  ;;  %v309_v29 = vmul.f32 %v5291_v17, %v270_v24 }
  0x16   : > { %435 = vst.msk [vmem:[#allocation2 + $0xb0] sm:$0xff] %vm411_vm0, %v5131_v7  ;;  %437 = vst.msk [vmem:[#allocation2 + $0xc0] sm:$0xff] %vm411_vm0, %v5131_v7  ;;  %v5319_v27 = vld [vmem:[#allocation2 + $0x8] sm:$0xff]  ;;  %v272_v30 = vld [vmem:[%s5299_s7 + $0x18] sm:$0xff]  ;;  %v310_v31 = vmul.f32 %v5291_v17, %v271_v25  ;;  %v607_v32 = vrot.slane %v5317_v26, 1  ;;  %4811 = vmatpush3.bf16.msra.mxu0 %v5264_v12  ;;  %4781 = vmatprep.subr.bf16.mxu1 %v4780_v18 }
  0x17   : > { %438 = vst.msk [vmem:[#allocation2 + $0xc8] sm:$0xff] %vm411_vm0, %v5131_v7  ;;  %440 = vst.msk [vmem:[#allocation2 + $0xd8] sm:$0xff] %vm411_vm0, %v5131_v7  ;;  %v608_v33 = vrot.slane %v5319_v27, 1  ;;  %v311_v35 = vmul.f32 %v5291_v17, %v272_v30  ;;  %v273_v36 = vld [vmem:[%s5299_s7 + $0x20] sm:$0xff]  ;;  %v274_v37 = vld [vmem:[%s5299_s7 + $0x28] sm:$0xff]  ;;  %v347_v39 = vadd.f32 %v5304_v19, %v308_v28  ;;  %v348_v40 = vadd.f32 %v5304_v19, %v309_v29 }
  0x18   : > { %441 = vst.msk [vmem:[#allocation2 + $0xe0] sm:$0xff] %vm411_vm0, %v5131_v7  ;;  %443 = vst.msk [vmem:[#allocation2 + $0xf0] sm:$0xff] %vm411_vm0, %v5131_v7  ;;  %4813 = vmatprep.subr.bf16.mxu0 %v5306_v20  ;;  %v275_v41 = vld [vmem:[%s5299_s7 + $0x30] sm:$0xff]  ;;  %v349_v44 = vadd.f32 %v5304_v19, %v310_v31  ;;  %v312_v46 = vmul.f32 %v5291_v17, %v273_v36  ;;  %v276_v47 = vld [vmem:[%s5299_s7 + $0x38] sm:$0xff]  ;;  %v313_v53 = vmul.f32 %v5291_v17, %v274_v37 }
  0x19   : > { %444 = vst.msk [vmem:[#allocation2 + $0xf8] sm:$0xff] %vm411_vm0, %v5131_v7  ;;  %446 = vst.msk [vmem:[#allocation2 + $0x108] sm:$0xff] %vm411_vm0, %v5131_v7  ;;  %v609_v43 = vsel %vm606_vm2, %v607_v32, %v608_v33  ;;  %v350_v45 = vadd.f32 %v5304_v19, %v311_v35  ;;  %v277_v48 = vld [vmem:[%s5299_s7 + $0x40] sm:$0xff]  ;;  %v278_v49 = vld [vmem:[%s5299_s7 + $0x48] sm:$0xff]  ;;  %v379_v51 = vmax.f32 %v347_v39, 0.0  ;;  %v380_v52 = vmax.f32 %v348_v40, 0.0 }
  0x1a   : > { %447 = vst.msk [vmem:[#allocation2 + $0x110] sm:$0xff] %vm411_vm0, %v5131_v7  ;;  %449 = vst.msk [vmem:[#allocation2 + $0x120] sm:$0xff] %vm411_vm0, %v5131_v7  ;;  %4276 = vmatprep.mubr.msk.f32.mxu1 %vm411_vm0, %v609_v43  ;;  %v279_v54 = vld [vmem:[%s5299_s7 + $0x50] sm:$0xff]  ;;  %v280_v55 = vld [vmem:[%s5299_s7 + $0x58] sm:$0xff]  ;;  %v381_v56 = vmax.f32 %v349_v44, 0.0  ;;  %v351_v58 = vadd.f32 %v5304_v19, %v312_v46  ;;  %v314_v59 = vmul.f32 %v5291_v17, %v275_v41 }
  0x1b   : > { %450 = vst.msk [vmem:[#allocation2 + $0x128] sm:$0xff] %vm411_vm0, %v5131_v7  ;;  %452 = vst.msk [vmem:[#allocation2 + $0x138] sm:$0xff] %vm411_vm0, %v5131_v7  ;;  %v382_v57 = vmax.f32 %v350_v45, 0.0  ;;  %v352_v60 = vadd.f32 %v5304_v19, %v313_v53  ;;  %v315_v61 = vmul.f32 %v5291_v17, %v276_v47  ;;  %v316_v62 = vmul.f32 %v5291_v17, %v277_v48  ;;  %v281_v0 = vld [vmem:[%s5299_s7 + $0x60] sm:$0xff]  ;;  %v282_v5 = vld [vmem:[%s5299_s7 + $0x68] sm:$0xff] }
  0x1c   : > { %453 = vst.msk [vmem:[#allocation2 + $0x140] sm:$0xff] %vm411_vm0, %v5131_v7  ;;  %455 = vst.msk [vmem:[#allocation2 + $0x150] sm:$0xff] %vm411_vm0, %v5131_v7  ;;  %v317_v63 = vmul.f32 %v5291_v17, %v278_v49  ;;  %v383_v1 = vmax.f32 %v351_v58, 0.0  ;;  %v353_v2 = vadd.f32 %v5304_v19, %v314_v59  ;;  %v318_v3 = vmul.f32 %v5291_v17, %v279_v54  ;;  %v3798_v11 = vld [vmem:[%s6675_s3 + $0xb0] sm:$0xff]  ;;  %v3799_v15 = vld [vmem:[%s6675_s3 + $0xb8] sm:$0xff] }
  0x1d   : > { %456 = vst.msk [vmem:[#allocation2 + $0x158] sm:$0xff] %vm411_vm0, %v5131_v7  ;;  %458 = vst.msk [vmem:[#allocation2 + $0x168] sm:$0xff] %vm411_vm0, %v5131_v7  ;;  %v319_v4 = vmul.f32 %v5291_v17, %v280_v55  ;;  %v384_v6 = vmax.f32 %v352_v60, 0.0  ;;  %v355_v9 = vadd.f32 %v5304_v19, %v316_v62  ;;  %v283_v13 = vld [vmem:[%s5299_s7 + $0x70] sm:$0xff]  ;;  %v320_v21 = vmul.f32 %v5291_v17, %v281_v0  ;;  %v284_v22 = vld [vmem:[%s5299_s7 + $0x78] sm:$0xff] }
  0x1e   : > { %459 = vst.msk [vmem:[#allocation2 + $0x170] sm:$0xff] %vm411_vm0, %v5131_v7  ;;  %461 = vst.msk [vmem:[#allocation2 + $0x180] sm:$0xff] %vm411_vm0, %v5131_v7  ;;  %v356_v10 = vadd.f32 %v5304_v19, %v317_v63  ;;  %v385_v14 = vmax.f32 %v353_v2, 0.0  ;;  %v357_v16 = vadd.f32 %v5304_v19, %v318_v3  ;;  %v285_v23 = vld [vmem:[%s5299_s7 + $0x80] sm:$0xff]  ;;  %v321_v29 = vmul.f32 %v5291_v17, %v282_v5  ;;  %v286_v30 = vld [vmem:[%s5299_s7 + $0x88] sm:$0xff] }
  0x1f   : > { %462 = vst.msk [vmem:[#allocation2 + $0x188] sm:$0xff] %vm411_vm0, %v5131_v7  ;;  %464 = vst.msk [vmem:[#allocation2 + $0x198] sm:$0xff] %vm411_vm0, %v5131_v7  ;;  %v387_v25 = vmax.f32 %v355_v9, 0.0  ;;  %v287_v31 = vld [vmem:[%s5299_s7 + $0x90] sm:$0xff]  ;;  %v322_v35 = vmul.f32 %v5291_v17, %v283_v13  ;;  %v288_v36 = vld [vmem:[%s5299_s7 + $0x98] sm:$0xff]  ;;  %v5390_v37 = vpack.c.bf16 %v3799_v15, %v3798_v11  ;;  %v323_v39 = vmul.f32 %v5291_v17, %v284_v22 }
  0x20   : > { %465 = vst.msk [vmem:[#allocation2 + $0x1a0] sm:$0xff] %vm411_vm0, %v5131_v7  ;;  %6748 = vst [vmem:[#allocation3_spill] sm:$0xff] %v5237_v8  ;;  %v388_v28 = vmax.f32 %v356_v10, 0.0  ;;  %v389_v32 = vmax.f32 %v357_v16, 0.0  ;;  %v324_v40 = vmul.f32 %v5291_v17, %v285_v23  ;;  %v325_v46 = vmul.f32 %v5291_v17, %v286_v30  ;;  %v3832_v10 = vld [vmem:[%s6675_s3 + $0xc0] sm:$0xff]  ;;  %v3833_v11 = vld [vmem:[%s6675_s3 + $0xc8] sm:$0xff] }
  0x21   : > { %415 = vst.msk [vmem:[#allocation2 + $0x10] sm:$0x3] %vm414_vm1, %v5131_v7  ;;  %418 = vst.msk [vmem:[#allocation2 + $0x28] sm:$0x3] %vm414_vm1, %v5131_v7  ;;  %v361_v45 = vadd.f32 %v5304_v19, %v322_v35  ;;  %v326_v47 = vmul.f32 %v5291_v17, %v287_v31  ;;  %v327_v53 = vmul.f32 %v5291_v17, %v288_v36  ;;  %v300_v8 = vld [vmem:[%s5299_s7 + $0xf8] sm:$0xff] }
  0x22   : > { %421 = vst.msk [vmem:[#allocation2 + $0x40] sm:$0x3] %vm414_vm1, %v5131_v7  ;;  %424 = vst.msk [vmem:[#allocation2 + $0x58] sm:$0x3] %vm414_vm1, %v5131_v7  ;;  %v362_v58 = vadd.f32 %v5304_v19, %v323_v39  ;;  %v363_v5 = vadd.f32 %v5304_v19, %v324_v40  ;;  %v364_v9 = vadd.f32 %v5304_v19, %v325_v46  ;;  %v290_v46 = vld [vmem:[%s5299_s7 + $0xa8] sm:$0xff] }
  0x23   : > { %427 = vst.msk [vmem:[#allocation2 + $0x70] sm:$0x3] %vm414_vm1, %v5131_v7  ;;  %430 = vst.msk [vmem:[#allocation2 + $0x88] sm:$0x3] %vm414_vm1, %v5131_v7  ;;  %v393_v63 = vmax.f32 %v361_v45, 0.0  ;;  %v365_v23 = vadd.f32 %v5304_v19, %v326_v47  ;;  %v289_v45 = vld [vmem:[%s5299_s7 + $0xa0] sm:$0xff] }
  0x24   : > { %433 = vst.msk [vmem:[#allocation2 + $0xa0] sm:$0x3] %vm414_vm1, %v5131_v7  ;;  %436 = vst.msk [vmem:[#allocation2 + $0xb8] sm:$0x3] %vm414_vm1, %v5131_v7  ;;  %v395_v16 = vmax.f32 %v363_v5, 0.0  ;;  %v396_v30 = vmax.f32 %v364_v9, 0.0 }
  0x25   : > { %439 = vst.msk [vmem:[#allocation2 + $0xd0] sm:$0x3] %vm414_vm1, %v5131_v7  ;;  %442 = vst.msk [vmem:[#allocation2 + $0xe8] sm:$0x3] %vm414_vm1, %v5131_v7  ;;  %v397_v39 = vmax.f32 %v365_v23, 0.0 }
  0x26   : > { %445 = vst.msk [vmem:[#allocation2 + $0x100] sm:$0x3] %vm414_vm1, %v5131_v7  ;;  %448 = vst.msk [vmem:[#allocation2 + $0x118] sm:$0x3] %vm414_vm1, %v5131_v7 }
  0x27   : > { %451 = vst.msk [vmem:[#allocation2 + $0x130] sm:$0x3] %vm414_vm1, %v5131_v7  ;;  %454 = vst.msk [vmem:[#allocation2 + $0x148] sm:$0x3] %vm414_vm1, %v5131_v7 }
  0x28   : > { %457 = vst.msk [vmem:[#allocation2 + $0x160] sm:$0x3] %vm414_vm1, %v5131_v7  ;;  %460 = vst.msk [vmem:[#allocation2 + $0x178] sm:$0x3] %vm414_vm1, %v5131_v7  ;;  %v502_v34 = vld [vmem:[#allocation2 + $0x10] sm:$0x3] }
  0x29   : > { %463 = vst.msk [vmem:[#allocation2 + $0x190] sm:$0x3] %vm414_vm1, %v5131_v7  ;;  %466 = vst.msk [vmem:[#allocation2 + $0x1a8] sm:$0x3] %vm414_vm1, %v5131_v7  ;;  %v610_v38 = vrot.slane %v502_v34, 1  ;;  %v354_v7 = vadd.f32 %v5304_v19, %v315_v61  ;;  %v359_v34 = vadd.f32 %v5304_v19, %v320_v21 }
  0x2a   : > { %6749 = vst [vmem:[#allocation4_spill] sm:$0xff] %v5264_v12  ;;  %468 = vst.msk [vmem:[#allocation2 + $0x19] sm:$0xff] %vm411_vm0, %v379_v51 }
  0x2b   : > { %v611_v50 = vsel %vm606_vm2, %v608_v33, %v610_v38  ;;  %469 = vst.msk [vmem:[#allocation2 + $0x21] sm:$0xff] %vm411_vm0, %v380_v52  ;;  %470 = vst.msk [vmem:[#allocation2 + $0x31] sm:$0xff] %vm411_vm0, %v381_v56  ;;  %v386_v24 = vmax.f32 %v354_v7, 0.0  ;;  %v360_v38 = vadd.f32 %v5304_v19, %v321_v29  ;;  %v391_v44 = vmax.f32 %v359_v34, 0.0 }
  0x2c   : > { %4277 = vmatmul.mubr.msk.f32.vlgmr.msra.gmra.mrb[0].mxu1 %vm411_vm0, %v611_v50  ;;  %471 = vst.msk [vmem:[#allocation2 + $0x39] sm:$0xff] %vm411_vm0, %v382_v57  ;;  %472 = vst.msk [vmem:[#allocation2 + $0x49] sm:$0xff] %vm411_vm0, %v383_v1  ;;  %v366_v29 = vadd.f32 %v5304_v19, %v327_v53 }
  0x2d   : > { %4783 = vmatpush3.bf16.msra.mxu1 %v4780_v18  ;;  %v358_v18 = vadd.f32 %v5304_v19, %v319_v4  ;;  %473 = vst.msk [vmem:[#allocation2 + $0x51] sm:$0xff] %vm411_vm0, %v384_v6  ;;  %474 = vst.msk [vmem:[#allocation2 + $0x61] sm:$0xff] %vm411_vm0, %v385_v14  ;;  %v392_v57 = vmax.f32 %v360_v38, 0.0  ;;  %v394_v4 = vmax.f32 %v362_v58, 0.0  ;;  %v292_v58 = vld [vmem:[%s5299_s7 + $0xb8] sm:$0xff] }
  0x2e   : > { %4785 = vmatprep.subr.bf16.mxu1 %v4784_v42  ;;  %475 = vst.msk [vmem:[#allocation2 + $0x69] sm:$0xff] %vm411_vm0, %v386_v24  ;;  %476 = vst.msk [vmem:[#allocation2 + $0x79] sm:$0xff] %vm411_vm0, %v387_v25  ;;  %v331_v9 = vmul.f32 %v5291_v17, %v292_v58 }
  0x2f   : > { %v390_v33 = vmax.f32 %v358_v18, 0.0  ;;  %477 = vst.msk [vmem:[#allocation2 + $0x81] sm:$0xff] %vm411_vm0, %v388_v28  ;;  %478 = vst.msk [vmem:[#allocation2 + $0x91] sm:$0xff] %vm411_vm0, %v389_v32  ;;  %v5476_v28 = vpack.c.bf16 %v3833_v11, %v3832_v10 }
  0x30   : > { %480 = vst.msk [vmem:[#allocation2 + $0xa9] sm:$0xff] %vm411_vm0, %v391_v44  ;;  %481 = vst.msk [vmem:[#allocation2 + $0xb1] sm:$0xff] %vm411_vm0, %v392_v57  ;;  %v398_v44 = vmax.f32 %v366_v29, 0.0  ;;  %v291_v57 = vld [vmem:[%s5299_s7 + $0xb0] sm:$0xff] }
  0x31   : > { %4787 = vmatpush3.bf16.msra.mxu1 %v4784_v42  ;;  %v5395_v41 = vld [vmem:[#allocation2 + $0x18] sm:$0xff]  ;;  %479 = vst.msk [vmem:[#allocation2 + $0x99] sm:$0xff] %vm411_vm0, %v390_v33  ;;  %482 = vst.msk [vmem:[#allocation2 + $0xc1] sm:$0xff] %vm411_vm0, %v393_v63 }
  0x32   : > { %v5397_v42 = vld [vmem:[#allocation2 + $0x20] sm:$0xff]  ;;  %v5399_v43 = vld [vmem:[#allocation2 + $0x28] sm:$0x3]  ;;  %v612_v48 = vrot.slane %v5395_v41, 1  ;;  %v5409_v51 = vld [vmem:[#allocation2 + $0x30] sm:$0xff]  ;;  %483 = vst.msk [vmem:[#allocation2 + $0xc9] sm:$0xff] %vm411_vm0, %v394_v4 }
  0x33   : > { %v613_v49 = vrot.slane %v5397_v42, 1  ;;  %v615_v50 = vrot.slane %v5399_v43, 1  ;;  %v5411_v52 = vld [vmem:[#allocation2 + $0x38] sm:$0xff]  ;;  %v617_v54 = vrot.slane %v5409_v51, 1  ;;  %v5416_v56 = vld [vmem:[#allocation2 + $0x40] sm:$0x3] }
  0x34   : > { %v618_v55 = vrot.slane %v5411_v52, 1  ;;  %v620_v61 = vrot.slane %v5416_v56, 1  ;;  %v5423_v62 = vld [vmem:[#allocation2 + $0x48] sm:$0xff]  ;;  %v5430_v1 = vld [vmem:[#allocation2 + $0x50] sm:$0xff]  ;;  %v5433_v3 = vld [vmem:[#allocation2 + $0x58] sm:$0x3] }
  0x35   : > { %v614_v59 = vsel %vm606_vm2, %v612_v48, %v613_v49  ;;  %v616_v60 = vsel %vm606_vm2, %v613_v49, %v615_v50  ;;  %v622_v2 = vrot.slane %v5423_v62, 1  ;;  %v623_v6 = vrot.slane %v5430_v1, 1  ;;  %v5440_v7 = vld [vmem:[#allocation2 + $0x60] sm:$0xff]  ;;  %v5457_v15 = vld [vmem:[#allocation2 + $0x68] sm:$0xff]  ;;  %v5467_v22 = vld [vmem:[#allocation2 + $0x70] sm:$0x3] }
  0x36   : > { %4279 = vmatprep.mubr.msk.f32.mxu1 %vm411_vm0, %v614_v59  ;;  %4500 = vmatprep.mubr.msk.f32.mxu0 %vm411_vm0, %v614_v59  ;;  %v5428_v0 = vsel %vm606_vm2, %v617_v54, %v618_v55  ;;  %v5454_v13 = vsel %vm606_vm2, %v618_v55, %v620_v61  ;;  %v625_v14 = vrot.slane %v5433_v3, 1  ;;  %v628_v21 = vrot.slane %v5457_v15, 1  ;;  %v5471_v24 = vld [vmem:[#allocation2 + $0x78] sm:$0xff]  ;;  %v5473_v25 = vld [vmem:[#allocation2 + $0x80] sm:$0xff]  ;;  %484 = vst.msk [vmem:[#allocation2 + $0xd9] sm:$0xff] %vm411_vm0, %v395_v16  ;;  %v5499_v38 = vld [vmem:[#allocation2 + $0x90] sm:$0xff] }
  0x37   : > { %6750 = vst [vmem:[#allocation5_spill] sm:$0xff] %v5428_v0  ;;  %4280 = vmatmul.mubr.msk.f32.gmra.mrb[2].mxu1 %vm411_vm0, %v616_v60  ;;  %4501 = vmatmul.mubr.msk.f32.vlgmr.msra.gmra.mrb[0].mxu0 %vm411_vm0, %v616_v60  ;;  %6751 = vst [vmem:[#allocation6_spill] sm:$0xff] %v5454_v13  ;;  %v5463_v18 = vsel %vm606_vm2, %v622_v2, %v623_v6  ;;  %v630_v32 = vrot.slane %v5467_v22, 1  ;;  %v5491_v33 = vld [vmem:[#allocation2 + $0x88] sm:$0x3]  ;;  %v632_v35 = vrot.slane %v5471_v24, 1 }
  0x38   : > { %4815 = vmatpush3.bf16.msra.mxu0 %v5306_v20  ;;  %4282 = vmatprep.mubr.msk.f32.mxu1 %vm411_vm0, %v5428_v0  ;;  %6752 = vst [vmem:[#allocation7_spill] sm:$0xff] %v5463_v18  ;;  %v627_v20 = vrot.slane %v5440_v7, 1  ;;  %v5488_v31 = vsel %vm606_vm2, %v623_v6, %v625_v14  ;;  %v633_v36 = vrot.slane %v5473_v25, 1  ;;  %485 = vst.msk [vmem:[#allocation2 + $0xe1] sm:$0xff] %vm411_vm0, %v396_v30  ;;  %v5502_v40 = vld [vmem:[#allocation2 + $0x98] sm:$0xff]  ;;  %v637_v48 = vrot.slane %v5499_v38, 1 }
  0x39   : > { %4503 = vmatprep.mubr.msk.f32.mxu0 %vm411_vm0, %v5428_v0  ;;  %4817 = vmatprep.subr.bf16.mxu0 %v5390_v37  ;;  %6753 = vst [vmem:[#allocation8_spill] sm:$0xff] %v5488_v31  ;;  %486 = vst.msk [vmem:[#allocation2 + $0xf1] sm:$0xff] %vm411_vm0, %v397_v39  ;;  %v5518_v47 = vsel %vm606_vm2, %v628_v21, %v630_v32  ;;  %v638_v50 = vrot.slane %v5502_v40, 1  ;;  %v5526_v53 = vld [vmem:[#allocation2 + $0xa0] sm:$0x3]  ;;  %v328_v54 = vmul.f32 %v5291_v17, %v289_v45  ;;  %v5532_v59 = vld [vmem:[#allocation2 + $0xa8] sm:$0xff] }
  0x3a   : > { %v5494_v34 = vsel %vm606_vm2, %v627_v20, %v628_v21  ;;  %6755 = vst [vmem:[#allocation10_spill] sm:$0xff] %v5518_v47  ;;  %487 = vst.msk [vmem:[#allocation2 + $0xf9] sm:$0xff] %vm411_vm0, %v398_v44  ;;  %v5523_v49 = vsel %vm606_vm2, %v632_v35, %v633_v36  ;;  %v329_v55 = vmul.f32 %v5291_v17, %v290_v46  ;;  %v5534_v60 = vld [vmem:[#allocation2 + $0xb0] sm:$0xff]  ;;  %v640_v2 = vrot.slane %v5526_v53, 1  ;;  %v5549_v4 = vld [vmem:[#allocation2 + $0xb8] sm:$0x3] }
  0x3b   : > { %4283 = vmatmul.mubr.msk.f32.gmra.mrb[4].mxu1 %vm411_vm0, %v5454_v13  ;;  %4504 = vmatmul.mubr.msk.f32.gmra.mrb[2].mxu0 %vm411_vm0, %v5454_v13  ;;  %6754 = vst [vmem:[#allocation9_spill] sm:$0xff] %v5494_v34  ;;  %6756 = vst [vmem:[#allocation11_spill] sm:$0xff] %v5523_v49  ;;  %v367_v63 = vadd.f32 %v5304_v19, %v328_v54  ;;  %v330_v6 = vmul.f32 %v5291_v17, %v291_v57  ;;  %v642_v11 = vrot.slane %v5532_v59, 1  ;;  %v5559_v16 = vld [vmem:[#allocation2 + $0xc0] sm:$0xff]  ;;  %v5561_v21 = vld [vmem:[#allocation2 + $0xc8] sm:$0xff] }
  0x3c   : > { %4285 = vmatprep.mubr.msk.f32.mxu1 %vm411_vm0, %v5463_v18  ;;  %4506 = vmatprep.mubr.msk.f32.mxu0 %vm411_vm0, %v5463_v18  ;;  %6757 = vst [vmem:[#allocation12_spill] sm:$0xff] %v5532_v59  ;;  %6758 = vst [vmem:[#allocation13_spill] sm:$0xff] %v5534_v60  ;;  %v368_v5 = vadd.f32 %v5304_v19, %v329_v55  ;;  %v5555_v10 = vsel %vm606_vm2, %v637_v48, %v638_v50  ;;  %v643_v14 = vrot.slane %v5534_v60, 1  ;;  %v293_v32 = vld [vmem:[%s5299_s7 + $0xc0] sm:$0xff]  ;;  %v294_v35 = vld [vmem:[%s5299_s7 + $0xc8] sm:$0xff] }
  0x3d   : > { %4819 = vmatpush3.bf16.msra.mxu0 %v5390_v37  ;;  %v635_v37 = vrot.slane %v5491_v33, 1  ;;  %6760 = vst [vmem:[#allocation15_spill] sm:$0xff] %v5555_v10  ;;  %v399_v20 = vmax.f32 %v367_v63, 0.0  ;;  %v369_v29 = vadd.f32 %v5304_v19, %v330_v6  ;;  %v370_v30 = vadd.f32 %v5304_v19, %v331_v9  ;;  %v5581_v45 = vld [vmem:[#allocation2 + $0xd0] sm:$0x3]  ;;  %v5588_v55 = vld [vmem:[#allocation2 + $0xd8] sm:$0xff] }
  0x3e   : > { %4821 = vmatprep.subr.bf16.mxu0 %v5476_v28  ;;  %v400_v23 = vmax.f32 %v368_v5, 0.0  ;;  %v5578_v39 = vsel %vm606_vm2, %v638_v50, %v640_v2  ;;  %v647_v44 = vrot.slane %v5559_v16, 1  ;;  %v5585_v48 = vsel %vm606_vm2, %v642_v11, %v643_v14  ;;  %v295_v63 = vld [vmem:[%s5299_s7 + $0xd0] sm:$0xff]  ;;  %v296_v6 = vld [vmem:[%s5299_s7 + $0xd8] sm:$0xff] }
  0x3f   : > { %4286 = vmatmul.mubr.msk.f32.gmra.mrb[6].mxu1 %vm411_vm0, %v5488_v31  ;;  %4507 = vmatmul.mubr.msk.f32.gmra.mrb[4].mxu0 %vm411_vm0, %v5488_v31  ;;  %v5541_v61 = vsel %vm606_vm2, %v633_v36, %v635_v37  ;;  %v645_v36 = vrot.slane %v5549_v4, 1  ;;  %488 = vst.msk [vmem:[#allocation2 + $0x109] sm:$0xff] %vm411_vm0, %v399_v20  ;;  %6761 = vst [vmem:[#allocation16_spill] sm:$0xff] %v5578_v39  ;;  %v401_v46 = vmax.f32 %v369_v29, 0.0  ;;  %v402_v37 = vmax.f32 %v370_v30, 0.0  ;;  %v5590_v57 = vld [vmem:[#allocation2 + $0xe0] sm:$0xff] }
  0x40   : > { %4288 = vmatprep.mubr.msk.f32.mxu1 %vm411_vm0, %v5494_v34  ;;  %4509 = vmatprep.mubr.msk.f32.mxu0 %vm411_vm0, %v5494_v34  ;;  %6759 = vst [vmem:[#allocation14_spill] sm:$0xff] %v5541_v61  ;;  %489 = vst.msk [vmem:[#allocation2 + $0x111] sm:$0xff] %vm411_vm0, %v400_v23  ;;  %v648_v54 = vrot.slane %v5561_v21, 1  ;;  %v332_v50 = vmul.f32 %v5291_v17, %v293_v32  ;;  %v333_v58 = vmul.f32 %v5291_v17, %v294_v35  ;;  %v297_v23 = vld [vmem:[%s5299_s7 + $0xe0] sm:$0xff]  ;;  %v298_v35 = vld [vmem:[%s5299_s7 + $0xe8] sm:$0xff] }
  0x41   : > { %6762 = vst [vmem:[#allocation17_spill] sm:$0xff] %v5585_v48  ;;  %v1276_v2 = vrot.slane %v5395_v41, 2  ;;  %v1277_v5 = vrot.slane %v5397_v42, 2  ;;  %490 = vst.msk [vmem:[#allocation2 + $0x121] sm:$0xff] %vm411_vm0, %v401_v46  ;;  %v5605_v9 = vsel %vm606_vm2, %v643_v14, %v645_v36  ;;  %v650_v11 = vrot.slane %v5581_v45, 1 }
  0x42   : > { %491 = vst.msk [vmem:[#allocation2 + $0x129] sm:$0xff] %vm411_vm0, %v402_v37  ;;  %6763 = vst [vmem:[#allocation18_spill] sm:$0xff] %v5605_v9  ;;  %v371_v20 = vadd.f32 %v5304_v19, %v332_v50  ;;  %v652_v29 = vrot.slane %v5588_v55, 1  ;;  %v653_v30 = vrot.slane %v5590_v57, 1  ;;  %v372_v32 = vadd.f32 %v5304_v19, %v333_v58  ;;  %v5622_v46 = vld [vmem:[#allocation2 + $0xe8] sm:$0x3] }
  0x43   : > { %4289 = vmatmul.mubr.msk.f32.gmra.mrb[8].mxu1 %vm411_vm0, %v5518_v47  ;;  %4510 = vmatmul.mubr.msk.f32.gmra.mrb[6].mxu0 %vm411_vm0, %v5518_v47  ;;  %v334_v14 = vmul.f32 %v5291_v17, %v295_v63  ;;  %v5620_v36 = vsel %vm606_vm2, %v647_v44, %v648_v54  ;;  %v5624_v37 = vld [vmem:[#allocation2 + $0xf0] sm:$0xff]  ;;  %v335_v12 = vmul.f32 %v5291_v17, %v296_v6  ;;  %v1279_v44 = vrot.slane %v5399_v43, 2 }
  0x44   : > { %4291 = vmatprep.mubr.msk.f32.mxu1 %vm411_vm0, %v5523_v49  ;;  %4512 = vmatprep.mubr.msk.f32.mxu0 %vm411_vm0, %v5523_v49  ;;  %6764 = vst [vmem:[#allocation19_spill] sm:$0xff] %v5620_v36  ;;  %v403_v50 = vmax.f32 %v371_v20, 0.0  ;;  %v336_v63 = vmul.f32 %v5291_v17, %v297_v23  ;;  %v5640_v6 = vsel %vm606_vm2, %v648_v54, %v650_v11  ;;  %v655_v23 = vrot.slane %v5622_v46, 1 }
  0x45   : > { %v373_v58 = vadd.f32 %v5304_v19, %v334_v14  ;;  %6766 = vst [vmem:[#allocation21_spill] sm:$0xff] %v5640_v6  ;;  %v337_v20 = vmul.f32 %v5291_v17, %v298_v35  ;;  %v5650_v43 = vsel %vm606_vm2, %v652_v29, %v653_v30  ;;  %v657_v54 = vrot.slane %v5624_v37, 1  ;;  %v3688_v29 = vld [vmem:[%s6675_s3 + $0x40] sm:$0xff] }
  0x46   : > { %492 = vst.msk [vmem:[#allocation2 + $0x139] sm:$0xff] %vm411_vm0, %v403_v50  ;;  %6767 = vst [vmem:[#allocation22_spill] sm:$0xff] %v5650_v43  ;;  %v375_v35 = vadd.f32 %v5304_v19, %v336_v63  ;;  %v5678_v63 = vsel %vm1270_vm3, %v1277_v5, %v1279_v44  ;;  %v1287_v44 = vrot.slane %v5430_v1, 2  ;;  %v1297_v18 = vrot.slane %v5473_v25, 2 }
  0x47   : > { %4292 = vmatmul.mubr.msk.f32.gmra.mrb[10].mxu1 %vm411_vm0, %v5541_v61  ;;  %4513 = vmatmul.mubr.msk.f32.gmra.mrb[8].mxu0 %vm411_vm0, %v5541_v61  ;;  %v405_v11 = vmax.f32 %v373_v58, 0.0  ;;  %v376_v50 = vadd.f32 %v5304_v19, %v337_v20  ;;  %v5665_v61 = vld [vmem:[#allocation2 + $0x108] sm:$0xff]  ;;  %6768 = vst [vmem:[#allocation23_spill] sm:$0xff] %v5678_v63 }
  0x48   : > { %4294 = vmatprep.mubr.msk.f32.mxu1 %vm411_vm0, %v5555_v10  ;;  %4515 = vmatprep.mubr.msk.f32.mxu0 %vm411_vm0, %v5555_v10  ;;  %v404_v10 = vmax.f32 %v372_v32, 0.0  ;;  %v5656_v32 = vld [vmem:[#allocation2 + $0x100] sm:$0x3]  ;;  %v3689_v58 = vld [vmem:[%s6675_s3 + $0x48] sm:$0xff]  ;;  %v407_v20 = vmax.f32 %v375_v35, 0.0 }
  0x49   : > { %494 = vst.msk [vmem:[#allocation2 + $0x151] sm:$0xff] %vm411_vm0, %v405_v11  ;;  %v408_v49 = vmax.f32 %v376_v50, 0.0  ;;  %v5687_v11 = vsel %vm606_vm2, %v653_v30, %v655_v23  ;;  %v662_v30 = vrot.slane %v5665_v61, 1  ;;  %v5703_v50 = vld [vmem:[#allocation2 + $0x118] sm:$0x3]  ;;  %v5712_v34 = vld [vmem:[#allocation2 + $0x120] sm:$0xff] }
  0x4a   : > { %493 = vst.msk [vmem:[#allocation2 + $0x141] sm:$0xff] %vm411_vm0, %v404_v10  ;;  %v5667_v10 = vld [vmem:[#allocation2 + $0x110] sm:$0xff]  ;;  %6769 = vst [vmem:[#allocation24_spill] sm:$0xff] %v5687_v11  ;;  %v5714_v31 = vld [vmem:[#allocation2 + $0x128] sm:$0xff] }
  0x4b   : > { %4295 = vmatmul.mubr.msk.f32.gmra.mrb[12].mxu1 %vm411_vm0, %v5578_v39  ;;  %4516 = vmatmul.mubr.msk.f32.gmra.mrb[10].mxu0 %vm411_vm0, %v5578_v39  ;;  %v5630_v39 = vld [vmem:[#allocation2 + $0xf8] sm:$0xff]  ;;  %v663_v23 = vrot.slane %v5667_v10, 1  ;;  %496 = vst.msk [vmem:[#allocation2 + $0x169] sm:$0xff] %vm411_vm0, %v407_v20  ;;  %497 = vst.msk [vmem:[#allocation2 + $0x171] sm:$0xff] %vm411_vm0, %v408_v49  ;;  %v1289_v49 = vrot.slane %v5433_v3, 2  ;;  %v665_v20 = vrot.slane %v5703_v50, 1 }
  0x4c   : > { %4297 = vmatprep.mubr.msk.f32.mxu1 %vm411_vm0, %v5585_v48  ;;  %4518 = vmatprep.mubr.msk.f32.mxu0 %vm411_vm0, %v5585_v48  ;;  %v5628_v48 = vsel %vm1270_vm3, %v1276_v2, %v1277_v5  ;;  %v374_v2 = vadd.f32 %v5304_v19, %v335_v12  ;;  %v658_v12 = vrot.slane %v5630_v39, 1  ;;  %v1286_v5 = vrot.slane %v5423_v62, 2 }
  0x4d   : > { %6765 = vst [vmem:[#allocation20_spill] sm:$0xff] %v5628_v48  ;;  %v5738_v3 = vsel %vm606_vm2, %v662_v30, %v663_v23  ;;  %v5763_v30 = vsel %vm606_vm2, %v663_v23, %v665_v20 }
  0x4e   : > { %v406_v14 = vmax.f32 %v374_v2, 0.0  ;;  %v1284_v2 = vrot.slane %v5416_v56, 2  ;;  %v3834_v56 = vld [vmem:[%s6675_s3 + $0xd0] sm:$0xff]  ;;  %v5699_v35 = vsel %vm606_vm2, %v657_v54, %v658_v12  ;;  %6775 = vst [vmem:[#allocation30_spill] sm:$0xff] %v5738_v3  ;;  %6777 = vst [vmem:[#allocation32_spill] sm:$0xff] %v5763_v30 }
  0x4f   : > { %4298 = vmatmul.mubr.msk.f32.gmra.mrb[14].mxu1 %vm411_vm0, %v5605_v9  ;;  %4519 = vmatmul.mubr.msk.f32.gmra.mrb[12].mxu0 %vm411_vm0, %v5605_v9  ;;  %v1282_v9 = vrot.slane %v5411_v52, 2  ;;  %6770 = vst [vmem:[#allocation25_spill] sm:$0xff] %v5699_v35 }
  0x50   : > { %4300 = vmatprep.mubr.msk.f32.mxu1 %vm411_vm0, %v5620_v36  ;;  %4521 = vmatprep.mubr.msk.f32.mxu0 %vm411_vm0, %v5620_v36  ;;  %v1281_v36 = vrot.slane %v5409_v51, 2  ;;  %495 = vst.msk [vmem:[#allocation2 + $0x159] sm:$0xff] %vm411_vm0, %v406_v14  ;;  %v3835_v14 = vld [vmem:[%s6675_s3 + $0xd8] sm:$0xff]  ;;  %v5779_v20 = vld [vmem:[#allocation2 + $0x150] sm:$0xff] }
  0x51   : > { %v5721_v54 = vsel %vm1270_vm3, %v1282_v9, %v1284_v2  ;;  %v5746_v2 = vld [vmem:[#allocation2 + $0x138] sm:$0xff]  ;;  %v5777_v23 = vld [vmem:[#allocation2 + $0x148] sm:$0x3] }
  0x52   : > { %v5710_v47 = vsel %vm1270_vm3, %v1281_v36, %v1282_v9  ;;  %6772 = vst [vmem:[#allocation27_spill] sm:$0xff] %v5721_v54  ;;  %v668_v9 = vrot.slane %v5714_v31, 1 }
  0x53   : > { %4301 = vmatmul.mubr.msk.f32.gmra.mrb[16].mxu1 %vm411_vm0, %v5640_v6  ;;  %4522 = vmatmul.mubr.msk.f32.gmra.mrb[14].mxu0 %vm411_vm0, %v5640_v6  ;;  %v660_v6 = vrot.slane %v5656_v32, 1  ;;  %6771 = vst [vmem:[#allocation26_spill] sm:$0xff] %v5710_v47 }
  0x54   : > { %4303 = vmatprep.mubr.msk.f32.mxu1 %vm411_vm0, %v5650_v43  ;;  %4556 = vmatprep.mubr.msk.f32.mxu0 %vm411_vm0, %v5628_v48  ;;  %v5707_v43 = vpack.c.bf16 %v3689_v58, %v3688_v29  ;;  %v4824_v29 = vpack.c.bf16 %v3835_v14, %v3834_v56  ;;  %v5731_v58 = vsel %vm1270_vm3, %v1286_v5, %v1287_v44  ;;  %v5748_v5 = vld [vmem:[#allocation2 + $0x140] sm:$0xff]  ;;  %v1294_v14 = vrot.slane %v5467_v22, 2 }
  0x55   : > { %v5728_v36 = vsel %vm606_vm2, %v658_v12, %v660_v6  ;;  %6774 = vst [vmem:[#allocation29_spill] sm:$0xff] %v5731_v58  ;;  %v1292_v6 = vrot.slane %v5457_v15, 2  ;;  %v5743_v12 = vld [vmem:[#allocation2 + $0x130] sm:$0x3]  ;;  %v5755_v56 = vsel %vm1270_vm3, %v1287_v44, %v1289_v49  ;;  %v673_v13 = vrot.slane %v5748_v5, 1 }
  0x56   : > { %6773 = vst [vmem:[#allocation28_spill] sm:$0xff] %v5728_v36  ;;  %4789 = vmatprep.subr.bf16.mxu1 %v5707_v43  ;;  %6776 = vst [vmem:[#allocation31_spill] sm:$0xff] %v5755_v56  ;;  %v299_v44 = vld [vmem:[%s5299_s7 + $0xf0] sm:$0xff] }
  0x57   : > { %4304 = vmatmul.mubr.msk.f32.gmra.mrb[18].mxu1 %vm411_vm0, %v5687_v11  ;;  %4557 = vmatmul.mubr.msk.f32.vlgmr.msra.gmra.mrb[0].mxu0 %vm411_vm0, %v5678_v63  ;;  %v1291_v11 = vrot.slane %v5440_v7, 2  ;;  %v5781_v0 = vld [vmem:[#allocation2 + $0x158] sm:$0xff]  ;;  %v5822_v63 = vld [vmem:[#allocation2 + $0x170] sm:$0xff] }
  0x58   : > { %4823 = vmatpush3.bf16.msra.mxu0 %v5476_v28  ;;  %4306 = vmatprep.mubr.msk.f32.mxu1 %vm411_vm0, %v5699_v35  ;;  %v667_v28 = vrot.slane %v5712_v34, 1  ;;  %v670_v35 = vrot.slane %v5743_v12, 1  ;;  %6784 = vst [vmem:[#allocation39_spill] sm:$0xff] %v5822_v63 }
  0x59   : > { %4559 = vmatprep.mubr.msk.f32.mxu0 %vm411_vm0, %v5710_v47  ;;  %4825 = vmatprep.subr.bf16.mxu0 %v4824_v29  ;;  %v5773_v22 = vsel %vm1270_vm3, %v1291_v11, %v1292_v6  ;;  %v5789_v11 = vsel %vm1270_vm3, %v1292_v6, %v1294_v14  ;;  %v338_v47 = vmul.f32 %v5291_v17, %v299_v44  ;;  %v677_v6 = vrot.slane %v5779_v20, 1 }
  0x5a   : > { %v5770_v49 = vsel %vm606_vm2, %v667_v28, %v668_v9  ;;  %6779 = vst [vmem:[#allocation34_spill] sm:$0xff] %v5773_v22  ;;  %6780 = vst [vmem:[#allocation35_spill] sm:$0xff] %v5789_v11  ;;  %v1301_v28 = vrot.slane %v5499_v38, 2  ;;  %v678_v14 = vrot.slane %v5781_v0, 1 }
  0x5b   : > { %4307 = vmatmul.mubr.msk.f32.gmra.mrb[20].mxu1 %vm411_vm0, %v5728_v36  ;;  %4560 = vmatmul.mubr.msk.f32.gmra.mrb[2].mxu0 %vm411_vm0, %v5721_v54  ;;  %v1296_v36 = vrot.slane %v5471_v24, 2  ;;  %6778 = vst [vmem:[#allocation33_spill] sm:$0xff] %v5770_v49  ;;  %v1302_v54 = vrot.slane %v5502_v40, 2  ;;  %v377_v48 = vadd.f32 %v5304_v19, %v338_v47  ;;  %v683_v47 = vrot.slane %v5822_v63, 1 }
  0x5c   : > { %4309 = vmatprep.mubr.msk.f32.mxu1 %vm411_vm0, %v5738_v3  ;;  %4562 = vmatprep.mubr.msk.f32.mxu0 %vm411_vm0, %v5731_v58  ;;  %v672_v3 = vrot.slane %v5746_v2, 1  ;;  %v1299_v58 = vrot.slane %v5491_v33, 2  ;;  %v5800_v33 = vsel %vm606_vm2, %v668_v9, %v670_v35  ;;  %v1304_v9 = vrot.slane %v5526_v53, 2 }
  0x5d   : > { %4827 = vmatpush3.bf16.msra.mxu0 %v4824_v29  ;;  %6781 = vst [vmem:[#allocation36_spill] sm:$0xff] %v5800_v33  ;;  %v675_v29 = vrot.slane %v5777_v23, 1  ;;  %v5809_v44 = vsel %vm1270_vm3, %v1296_v36, %v1297_v18  ;;  %v3869_v36 = vld [vmem:[%s6675_s3 + $0xe8] sm:$0xff]  ;;  %v1306_v53 = vrot.slane %v5532_v59, 2 }
  0x5e   : > { %6783 = vst [vmem:[#allocation38_spill] sm:$0xff] %v5809_v44  ;;  %v5817_v35 = vsel %vm1270_vm3, %v1297_v18, %v1299_v58  ;;  %v5833_v18 = vsel %vm1270_vm3, %v1301_v28, %v1302_v54  ;;  %v1307_v58 = vrot.slane %v5534_v60, 2  ;;  %v5852_v60 = vld [vmem:[#allocation2 + $0x178] sm:$0x3] }
  0x5f   : > { %4310 = vmatmul.mubr.msk.f32.gmra.mrb[22].mxu1 %vm411_vm0, %v5763_v30  ;;  %4563 = vmatmul.mubr.msk.f32.gmra.mrb[4].mxu0 %vm411_vm0, %v5755_v56  ;;  %v5806_v30 = vsel %vm606_vm2, %v672_v3, %v673_v13  ;;  %v5811_v56 = vld [vmem:[#allocation2 + $0x160] sm:$0x3]  ;;  %v339_v3 = vmul.f32 %v5291_v17, %v300_v8  ;;  %v5843_v8 = vsel %vm606_vm2, %v673_v13, %v675_v29  ;;  %v1311_v29 = vrot.slane %v5559_v16, 2 }
  0x60   : > { %4312 = vmatprep.mubr.msk.f32.mxu1 %vm411_vm0, %v5770_v49  ;;  %4565 = vmatprep.mubr.msk.f32.mxu0 %vm411_vm0, %v5773_v22  ;;  %6782 = vst [vmem:[#allocation37_spill] sm:$0xff] %v5806_v30  ;;  %v3868_v49 = vld [vmem:[%s6675_s3 + $0xe0] sm:$0xff]  ;;  %v5820_v22 = vld [vmem:[#allocation2 + $0x168] sm:$0xff]  ;;  %v5846_v17 = vsel %vm606_vm2, %v677_v6, %v678_v14  ;;  %v680_v28 = vrot.slane %v5811_v56, 1  ;;  %v5869_v13 = vsel %vm1270_vm3, %v1302_v54, %v1304_v9  ;;  %v1312_v6 = vrot.slane %v5561_v21, 2 }
  0x61   : > { %v5854_v59 = vpack.c.bf16 %v3869_v36, %v3868_v49  ;;  %v1309_v49 = vrot.slane %v5549_v4, 2  ;;  %v1317_v9 = vrot.slane %v5590_v57, 2 }
  0x63   : > { %4313 = vmatmul.mubr.msk.f32.gmra.mrb[24].mxu1 %vm411_vm0, %v5800_v33  ;;  %4566 = vmatmul.mubr.msk.f32.gmra.mrb[6].mxu0 %vm411_vm0, %v5789_v11  ;;  %v378_v33 = vadd.f32 %v5304_v19, %v339_v3  ;;  %v682_v11 = vrot.slane %v5820_v22, 1  ;;  %v5866_v19 = vsel %vm606_vm2, %v678_v14, %v680_v28  ;;  %v5895_v54 = vsel %vm1270_vm3, %v1307_v58, %v1309_v49  ;;  %v3690_v3 = vld [vmem:[%s6675_s3 + $0x50] sm:$0xff] }
  0x64   : > { %4315 = vmatprep.mubr.msk.f32.mxu1 %vm411_vm0, %v5806_v30  ;;  %4568 = vmatprep.mubr.msk.f32.mxu0 %vm411_vm0, %v5809_v44  ;;  %v409_v30 = vmax.f32 %v377_v48, 0.0  ;;  %v685_v48 = vrot.slane %v5852_v60, 1  ;;  %6786 = vst [vmem:[#allocation41_spill] sm:$0xff] %v5895_v54  ;;  %v5899_v14 = vsel %vm1270_vm3, %v1311_v29, %v1312_v6  ;;  %v1321_v28 = vrot.slane %v5624_v37, 2 }
  0x65   : > { %v410_v44 = vmax.f32 %v378_v33, 0.0  ;;  %v5878_v33 = vsel %vm1270_vm3, %v1306_v53, %v1307_v58  ;;  %4829 = vmatprep.subr.bf16.mxu0 %v5854_v59  ;;  %6787 = vst [vmem:[#allocation42_spill] sm:$0xff] %v5899_v14  ;;  %v1319_v53 = vrot.slane %v5622_v46, 2  ;;  %v3725_v46 = vld [vmem:[%s6675_s3 + $0x68] sm:$0xff] }
  0x66   : > { %498 = vst.msk [vmem:[#allocation2 + $0x181] sm:$0xff] %vm411_vm0, %v409_v30  ;;  %v5875_v30 = vsel %vm606_vm2, %v682_v11, %v683_v47  ;;  %v5892_v4 = vsel %vm606_vm2, %v683_v47, %v685_v48  ;;  %v1314_v11 = vrot.slane %v5581_v45, 2  ;;  %v3691_v45 = vld [vmem:[%s6675_s3 + $0x58] sm:$0xff]  ;;  %v1322_v47 = vrot.slane %v5630_v39, 2 }
  0x67   : > { %4316 = vmatmul.mubr.msk.f32.gmra.mrb[26].mxu1 %vm411_vm0, %v5843_v8  ;;  %4569 = vmatmul.mubr.msk.f32.gmra.mrb[8].mxu0 %vm411_vm0, %v5817_v35  ;;  %499 = vst.msk [vmem:[#allocation2 + $0x189] sm:$0xff] %vm411_vm0, %v410_v44  ;;  %6785 = vst [vmem:[#allocation40_spill] sm:$0xff] %v5892_v4  ;;  %v1316_v44 = vrot.slane %v5588_v55, 2  ;;  %v4792_v48 = vpack.c.bf16 %v3691_v45, %v3690_v3  ;;  %v5941_v49 = vsel %vm1270_vm3, %v1317_v9, %v1319_v53 }
  0x68   : > { %4318 = vmatprep.mubr.msk.f32.mxu1 %vm411_vm0, %v5846_v17  ;;  %4571 = vmatprep.mubr.msk.f32.mxu0 %vm411_vm0, %v5833_v18  ;;  %v5918_v36 = vsel %vm1270_vm3, %v1312_v6, %v1314_v11  ;;  %v5946_v29 = vsel %vm1270_vm3, %v1321_v28, %v1322_v47  ;;  %v1326_v6 = vrot.slane %v5665_v61, 2  ;;  %v1327_v11 = vrot.slane %v5667_v10, 2 }
  0x69   : > { %6788 = vst [vmem:[#allocation43_spill] sm:$0xff] %v5918_v36  ;;  %v5922_v58 = vsel %vm1270_vm3, %v1316_v44, %v1317_v9  ;;  %v1331_v9 = vrot.slane %v5712_v34, 2  ;;  %v1334_v3 = vrot.slane %v5743_v12, 2  ;;  %v1336_v53 = vrot.slane %v5746_v2, 2 }
  0x6a   : > { %v1337_v28 = vrot.slane %v5748_v5, 2 }
  0x6b   : > { %4319 = vmatmul.mubr.msk.f32.gmra.mrb[28].mxu1 %vm411_vm0, %v5866_v19  ;;  %4572 = vmatmul.mubr.msk.f32.gmra.mrb[10].mxu0 %vm411_vm0, %v5869_v13 }
  0x6c   : > { %4321 = vmatprep.mubr.msk.f32.mxu1 %vm411_vm0, %v5875_v30  ;;  %4574 = vmatprep.mubr.msk.f32.mxu0 %vm411_vm0, %v5878_v33 }
  0x6f   : > { %4322 = vmatmul.mubr.msk.f32.gmra.mrb[30].mxu1 %vm411_vm0, %v5892_v4  ;;  %4575 = vmatmul.mubr.msk.f32.gmra.mrb[12].mxu0 %vm411_vm0, %v5895_v54  ;;  %v6792_v4 = vld [vmem:[#allocation12_spill] sm:$0xff] }
  0x70   : > { %4332 = vmatprep.mubr.msk.f32.mxu1 %vm411_vm0, %v5317_v26  ;;  %4577 = vmatprep.mubr.msk.f32.mxu0 %vm411_vm0, %v5899_v14  ;;  %v3724_v26 = vld [vmem:[%s6675_s3 + $0x60] sm:$0xff] }
  0x71   : > { %v5950_v44 = vpack.c.bf16 %v3725_v46, %v3724_v26  ;;  %v1341_v26 = vrot.slane %v5779_v20, 2  ;;  %v1342_v46 = vrot.slane %v5781_v0, 2 }
  0x73   : > { %4333 = vmatmul.mubr.msk.f32.vlgmr.msra.gmra.mrb[0].mxu1 %vm411_vm0, %v5319_v27  ;;  %4578 = vmatmul.mubr.msk.f32.gmra.mrb[14].mxu0 %vm411_vm0, %v5918_v36  ;;  %v1324_v27 = vrot.slane %v5656_v32, 2  ;;  %v5965_v32 = vsel %vm1270_vm3, %v1326_v6, %v1327_v11  ;;  %v6017_v6 = vsel %vm1270_vm3, %v1341_v26, %v1342_v46  ;;  %v6042_v26 = vld [vmem:[#allocation2 + $0x190] sm:$0x3] }
  0x74   : > { %4335 = vmatprep.mubr.msk.f32.mxu1 %vm411_vm0, %v5395_v41  ;;  %4580 = vmatprep.mubr.msk.f32.mxu0 %vm411_vm0, %v5922_v58  ;;  %6789 = vst [vmem:[#allocation44_spill] sm:$0xff] %v6017_v6 }
  0x75   : > { %4791 = vmatpush3.bf16.msra.mxu1 %v5707_v43  ;;  %v5961_v41 = vsel %vm1270_vm3, %v1322_v47, %v1324_v27  ;;  %v1329_v43 = vrot.slane %v5703_v50, 2  ;;  %v1339_v47 = vrot.slane %v5777_v23, 2  ;;  %v1344_v27 = vrot.slane %v5811_v56, 2 }
  0x76   : > { %4793 = vmatprep.subr.bf16.mxu1 %v4792_v48 }
  0x77   : > { %4336 = vmatmul.mubr.msk.f32.gmra.mrb[2].mxu1 %vm411_vm0, %v5397_v42  ;;  %4581 = vmatmul.mubr.msk.f32.gmra.mrb[16].mxu0 %vm411_vm0, %v5941_v49  ;;  %v1332_v42 = vrot.slane %v5714_v31, 2  ;;  %v5979_v50 = vsel %vm1270_vm3, %v1327_v11, %v1329_v43  ;;  %v6013_v23 = vsel %vm1270_vm3, %v1337_v28, %v1339_v47  ;;  %v1346_v11 = vrot.slane %v5820_v22, 2 }
  0x78   : > { %4338 = vmatprep.mubr.msk.f32.mxu1 %vm411_vm0, %v5409_v51  ;;  %4583 = vmatprep.mubr.msk.f32.mxu0 %vm411_vm0, %v5946_v29  ;;  %v1347_v43 = vrot.slane %v5822_v63, 2  ;;  %v6034_v56 = vsel %vm1270_vm3, %v1342_v46, %v1344_v27  ;;  %v2220_v46 = vrot.slane %v6042_v26, 2 }
  0x79   : > { %4795 = vmatpush3.bf16.msra.mxu1 %v4792_v48  ;;  %v5983_v45 = vsel %vm1270_vm3, %v1331_v9, %v1332_v42  ;;  %v5996_v12 = vsel %vm1270_vm3, %v1332_v42, %v1334_v3  ;;  %v6000_v48 = vsel %vm1270_vm3, %v1336_v53, %v1337_v28  ;;  %v6021_v9 = vld [vmem:[#allocation2 + $0x180] sm:$0xff]  ;;  %v6023_v42 = vld [vmem:[#allocation2 + $0x188] sm:$0xff]  ;;  %6790 = vst [vmem:[#allocation45_spill] sm:$0xff] %v6034_v56  ;;  %v1349_v3 = vrot.slane %v5852_v60, 2 }
  0x7a   : > { %4797 = vmatprep.subr.bf16.mxu1 %v5950_v44  ;;  %v6038_v53 = vsel %vm1270_vm3, %v1346_v11, %v1347_v43  ;;  %v2217_v28 = vrot.slane %v6021_v9, 2  ;;  %v2218_v47 = vrot.slane %v6023_v42, 2  ;;  %v6795_v11 = vld [vmem:[#allocation13_spill] sm:$0xff] }
  0x7b   : > { %4339 = vmatmul.mubr.msk.f32.gmra.mrb[4].mxu1 %vm411_vm0, %v5411_v52  ;;  %4584 = vmatmul.mubr.msk.f32.gmra.mrb[18].mxu0 %vm411_vm0, %v5961_v41  ;;  %6791 = vst [vmem:[#allocation46_spill] sm:$0xff] %v6038_v53  ;;  %v6053_v60 = vsel %vm1270_vm3, %v1347_v43, %v1349_v3  ;;  %v3870_v3 = vld [vmem:[%s6675_s3 + $0xf0] sm:$0xff] }
  0x7c   : > { %4341 = vmatprep.mubr.msk.f32.mxu1 %vm411_vm0, %v5423_v62  ;;  %4586 = vmatprep.mubr.msk.f32.mxu0 %vm411_vm0, %v5965_v32  ;;  %6793 = vst [vmem:[#allocation12_spill] sm:$0xff] %v6053_v60  ;;  %v6057_v27 = vsel %vm1270_vm3, %v2217_v28, %v2218_v47  ;;  %v6068_v43 = vsel %vm1270_vm3, %v2218_v47, %v2220_v46  ;;  %v3871_v28 = vld [vmem:[%s6675_s3 + $0xf8] sm:$0xff]  ;;  %v3904_v46 = vld [vmem:[%s6675_s3 + $0x100] sm:$0xff] }
  0x7d   : > { %6794 = vst [vmem:[#allocation47_spill] sm:$0xff] %v6057_v27  ;;  %6796 = vst [vmem:[#allocation13_spill] sm:$0xff] %v6068_v43  ;;  %v4832_v47 = vpack.c.bf16 %v3871_v28, %v3870_v3  ;;  %v3726_v28 = vld [vmem:[%s6675_s3 + $0x70] sm:$0xff] }
  0x7f   : > { %4342 = vmatmul.mubr.msk.f32.gmra.mrb[6].mxu1 %vm411_vm0, %v5430_v1  ;;  %4587 = vmatmul.mubr.msk.f32.gmra.mrb[20].mxu0 %vm411_vm0, %v5979_v50 }
  0x80   : > { %4344 = vmatprep.mubr.msk.f32.mxu1 %vm411_vm0, %v5440_v7  ;;  %4589 = vmatprep.mubr.msk.f32.mxu0 %vm411_vm0, %v5983_v45 }
  0x83   : > { %4345 = vmatmul.mubr.msk.f32.gmra.mrb[8].mxu1 %vm411_vm0, %v5457_v15  ;;  %4590 = vmatmul.mubr.msk.f32.gmra.mrb[22].mxu0 %vm411_vm0, %v5996_v12 }
  0x84   : > { %4347 = vmatprep.mubr.msk.f32.mxu1 %vm411_vm0, %v5471_v24  ;;  %4592 = vmatprep.mubr.msk.f32.mxu0 %vm411_vm0, %v6000_v48 }
  0x87   : > { %4348 = vmatmul.mubr.msk.f32.gmra.mrb[10].mxu1 %vm411_vm0, %v5473_v25  ;;  %4593 = vmatmul.mubr.msk.f32.gmra.mrb[24].mxu0 %vm411_vm0, %v6013_v23 }
  0x88   : > { %4350 = vmatprep.mubr.msk.f32.mxu1 %vm411_vm0, %v5499_v38  ;;  %4595 = vmatprep.mubr.msk.f32.mxu0 %vm411_vm0, %v6017_v6 }
  0x8b   : > { %4351 = vmatmul.mubr.msk.f32.gmra.mrb[12].mxu1 %vm411_vm0, %v5502_v40  ;;  %4596 = vmatmul.mubr.msk.f32.gmra.mrb[26].mxu0 %vm411_vm0, %v6034_v56 }
  0x8c   : > { %4353 = vmatprep.mubr.msk.f32.mxu1 %vm411_vm0, %v6792_v4  ;;  %4598 = vmatprep.mubr.msk.f32.mxu0 %vm411_vm0, %v6038_v53 }
  0x8f   : > { %4354 = vmatmul.mubr.msk.f32.gmra.mrb[14].mxu1 %vm411_vm0, %v6795_v11  ;;  %4599 = vmatmul.mubr.msk.f32.gmra.mrb[28].mxu0 %vm411_vm0, %v6053_v60 }
  0x90   : > { %4356 = vmatprep.mubr.msk.f32.mxu1 %vm411_vm0, %v5559_v16  ;;  %4601 = vmatprep.mubr.msk.f32.mxu0 %vm411_vm0, %v6057_v27  ;;  %v3907_v27 = vld [vmem:[%s6675_s3 + $0x118] sm:$0xff] }
  0x93   : > { %4357 = vmatmul.mubr.msk.f32.gmra.mrb[16].mxu1 %vm411_vm0, %v5561_v21  ;;  %4602 = vmatmul.mubr.msk.f32.gmra.mrb[30].mxu0 %vm411_vm0, %v6068_v43  ;;  %v3905_v43 = vld [vmem:[%s6675_s3 + $0x108] sm:$0xff] }
  0x94   : > { %4359 = vmatprep.mubr.msk.f32.mxu1 %vm411_vm0, %v5588_v55  ;;  %4612 = vmatprep.mubr.msk.f32.mxu0 %vm411_vm0, %v5409_v51  ;;  %v6099_v51 = vpack.c.bf16 %v3905_v43, %v3904_v46 }
  0x97   : > { %4360 = vmatmul.mubr.msk.f32.gmra.mrb[18].mxu1 %vm411_vm0, %v5590_v57  ;;  %4613 = vmatmul.mubr.msk.f32.vlgmr.msra.gmra.mrb[0].mxu0 %vm411_vm0, %v5411_v52  ;;  %v5113_v52 = vld [vmem:[#allocation2] sm:$0xff] }
  0x98   : > { %4831 = vmatpush3.bf16.msra.mxu0 %v5854_v59  ;;  %4362 = vmatprep.mubr.msk.f32.mxu1 %vm411_vm0, %v5624_v37  ;;  %v5115_v59 = vld [vmem:[#allocation2 + $0x10] sm:$0x3] }
  0x99   : > { %4615 = vmatprep.mubr.msk.f32.mxu0 %vm411_vm0, %v5423_v62  ;;  %4833 = vmatprep.subr.bf16.mxu0 %v4832_v47  ;;  %v1271_v62 = vrot.slane %v5113_v52, 2  ;;  %v1274_v43 = vrot.slane %v5115_v59, 2  ;;  %v6800_v59 = vld [vmem:[#allocation3_spill] sm:$0xff] }
  0x9b   : > { %4363 = vmatmul.mubr.msk.f32.gmra.mrb[20].mxu1 %vm411_vm0, %v5630_v39  ;;  %4616 = vmatmul.mubr.msk.f32.gmra.mrb[2].mxu0 %vm411_vm0, %v5430_v1  ;;  %v5114_v1 = vld [vmem:[#allocation2 + $0x8] sm:$0xff] }
  0x9c   : > { %4365 = vmatprep.mubr.msk.f32.mxu1 %vm411_vm0, %v5665_v61  ;;  %4618 = vmatprep.mubr.msk.f32.mxu0 %vm411_vm0, %v5440_v7  ;;  %v1272_v7 = vrot.slane %v5114_v1, 2  ;;  %v6798_v1 = vld [vmem:[#allocation23_spill] sm:$0xff] }
  0x9d   : > { %4835 = vmatpush3.bf16.msra.mxu0 %v4832_v47  ;;  %v3727_v47 = vld [vmem:[%s6675_s3 + $0x78] sm:$0xff] }
  0x9e   : > { %4837 = vmatprep.subr.bf16.mxu0 %v6099_v51  ;;  %v1273_v3 = vsel %vm1270_vm3, %v1271_v62, %v1272_v7  ;;  %v1275_v46 = vsel %vm1270_vm3, %v1272_v7, %v1274_v43  ;;  %v4800_v52 = vpack.c.bf16 %v3727_v47, %v3726_v28  ;;  %v6797_v62 = vld [vmem:[#allocation20_spill] sm:$0xff]  ;;  %v6799_v7 = vld [vmem:[#allocation26_spill] sm:$0xff]  ;;  %v6801_v43 = vld [vmem:[#allocation27_spill] sm:$0xff] }
  0x9f   : > { %4366 = vmatmul.mubr.msk.f32.gmra.mrb[22].mxu1 %vm411_vm0, %v5667_v10  ;;  %4619 = vmatmul.mubr.msk.f32.gmra.mrb[4].mxu0 %vm411_vm0, %v5457_v15  ;;  %v6804_v28 = vld [vmem:[#allocation34_spill] sm:$0xff]  ;;  %v6805_v47 = vld [vmem:[#allocation35_spill] sm:$0xff] }
  0xa0   : > { %4368 = vmatprep.mubr.msk.f32.mxu1 %vm411_vm0, %v5712_v34  ;;  %4621 = vmatprep.mubr.msk.f32.mxu0 %vm411_vm0, %v5471_v24 }
  0xa3   : > { %4369 = vmatmul.mubr.msk.f32.gmra.mrb[24].mxu1 %vm411_vm0, %v5714_v31  ;;  %4622 = vmatmul.mubr.msk.f32.gmra.mrb[6].mxu0 %vm411_vm0, %v5473_v25 }
  0xa4   : > { %4371 = vmatprep.mubr.msk.f32.mxu1 %vm411_vm0, %v5746_v2  ;;  %4624 = vmatprep.mubr.msk.f32.mxu0 %vm411_vm0, %v5499_v38 }
  0xa7   : > { %4372 = vmatmul.mubr.msk.f32.gmra.mrb[26].mxu1 %vm411_vm0, %v5748_v5  ;;  %4625 = vmatmul.mubr.msk.f32.gmra.mrb[8].mxu0 %vm411_vm0, %v5502_v40 }
  0xa8   : > { %4374 = vmatprep.mubr.msk.f32.mxu1 %vm411_vm0, %v5779_v20  ;;  %4627 = vmatprep.mubr.msk.f32.mxu0 %vm411_vm0, %v6792_v4 }
  0xab   : > { %4375 = vmatmul.mubr.msk.f32.gmra.mrb[28].mxu1 %vm411_vm0, %v5781_v0  ;;  %4628 = vmatmul.mubr.msk.f32.gmra.mrb[10].mxu0 %vm411_vm0, %v6795_v11 }
  0xac   : > { %4377 = vmatprep.mubr.msk.f32.mxu1 %vm411_vm0, %v5820_v22  ;;  %4630 = vmatprep.mubr.msk.f32.mxu0 %vm411_vm0, %v5559_v16 }
  0xaf   : > { %4378 = vmatmul.mubr.msk.f32.gmra.mrb[30].mxu1 %vm411_vm0, %v5822_v63  ;;  %4631 = vmatmul.mubr.msk.f32.gmra.mrb[12].mxu0 %vm411_vm0, %v5561_v21 }
  0xb0   : > { %4388 = vmatprep.mubr.msk.f32.mxu1 %vm411_vm0, %v1273_v3  ;;  %4633 = vmatprep.mubr.msk.f32.mxu0 %vm411_vm0, %v5588_v55  ;;  %v6803_v3 = vld [vmem:[#allocation31_spill] sm:$0xff] }
  0xb3   : > { %4389 = vmatmul.mubr.msk.f32.vlgmr.msra.gmra.mrb[0].mxu1 %vm411_vm0, %v1275_v46  ;;  %4634 = vmatmul.mubr.msk.f32.gmra.mrb[14].mxu0 %vm411_vm0, %v5590_v57  ;;  %v6806_v46 = vld [vmem:[#allocation38_spill] sm:$0xff] }
  0xb4   : > { %4391 = vmatprep.mubr.msk.f32.mxu1 %vm411_vm0, %v6797_v62  ;;  %4636 = vmatprep.mubr.msk.f32.mxu0 %vm411_vm0, %v5624_v37  ;;  %v6224_v62 = vld [vmem:[#allocation2 + $0x1a0] sm:$0xff] }
  0xb5   : > { %4799 = vmatpush3.bf16.msra.mxu1 %v5950_v44  ;;  %v6802_v44 = vld [vmem:[#allocation29_spill] sm:$0xff] }
  0xb6   : > { %4801 = vmatprep.subr.bf16.mxu1 %v4800_v52 }
  0xb7   : > { %4392 = vmatmul.mubr.msk.f32.gmra.mrb[2].mxu1 %vm411_vm0, %v6798_v1  ;;  %4637 = vmatmul.mubr.msk.f32.gmra.mrb[16].mxu0 %vm411_vm0, %v5630_v39  ;;  %v3906_v1 = vld [vmem:[%s6675_s3 + $0x110] sm:$0xff] }
  0xb8   : > { %4394 = vmatprep.mubr.msk.f32.mxu1 %vm411_vm0, %v6799_v7  ;;  %4639 = vmatprep.mubr.msk.f32.mxu0 %vm411_vm0, %v5665_v61 }
  0xb9   : > { %4803 = vmatpush3.bf16.msra.mxu1 %v4800_v52  ;;  %v6214_v52 = vld [vmem:[#allocation2 + $0x198] sm:$0xff] }
  0xba   : > { %4844 = vmatprep.subr.bf16.mxu1 %v6800_v59 }
  0xbb   : > { %4395 = vmatmul.mubr.msk.f32.gmra.mrb[4].mxu1 %vm411_vm0, %v6801_v43  ;;  %4640 = vmatmul.mubr.msk.f32.gmra.mrb[18].mxu0 %vm411_vm0, %v5667_v10 }
  0xbc   : > { %4397 = vmatprep.mubr.msk.f32.mxu1 %vm411_vm0, %v6802_v44  ;;  %4642 = vmatprep.mubr.msk.f32.mxu0 %vm411_vm0, %v5712_v34 }
  0xbf   : > { %4398 = vmatmul.mubr.msk.f32.gmra.mrb[6].mxu1 %vm411_vm0, %v6803_v3  ;;  %4643 = vmatmul.mubr.msk.f32.gmra.mrb[20].mxu0 %vm411_vm0, %v5714_v31 }
  0xc0   : > { %4400 = vmatprep.mubr.msk.f32.mxu1 %vm411_vm0, %v6804_v28  ;;  %4645 = vmatprep.mubr.msk.f32.mxu0 %vm411_vm0, %v5746_v2 }
  0xc3   : > { %4401 = vmatmul.mubr.msk.f32.gmra.mrb[8].mxu1 %vm411_vm0, %v6805_v47  ;;  %4646 = vmatmul.mubr.msk.f32.gmra.mrb[22].mxu0 %vm411_vm0, %v5748_v5 }
  0xc4   : > { %4403 = vmatprep.mubr.msk.f32.mxu1 %vm411_vm0, %v6806_v46  ;;  %4648 = vmatprep.mubr.msk.f32.mxu0 %vm411_vm0, %v5779_v20 }
  0xc7   : > { %4404 = vmatmul.mubr.msk.f32.gmra.mrb[10].mxu1 %vm411_vm0, %v5817_v35  ;;  %4649 = vmatmul.mubr.msk.f32.gmra.mrb[24].mxu0 %vm411_vm0, %v5781_v0 }
  0xc8   : > { %4406 = vmatprep.mubr.msk.f32.mxu1 %vm411_vm0, %v5833_v18  ;;  %4651 = vmatprep.mubr.msk.f32.mxu0 %vm411_vm0, %v5820_v22 }
  0xcb   : > { %4407 = vmatmul.mubr.msk.f32.gmra.mrb[12].mxu1 %vm411_vm0, %v5869_v13  ;;  %4652 = vmatmul.mubr.msk.f32.gmra.mrb[26].mxu0 %vm411_vm0, %v5822_v63  ;;  %v6808_v63 = vld [vmem:[#allocation6_spill] sm:$0xff] }
  0xcc   : > { %4409 = vmatprep.mubr.msk.f32.mxu1 %vm411_vm0, %v5878_v33  ;;  %4654 = vmatprep.mubr.msk.f32.mxu0 %vm411_vm0, %v6021_v9 }
  0xcf   : > { %4410 = vmatmul.mubr.msk.f32.gmra.mrb[14].mxu1 %vm411_vm0, %v5895_v54  ;;  %4655 = vmatmul.mubr.msk.f32.gmra.mrb[28].mxu0 %vm411_vm0, %v6023_v42  ;;  %v4840_v54 = vpack.c.bf16 %v3907_v27, %v3906_v1  ;;  %v6811_v27 = vld [vmem:[#allocation9_spill] sm:$0xff]  ;;  %v6816_v1 = vld [vmem:[#allocation16_spill] sm:$0xff] }
  0xd0   : > { %4412 = vmatprep.mubr.msk.f32.mxu1 %vm411_vm0, %v5899_v14  ;;  %4657 = vmatprep.mubr.msk.f32.mxu0 %vm411_vm0, %v6214_v52  ;;  %v6807_v14 = vld [vmem:[#allocation5_spill] sm:$0xff] }
  0xd3   : > { %4413 = vmatmul.mubr.msk.f32.gmra.mrb[16].mxu1 %vm411_vm0, %v5918_v36  ;;  %4658 = vmatmul.mubr.msk.f32.gmra.mrb[30].mxu0 %vm411_vm0, %v6224_v62  ;;  %v6809_v36 = vld [vmem:[#allocation7_spill] sm:$0xff] }
  0xd4   : > { %4415 = vmatprep.mubr.msk.f32.mxu1 %vm411_vm0, %v5922_v58  ;;  %4668 = vmatprep.mubr.msk.f32.mxu0 %vm411_vm0, %v6807_v14  ;;  %v6810_v14 = vld [vmem:[#allocation8_spill] sm:$0xff] }
  0xd7   : > { %4416 = vmatmul.mubr.msk.f32.gmra.mrb[18].mxu1 %vm411_vm0, %v5941_v49  ;;  %4669 = vmatmul.mubr.msk.f32.vlgmr.msra.gmra.mrb[0].mxu0 %vm411_vm0, %v6808_v63  ;;  %v6812_v63 = vld [vmem:[#allocation10_spill] sm:$0xff] }
  0xd8   : > { %4839 = vmatpush3.bf16.msra.mxu0 %v6099_v51  ;;  %4418 = vmatprep.mubr.msk.f32.mxu1 %vm411_vm0, %v5946_v29  ;;  %v6814_v51 = vld [vmem:[#allocation14_spill] sm:$0xff] }
  0xd9   : > { %4671 = vmatprep.mubr.msk.f32.mxu0 %vm411_vm0, %v6809_v36  ;;  %4841 = vmatprep.subr.bf16.mxu0 %v4840_v54  ;;  %v6813_v36 = vld [vmem:[#allocation11_spill] sm:$0xff] }
  0xdb   : > { %4419 = vmatmul.mubr.msk.f32.gmra.mrb[20].mxu1 %vm411_vm0, %v5961_v41  ;;  %4672 = vmatmul.mubr.msk.f32.gmra.mrb[2].mxu0 %vm411_vm0, %v6810_v14  ;;  %v6817_v14 = vld [vmem:[#allocation17_spill] sm:$0xff] }
  0xdc   : > { %4421 = vmatprep.mubr.msk.f32.mxu1 %vm411_vm0, %v5965_v32  ;;  %4674 = vmatprep.mubr.msk.f32.mxu0 %vm411_vm0, %v6811_v27  ;;  %v6818_v27 = vld [vmem:[#allocation18_spill] sm:$0xff] }
  0xdd   : > { %4843 = vmatpush3.bf16.msra.mxu0 %v4840_v54  ;;  %v6815_v54 = vld [vmem:[#allocation15_spill] sm:$0xff] }
  0xdf   : > { %4422 = vmatmul.mubr.msk.f32.gmra.mrb[22].mxu1 %vm411_vm0, %v5979_v50  ;;  %4675 = vmatmul.mubr.msk.f32.gmra.mrb[4].mxu0 %vm411_vm0, %v6812_v63  ;;  %v6819_v63 = vld [vmem:[#allocation19_spill] sm:$0xff] }
  0xe0   : > { %4424 = vmatprep.mubr.msk.f32.mxu1 %vm411_vm0, %v5983_v45  ;;  %4677 = vmatprep.mubr.msk.f32.mxu0 %vm411_vm0, %v6813_v36  ;;  %v6820_v36 = vld [vmem:[#allocation21_spill] sm:$0xff] }
  0xe3   : > { %4425 = vmatmul.mubr.msk.f32.gmra.mrb[24].mxu1 %vm411_vm0, %v5996_v12  ;;  %4678 = vmatmul.mubr.msk.f32.gmra.mrb[6].mxu0 %vm411_vm0, %v6814_v51  ;;  %v5116_v51 = vld [vmem:[#allocation2 + $0x18] sm:$0xff] }
  0xe4   : > { %4427 = vmatprep.mubr.msk.f32.mxu1 %vm411_vm0, %v6000_v48  ;;  %4680 = vmatprep.mubr.msk.f32.mxu0 %vm411_vm0, %v6815_v54  ;;  %v6821_v54 = vld [vmem:[#allocation22_spill] sm:$0xff] }
  0xe7   : > { %4428 = vmatmul.mubr.msk.f32.gmra.mrb[26].mxu1 %vm411_vm0, %v6013_v23  ;;  %4681 = vmatmul.mubr.msk.f32.gmra.mrb[8].mxu0 %vm411_vm0, %v6816_v1  ;;  %v5117_v1 = vld [vmem:[#allocation2 + $0x20] sm:$0xff] }
  0xe8   : > { %4430 = vmatprep.mubr.msk.f32.mxu1 %vm411_vm0, %v6017_v6  ;;  %4683 = vmatprep.mubr.msk.f32.mxu0 %vm411_vm0, %v6817_v14  ;;  %v6822_v14 = vld [vmem:[#allocation24_spill] sm:$0xff]  ;;  %v6349_v6 = vld [vmem:[#allocation2 + $0x1a8] sm:$0x3] }
  0xeb   : > { %4431 = vmatmul.mubr.msk.f32.gmra.mrb[28].mxu1 %vm411_vm0, %v6034_v56  ;;  %4684 = vmatmul.mubr.msk.f32.gmra.mrb[10].mxu0 %vm411_vm0, %v6818_v27  ;;  %v5118_v27 = vld [vmem:[#allocation2 + $0x30] sm:$0xff]  ;;  %v5122_v56 = vld [vmem:[#allocation2 + $0x60] sm:$0xff] }
  0xec   : > { %4433 = vmatprep.mubr.msk.f32.mxu1 %vm411_vm0, %v6038_v53  ;;  %4686 = vmatprep.mubr.msk.f32.mxu0 %vm411_vm0, %v6819_v63  ;;  %v6823_v63 = vld [vmem:[#allocation25_spill] sm:$0xff]  ;;  %v6826_v53 = vld [vmem:[#allocation30_spill] sm:$0xff] }
  0xef   : > { %4434 = vmatmul.mubr.msk.f32.gmra.mrb[30].mxu1 %vm411_vm0, %v6053_v60  ;;  %4687 = vmatmul.mubr.msk.f32.gmra.mrb[12].mxu0 %vm411_vm0, %v6820_v36  ;;  %v6824_v36 = vld [vmem:[#allocation4_spill] sm:$0xff] }
  0xf0   : > { %4444 = vmatprep.mubr.msk.f32.mxu1 %vm411_vm0, %v5116_v51  ;;  %4689 = vmatprep.mubr.msk.f32.mxu0 %vm411_vm0, %v6821_v54  ;;  %v5119_v51 = vld [vmem:[#allocation2 + $0x38] sm:$0xff] }
  0xf1   : > { %v6825_v60 = vld [vmem:[#allocation28_spill] sm:$0xff] }
  0xf3   : > { %4445 = vmatmul.mubr.msk.f32.vlgmr.msra.gmra.mrb[0].mxu1 %vm411_vm0, %v5117_v1  ;;  %4690 = vmatmul.mubr.msk.f32.gmra.mrb[14].mxu0 %vm411_vm0, %v6822_v14  ;;  %v5120_v1 = vld [vmem:[#allocation2 + $0x48] sm:$0xff] }
  0xf4   : > { %4447 = vmatprep.mubr.msk.f32.mxu1 %vm411_vm0, %v5118_v27  ;;  %4692 = vmatprep.mubr.msk.f32.mxu0 %vm411_vm0, %v6823_v63  ;;  %v5121_v27 = vld [vmem:[#allocation2 + $0x50] sm:$0xff] }
  0xf5   : > { %4846 = vmatpush3.bf16.msra.mxu1 %v6800_v59  ;;  %v6827_v59 = vld [vmem:[#allocation32_spill] sm:$0xff] }
  0xf6   : > { %4845 = vmatprep.subr.bf16.mxu1 %v6824_v36 }
  0xf7   : > { %4448 = vmatmul.mubr.msk.f32.gmra.mrb[2].mxu1 %vm411_vm0, %v5119_v51  ;;  %4693 = vmatmul.mubr.msk.f32.gmra.mrb[16].mxu0 %vm411_vm0, %v6825_v60  ;;  %v6828_v51 = vld [vmem:[#allocation33_spill] sm:$0xff] }
  0xf8   : > { %4450 = vmatprep.mubr.msk.f32.mxu1 %vm411_vm0, %v5120_v1  ;;  %4695 = vmatprep.mubr.msk.f32.mxu0 %vm411_vm0, %v6826_v53  ;;  %v6829_v1 = vld [vmem:[#allocation36_spill] sm:$0xff] }
  0xf9   : > { %4847 = vmatpush3.bf16.msra.mxu1 %v6824_v36  ;;  %v6830_v36 = vld [vmem:[#allocation37_spill] sm:$0xff] }
  0xfb   : > { %4451 = vmatmul.mubr.msk.f32.gmra.mrb[4].mxu1 %vm411_vm0, %v5121_v27  ;;  %4696 = vmatmul.mubr.msk.f32.gmra.mrb[18].mxu0 %vm411_vm0, %v6827_v59 }
  0xfc   : > { %4453 = vmatprep.mubr.msk.f32.mxu1 %vm411_vm0, %v5122_v56  ;;  %4698 = vmatprep.mubr.msk.f32.mxu0 %vm411_vm0, %v6828_v51  ;;  %v1947_v56 = vrot.slane %v6023_v42, 1 }
  0xff   : > { %4454 = vmatmul.mubr.msk.f32.gmra.mrb[6].mxu1 %vm411_vm0, %v5457_v15  ;;  %4699 = vmatmul.mubr.msk.f32.gmra.mrb[20].mxu0 %vm411_vm0, %v6829_v1  ;;  %v1946_v15 = vrot.slane %v6021_v9, 1 }
 0x100   : > { %4456 = vmatprep.mubr.msk.f32.mxu1 %vm411_vm0, %v5471_v24  ;;  %4701 = vmatprep.mubr.msk.f32.mxu0 %vm411_vm0, %v6830_v36  ;;  %v1949_v24 = vrot.slane %v6042_v26, 1  ;;  %v2760_v26 = vrot.slane %v6349_v6, 1 }
 0x101   : > { %v6347_v27 = vsel %vm606_vm2, %v1946_v15, %v1947_v56 }
 0x103   : > { %4457 = vmatmul.mubr.msk.f32.gmra.mrb[8].mxu1 %vm411_vm0, %v5473_v25  ;;  %4702 = vmatmul.mubr.msk.f32.gmra.mrb[22].mxu0 %vm411_vm0, %v5843_v8  ;;  %v2757_v25 = vrot.slane %v6214_v52, 1 }
 0x104   : > { %4459 = vmatprep.mubr.msk.f32.mxu1 %vm411_vm0, %v5499_v38  ;;  %4704 = vmatprep.mubr.msk.f32.mxu0 %vm411_vm0, %v5846_v17  ;;  %v2758_v38 = vrot.slane %v6224_v62, 1 }
 0x106   : > { %v2759_v15 = vsel %vm606_vm2, %v2757_v25, %v2758_v38 }
 0x107   : > { %4460 = vmatmul.mubr.msk.f32.gmra.mrb[10].mxu1 %vm411_vm0, %v5502_v40  ;;  %4705 = vmatmul.mubr.msk.f32.gmra.mrb[24].mxu0 %vm411_vm0, %v5866_v19  ;;  %v6831_v40 = vld [vmem:[#allocation40_spill] sm:$0xff] }
 0x108   : > { %4462 = vmatprep.mubr.msk.f32.mxu1 %vm411_vm0, %v6792_v4  ;;  %4707 = vmatprep.mubr.msk.f32.mxu0 %vm411_vm0, %v5875_v30  ;;  %v6360_v4 = vsel %vm606_vm2, %v1947_v56, %v1949_v24 }
 0x10b   : > { %4463 = vmatmul.mubr.msk.f32.gmra.mrb[12].mxu1 %vm411_vm0, %v6795_v11  ;;  %4708 = vmatmul.mubr.msk.f32.gmra.mrb[26].mxu0 %vm411_vm0, %v6831_v40 }
 0x10c   : > { %4465 = vmatprep.mubr.msk.f32.mxu1 %vm411_vm0, %v5559_v16  ;;  %4710 = vmatprep.mubr.msk.f32.mxu0 %vm411_vm0, %v6347_v27  ;;  %v2761_v16 = vsel %vm606_vm2, %v2758_v38, %v2760_v26 }
 0x10f   : > { %4466 = vmatmul.mubr.msk.f32.gmra.mrb[14].mxu1 %vm411_vm0, %v5561_v21  ;;  %4711 = vmatmul.mubr.msk.f32.gmra.mrb[28].mxu0 %vm411_vm0, %v6360_v4  ;;  %v6836_v21 = vld [vmem:[#allocation44_spill] sm:$0xff] }
 0x110   : > { %4468 = vmatprep.mubr.msk.f32.mxu1 %vm411_vm0, %v5588_v55  ;;  %4713 = vmatprep.mubr.msk.f32.mxu0 %vm411_vm0, %v2759_v15  ;;  %v6838_v55 = vld [vmem:[#allocation46_spill] sm:$0xff] }
 0x113   : > { %4469 = vmatmul.mubr.msk.f32.gmra.mrb[16].mxu1 %vm411_vm0, %v5590_v57  ;;  %4714 = vmatmul.mubr.msk.f32.gmra.mrb[30].mxu0 %vm411_vm0, %v2761_v16  ;;  %v3028_v57 = vrot.slane %v6214_v52, 2 }
 0x114   : > { %4471 = vmatprep.mubr.msk.f32.mxu1 %vm411_vm0, %v5624_v37  ;;  %4724 = vmatprep.mubr.msk.f32.mxu0 %vm411_vm0, %v6799_v7  ;;  %v3029_v37 = vrot.slane %v6224_v62, 2 }
 0x117   : > { %4472 = vmatmul.mubr.msk.f32.gmra.mrb[18].mxu1 %vm411_vm0, %v5630_v39  ;;  %4725 = vmatmul.mubr.msk.f32.vlgmr.msra.gmra.mrb[0].mxu0 %vm411_vm0, %v6801_v43  ;;  %v6837_v39 = vld [vmem:[#allocation45_spill] sm:$0xff] }
 0x118   : > { %4474 = vmatprep.mubr.msk.f32.mxu1 %vm411_vm0, %v5665_v61  ;;  %4727 = vmatprep.mubr.msk.f32.mxu0 %vm411_vm0, %v6802_v44  ;;  %v6834_v61 = vld [vmem:[#allocation42_spill] sm:$0xff] }
 0x11b   : > { %4475 = vmatmul.mubr.msk.f32.gmra.mrb[20].mxu1 %vm411_vm0, %v5667_v10  ;;  %4728 = vmatmul.mubr.msk.f32.gmra.mrb[2].mxu0 %vm411_vm0, %v6803_v3  ;;  %v6839_v10 = vld [vmem:[#allocation12_spill] sm:$0xff] }
 0x11c   : > { %4477 = vmatprep.mubr.msk.f32.mxu1 %vm411_vm0, %v5712_v34  ;;  %4730 = vmatprep.mubr.msk.f32.mxu0 %vm411_vm0, %v6804_v28  ;;  %v6833_v34 = vld [vmem:[#allocation41_spill] sm:$0xff] }
 0x11f   : > { %4478 = vmatmul.mubr.msk.f32.gmra.mrb[22].mxu1 %vm411_vm0, %v5714_v31  ;;  %4731 = vmatmul.mubr.msk.f32.gmra.mrb[4].mxu0 %vm411_vm0, %v6805_v47  ;;  %v6832_v31 = vld [vmem:[#allocation39_spill] sm:$0xff] }
 0x120   : > { %4480 = vmatprep.mubr.msk.f32.mxu1 %vm411_vm0, %v5746_v2  ;;  %4733 = vmatprep.mubr.msk.f32.mxu0 %vm411_vm0, %v6806_v46  ;;  %v6840_v2 = vld [vmem:[#allocation47_spill] sm:$0xff] }
 0x123   : > { %4481 = vmatmul.mubr.msk.f32.gmra.mrb[24].mxu1 %vm411_vm0, %v5748_v5  ;;  %4734 = vmatmul.mubr.msk.f32.gmra.mrb[6].mxu0 %vm411_vm0, %v5817_v35  ;;  %v3031_v5 = vrot.slane %v6349_v6, 2 }
 0x124   : > { %4483 = vmatprep.mubr.msk.f32.mxu1 %vm411_vm0, %v5779_v20  ;;  %4736 = vmatprep.mubr.msk.f32.mxu0 %vm411_vm0, %v5833_v18  ;;  %v6841_v20 = vld [vmem:[#allocation13_spill] sm:$0xff] }
 0x125   : > { %v3032_v35 = vsel %vm1270_vm3, %v3029_v37, %v3031_v5 }
 0x127   : > { %4484 = vmatmul.mubr.msk.f32.gmra.mrb[26].mxu1 %vm411_vm0, %v5781_v0  ;;  %4737 = vmatmul.mubr.msk.f32.gmra.mrb[8].mxu0 %vm411_vm0, %v5869_v13  ;;  %v6835_v0 = vld [vmem:[#allocation43_spill] sm:$0xff] }
 0x128   : > { %4486 = vmatprep.mubr.msk.f32.mxu1 %vm411_vm0, %v5820_v22  ;;  %4739 = vmatprep.mubr.msk.f32.mxu0 %vm411_vm0, %v5878_v33  ;;  %v3030_v22 = vsel %vm1270_vm3, %v3028_v57, %v3029_v37 }
 0x12b   : > { %4487 = vmatmul.mubr.msk.f32.gmra.mrb[28].mxu1 %vm411_vm0, %v6832_v31  ;;  %4740 = vmatmul.mubr.msk.f32.gmra.mrb[10].mxu0 %vm411_vm0, %v6833_v34 }
 0x12c   : > { %4489 = vmatprep.mubr.msk.f32.mxu1 %vm411_vm0, %v6021_v9  ;;  %4742 = vmatprep.mubr.msk.f32.mxu0 %vm411_vm0, %v6834_v61 }
 0x12f   : > { %4490 = vmatmul.mubr.msk.f32.gmra.mrb[30].mxu1 %vm411_vm0, %v6023_v42  ;;  %4743 = vmatmul.mubr.msk.f32.gmra.mrb[12].mxu0 %vm411_vm0, %v6835_v0 }
 0x130   : > { %4524 = vmatprep.mubr.msk.f32.mxu1 %vm411_vm0, %v6821_v54  ;;  %4745 = vmatprep.mubr.msk.f32.mxu0 %vm411_vm0, %v5922_v58 }
 0x133   : > { %4525 = vmatmul.mubr.msk.f32.vlgmr.msra.gmra.mrb[16].mxu1 %vm411_vm0, %v6822_v14  ;;  %4746 = vmatmul.mubr.msk.f32.gmra.mrb[14].mxu0 %vm411_vm0, %v5941_v49 }
 0x134   : > { %4527 = vmatprep.mubr.msk.f32.mxu1 %vm411_vm0, %v6823_v63  ;;  %4748 = vmatprep.mubr.msk.f32.mxu0 %vm411_vm0, %v5946_v29 }
 0x137   : > { %4528 = vmatmul.mubr.msk.f32.gmra.mrb[18].mxu1 %vm411_vm0, %v6825_v60  ;;  %4749 = vmatmul.mubr.msk.f32.gmra.mrb[16].mxu0 %vm411_vm0, %v5961_v41 }
 0x138   : > { %4530 = vmatprep.mubr.msk.f32.mxu1 %vm411_vm0, %v6826_v53  ;;  %4751 = vmatprep.mubr.msk.f32.mxu0 %vm411_vm0, %v5965_v32 }
 0x13b   : > { %4531 = vmatmul.mubr.msk.f32.gmra.mrb[20].mxu1 %vm411_vm0, %v6827_v59  ;;  %4752 = vmatmul.mubr.msk.f32.gmra.mrb[18].mxu0 %vm411_vm0, %v5979_v50 }
 0x13c   : > { %4533 = vmatprep.mubr.msk.f32.mxu1 %vm411_vm0, %v6828_v51  ;;  %4754 = vmatprep.mubr.msk.f32.mxu0 %vm411_vm0, %v5983_v45 }
 0x13f   : > { %4534 = vmatmul.mubr.msk.f32.gmra.mrb[22].mxu1 %vm411_vm0, %v6829_v1  ;;  %4755 = vmatmul.mubr.msk.f32.gmra.mrb[20].mxu0 %vm411_vm0, %v5996_v12 }
 0x140   : > { %4536 = vmatprep.mubr.msk.f32.mxu1 %vm411_vm0, %v6830_v36  ;;  %4757 = vmatprep.mubr.msk.f32.mxu0 %vm411_vm0, %v6000_v48 }
 0x143   : > { %4537 = vmatmul.mubr.msk.f32.gmra.mrb[24].mxu1 %vm411_vm0, %v5843_v8  ;;  %4758 = vmatmul.mubr.msk.f32.gmra.mrb[22].mxu0 %vm411_vm0, %v6013_v23 }
 0x144   : > { %4539 = vmatprep.mubr.msk.f32.mxu1 %vm411_vm0, %v5846_v17  ;;  %4760 = vmatprep.mubr.msk.f32.mxu0 %vm411_vm0, %v6836_v21 }
 0x147   : > { %4540 = vmatmul.mubr.msk.f32.gmra.mrb[26].mxu1 %vm411_vm0, %v5866_v19  ;;  %4761 = vmatmul.mubr.msk.f32.gmra.mrb[24].mxu0 %vm411_vm0, %v6837_v39 }
 0x148   : > { %4542 = vmatprep.mubr.msk.f32.mxu1 %vm411_vm0, %v5875_v30  ;;  %4763 = vmatprep.mubr.msk.f32.mxu0 %vm411_vm0, %v6838_v55 }
 0x14b   : > { %4543 = vmatmul.mubr.msk.f32.gmra.mrb[28].mxu1 %vm411_vm0, %v6831_v40  ;;  %4764 = vmatmul.mubr.msk.f32.gmra.mrb[26].mxu0 %vm411_vm0, %v6839_v10 }
 0x14c   : > { %4545 = vmatprep.mubr.msk.f32.mxu1 %vm411_vm0, %v6347_v27  ;;  %4766 = vmatprep.mubr.msk.f32.mxu0 %vm411_vm0, %v6840_v2 }
 0x14f   : > { %4546 = vmatmul.mubr.msk.f32.gmra.mrb[30].mxu1 %vm411_vm0, %v6360_v4  ;;  %4767 = vmatmul.mubr.msk.f32.gmra.mrb[28].mxu0 %vm411_vm0, %v6841_v20 }
 0x150   : > { %4769 = vmatprep.mubr.msk.f32.mxu0 %vm411_vm0, %v3030_v22 }
 0x153   : > { %4770 = vmatmul.mubr.msk.f32.gmra.mrb[30].mxu0 %vm411_vm0, %v3032_v35 }
 0x1c6   : > { %v4446_v18 = vpop.f32.mrb[0].mxu1 }
 0x1c7   : > { %v1754_v8 = vpop.f32.mrb[1].mxu1 }
 0x1ca   : > { %v4449_v17 = vpop.f32.mrb[2].mxu1 }
 0x1cb   : > { %v1764_v19 = vpop.f32.mrb[3].mxu1 }
 0x1ce   : > { %v4452_v13 = vpop.f32.mrb[4].mxu1 }
 0x1cf   : > { %v1774_v30 = vpop.f32.mrb[5].mxu1 }
 0x1d2   : > { %v4455_v33 = vpop.f32.mrb[6].mxu1 }
 0x1d3   : > { %v1784_v58 = vpop.f32.mrb[7].mxu1 }
 0x1d6   : > { %v6502_v49 = vpop.f32.mrb[8].mxu1 }
 0x1d7   : > { %v6504_v29 = vpop.f32.mrb[9].mxu1 }
 0x1da   : > { %v6506_v41 = vpop.f32.mrb[10].mxu1 }
 0x1db   : > { %v6508_v32 = vpop.f32.mrb[11].mxu1 }
 0x1de   : > { %v6510_v50 = vpop.f32.mrb[12].mxu1 }
 0x1df   : > { %v6512_v45 = vpop.f32.mrb[13].mxu1 }
 0x1e2   : > { %v6514_v12 = vpop.f32.mrb[14].mxu1 }
 0x1e3   : > { %v6516_v48 = vpop.f32.mrb[15].mxu1 }
 0x1ea   : > { %v4726_v23 = vpop.f32.mrb[0].mxu0 }
 0x1eb   : > { %v4848_v6 = vadd.f32 %v4726_v23, %v4446_v18  ;;  %v3108_v9 = vpop.f32.mrb[1].mxu0 }
 0x1ec   : > { %v4849_v42 = vadd.f32 %v3108_v9, %v1754_v8 }
 0x1ed   : > { %3300 = vst.msk [vmem:[%s6523_s18 + $0x8] sm:$0xff] %vm411_vm0, %v4848_v6  ;;  %v3332_v53 = vsel %vm411_vm0, %v4848_v6, 0.0  ;;  %v3403_v60 = vmul.f32 %v4848_v6, %v4848_v6 }
 0x1ee   : > { %3299 = vst.msk [vmem:[%s6523_s18] sm:$0xff] %vm411_vm0, %v4849_v42  ;;  %v3331_v11 = vsel %vm411_vm0, %v4849_v42, 0.0  ;;  %v3402_v7 = vmul.f32 %v4849_v42, %v4849_v42  ;;  %v4729_v43 = vpop.f32.mrb[2].mxu0 }
 0x1ef   : > { %v3435_v44 = vsel %vm411_vm0, %v3403_v60, 0.0  ;;  %v3333_v3 = vadd.f32 %v3332_v53, %v3331_v11  ;;  %v4850_v28 = vadd.f32 %v4729_v43, %v4449_v17  ;;  %v3118_v47 = vpop.f32.mrb[3].mxu0 }
 0x1f0   : > { %v3434_v46 = vsel %vm411_vm0, %v3402_v7, 0.0  ;;  %v4851_v52 = vadd.f32 %v3118_v47, %v1764_v19 }
 0x1f1   : > { %v3436_v62 = vadd.f32 %v3435_v44, %v3434_v46  ;;  %3302 = vst.msk [vmem:[%s6523_s18 + $0x18] sm:$0xff] %vm411_vm0, %v4850_v28  ;;  %v3405_v54 = vmul.f32 %v4850_v28, %v4850_v28  ;;  %v3336_v56 = vsel %vm411_vm0, %v4850_v28, 0.0 }
 0x1f2   : > { %3301 = vst.msk [vmem:[%s6523_s18 + $0x10] sm:$0xff] %vm411_vm0, %v4851_v52  ;;  %v3334_v14 = vsel %vm411_vm0, %v4851_v52, 0.0  ;;  %v3404_v63 = vmul.f32 %v4851_v52, %v4851_v52  ;;  %v4732_v59 = vpop.f32.mrb[4].mxu0 }
 0x1f3   : > { %v3335_v51 = vadd.f32 %v3334_v14, %v3333_v3  ;;  %v4852_v1 = vadd.f32 %v4732_v59, %v4452_v13  ;;  %v3128_v36 = vpop.f32.mrb[5].mxu0  ;;  %v3439_v40 = vsel %vm411_vm0, %v3405_v54, 0.0 }
 0x1f4   : > { %v3437_v24 = vsel %vm411_vm0, %v3404_v63, 0.0  ;;  %v4853_v25 = vadd.f32 %v3128_v36, %v1774_v30 }
 0x1f5   : > { %v3438_v38 = vadd.f32 %v3437_v24, %v3436_v62  ;;  %3304 = vst.msk [vmem:[%s6523_s18 + $0x28] sm:$0xff] %vm411_vm0, %v4852_v1  ;;  %v3337_v27 = vadd.f32 %v3336_v56, %v3335_v51  ;;  %v3407_v4 = vmul.f32 %v4852_v1, %v4852_v1  ;;  %v3340_v21 = vsel %vm411_vm0, %v4852_v1, 0.0 }
 0x1f6   : > { %3303 = vst.msk [vmem:[%s6523_s18 + $0x20] sm:$0xff] %vm411_vm0, %v4853_v25  ;;  %v3338_v26 = vsel %vm411_vm0, %v4853_v25, 0.0  ;;  %v3406_v15 = vmul.f32 %v4853_v25, %v4853_v25  ;;  %v4735_v16 = vpop.f32.mrb[6].mxu0 }
 0x1f7   : > { %v3339_v31 = vadd.f32 %v3338_v26, %v3337_v27  ;;  %v3440_v34 = vadd.f32 %v3439_v40, %v3438_v38  ;;  %v4854_v61 = vadd.f32 %v4735_v16, %v4455_v33  ;;  %v3138_v0 = vpop.f32.mrb[7].mxu0  ;;  %v3443_v10 = vsel %vm411_vm0, %v3407_v4, 0.0 }
 0x1f8   : > { %v3441_v39 = vsel %vm411_vm0, %v3406_v15, 0.0  ;;  %v4855_v55 = vadd.f32 %v3138_v0, %v1784_v58 }
 0x1f9   : > { %v3442_v57 = vadd.f32 %v3441_v39, %v3440_v34  ;;  %3306 = vst.msk [vmem:[%s6523_s18 + $0x38] sm:$0xff] %vm411_vm0, %v4854_v61  ;;  %v3341_v37 = vadd.f32 %v3340_v21, %v3339_v31  ;;  %v3409_v2 = vmul.f32 %v4854_v61, %v4854_v61  ;;  %v3344_v19 = vsel %vm411_vm0, %v4854_v61, 0.0 }
 0x1fa   : > { %3305 = vst.msk [vmem:[%s6523_s18 + $0x30] sm:$0xff] %vm411_vm0, %v4855_v55  ;;  %v3342_v5 = vsel %vm411_vm0, %v4855_v55, 0.0  ;;  %v3408_v22 = vmul.f32 %v4855_v55, %v4855_v55  ;;  %v4738_v20 = vpop.f32.mrb[8].mxu0 }
 0x1fb   : > { %v3343_v35 = vadd.f32 %v3342_v5, %v3341_v37  ;;  %v3444_v18 = vadd.f32 %v3443_v10, %v3442_v57  ;;  %v4856_v8 = vadd.f32 %v4738_v20, %v6502_v49  ;;  %v3148_v17 = vpop.f32.mrb[9].mxu0  ;;  %v3447_v23 = vsel %vm411_vm0, %v3409_v2, 0.0 }
 0x1fc   : > { %v3445_v13 = vsel %vm411_vm0, %v3408_v22, 0.0  ;;  %v4857_v30 = vadd.f32 %v3148_v17, %v6504_v29 }
 0x1fd   : > { %v3446_v33 = vadd.f32 %v3445_v13, %v3444_v18  ;;  %3308 = vst.msk [vmem:[%s6523_s18 + $0x48] sm:$0xff] %vm411_vm0, %v4856_v8  ;;  %v3345_v58 = vadd.f32 %v3344_v19, %v3343_v35  ;;  %v3411_v6 = vmul.f32 %v4856_v8, %v4856_v8  ;;  %v3348_v7 = vsel %vm411_vm0, %v4856_v8, 0.0 }
 0x1fe   : > { %3307 = vst.msk [vmem:[%s6523_s18 + $0x40] sm:$0xff] %vm411_vm0, %v4857_v30  ;;  %v3346_v49 = vsel %vm411_vm0, %v4857_v30, 0.0  ;;  %v3410_v9 = vmul.f32 %v4857_v30, %v4857_v30  ;;  %v4741_v42 = vpop.f32.mrb[10].mxu0 }
 0x1ff   : > { %v3347_v53 = vadd.f32 %v3346_v49, %v3345_v58  ;;  %v3448_v60 = vadd.f32 %v3447_v23, %v3446_v33  ;;  %v4858_v11 = vadd.f32 %v4741_v42, %v6506_v41  ;;  %v3158_v29 = vpop.f32.mrb[11].mxu0  ;;  %v3451_v47 = vsel %vm411_vm0, %v3411_v6, 0.0 }
 0x200   : > { %v3449_v43 = vsel %vm411_vm0, %v3410_v9, 0.0  ;;  %v4859_v44 = vadd.f32 %v3158_v29, %v6508_v32 }
 0x201   : > { %v3450_v3 = vadd.f32 %v3449_v43, %v3448_v60  ;;  %3310 = vst.msk [vmem:[%s6523_s18 + $0x58] sm:$0xff] %vm411_vm0, %v4858_v11  ;;  %v3349_v28 = vadd.f32 %v3348_v7, %v3347_v53  ;;  %v3413_v46 = vmul.f32 %v4858_v11, %v4858_v11  ;;  %v3352_v59 = vsel %vm411_vm0, %v4858_v11, 0.0 }
 0x202   : > { %3309 = vst.msk [vmem:[%s6523_s18 + $0x50] sm:$0xff] %vm411_vm0, %v4859_v44  ;;  %v3350_v41 = vsel %vm411_vm0, %v4859_v44, 0.0  ;;  %v3412_v52 = vmul.f32 %v4859_v44, %v4859_v44  ;;  %v4744_v62 = vpop.f32.mrb[12].mxu0 }
 0x203   : > { %v3351_v54 = vadd.f32 %v3350_v41, %v3349_v28  ;;  %v3452_v14 = vadd.f32 %v3451_v47, %v3450_v3  ;;  %v4860_v63 = vadd.f32 %v4744_v62, %v6510_v50  ;;  %v3168_v32 = vpop.f32.mrb[13].mxu0  ;;  %v3455_v24 = vsel %vm411_vm0, %v3413_v46, 0.0 }
 0x204   : > { %v3453_v51 = vsel %vm411_vm0, %v3412_v52, 0.0  ;;  %v4861_v1 = vadd.f32 %v3168_v32, %v6512_v45 }
 0x205   : > { %v3454_v36 = vadd.f32 %v3453_v51, %v3452_v14  ;;  %3312 = vst.msk [vmem:[%s6523_s18 + $0x68] sm:$0xff] %vm411_vm0, %v4860_v63  ;;  %v3353_v56 = vadd.f32 %v3352_v59, %v3351_v54  ;;  %v3415_v25 = vmul.f32 %v4860_v63, %v4860_v63  ;;  %v3356_v31 = vsel %vm411_vm0, %v4860_v63, 0.0 }
 0x206   : > { %3311 = vst.msk [vmem:[%s6523_s18 + $0x60] sm:$0xff] %vm411_vm0, %v4861_v1  ;;  %v3354_v38 = vsel %vm411_vm0, %v4861_v1, 0.0  ;;  %v3414_v50 = vmul.f32 %v4861_v1, %v4861_v1  ;;  %v4526_v27 = vpop.f32.mrb[16].mxu1  ;;  %v4747_v40 = vpop.f32.mrb[14].mxu0 }
 0x207   : > { %v3355_v4 = vadd.f32 %v3354_v38, %v3353_v56  ;;  %v3456_v26 = vadd.f32 %v3455_v24, %v3454_v36  ;;  %v4862_v45 = vadd.f32 %v4747_v40, %v6514_v12  ;;  %v2106_v15 = vpop.f32.mrb[17].mxu1  ;;  %v3178_v16 = vpop.f32.mrb[15].mxu0  ;;  %v3459_v39 = vsel %vm411_vm0, %v3415_v25, 0.0 }
 0x208   : > { %v3457_v34 = vsel %vm411_vm0, %v3414_v50, 0.0  ;;  %v4863_v61 = vadd.f32 %v3178_v16, %v6516_v48 }
 0x209   : > { %v3458_v0 = vadd.f32 %v3457_v34, %v3456_v26  ;;  %3314 = vst.msk [vmem:[%s6523_s18 + $0x78] sm:$0xff] %vm411_vm0, %v4862_v45  ;;  %v3357_v21 = vadd.f32 %v3356_v31, %v3355_v4  ;;  %v3417_v55 = vmul.f32 %v4862_v45, %v4862_v45  ;;  %v3360_v35 = vsel %vm411_vm0, %v4862_v45, 0.0 }
 0x20a   : > { %3313 = vst.msk [vmem:[%s6523_s18 + $0x70] sm:$0xff] %vm411_vm0, %v4863_v61  ;;  %v3358_v12 = vsel %vm411_vm0, %v4863_v61, 0.0  ;;  %v3416_v57 = vmul.f32 %v4863_v61, %v4863_v61  ;;  %v4529_v37 = vpop.f32.mrb[18].mxu1  ;;  %v4750_v10 = vpop.f32.mrb[16].mxu0 }
 0x20b   : > { %v3359_v2 = vadd.f32 %v3358_v12, %v3357_v21  ;;  %v3460_v5 = vadd.f32 %v3459_v39, %v3458_v0  ;;  %v4864_v22 = vadd.f32 %v4750_v10, %v4526_v27  ;;  %v2116_v48 = vpop.f32.mrb[19].mxu1  ;;  %v3188_v20 = vpop.f32.mrb[17].mxu0  ;;  %v3463_v13 = vsel %vm411_vm0, %v3417_v55, 0.0 }
 0x20c   : > { %v3461_v18 = vsel %vm411_vm0, %v3416_v57, 0.0  ;;  %v4865_v8 = vadd.f32 %v3188_v20, %v2106_v15 }
 0x20d   : > { %v3462_v17 = vadd.f32 %v3461_v18, %v3460_v5  ;;  %3316 = vst.msk [vmem:[%s6523_s18 + $0x88] sm:$0xff] %vm411_vm0, %v4864_v22  ;;  %v3361_v19 = vadd.f32 %v3360_v35, %v3359_v2  ;;  %v3419_v30 = vmul.f32 %v4864_v22, %v4864_v22  ;;  %v3364_v11 = vsel %vm411_vm0, %v4864_v22, 0.0 }
 0x20e   : > { %3315 = vst.msk [vmem:[%s6523_s18 + $0x80] sm:$0xff] %vm411_vm0, %v4865_v8  ;;  %v3362_v33 = vsel %vm411_vm0, %v4865_v8, 0.0  ;;  %v3418_v58 = vmul.f32 %v4865_v8, %v4865_v8  ;;  %v4532_v23 = vpop.f32.mrb[20].mxu1  ;;  %v4753_v6 = vpop.f32.mrb[18].mxu0 }
 0x20f   : > { %v3363_v49 = vadd.f32 %v3362_v33, %v3361_v19  ;;  %v3464_v9 = vadd.f32 %v3463_v13, %v3462_v17  ;;  %v4866_v42 = vadd.f32 %v4753_v6, %v4529_v37  ;;  %v2126_v53 = vpop.f32.mrb[21].mxu1  ;;  %v3198_v60 = vpop.f32.mrb[19].mxu0  ;;  %v3467_v3 = vsel %vm411_vm0, %v3419_v30, 0.0 }
 0x210   : > { %v3465_v29 = vsel %vm411_vm0, %v3418_v58, 0.0  ;;  %v4867_v7 = vadd.f32 %v3198_v60, %v2116_v48 }
 0x211   : > { %v3466_v43 = vadd.f32 %v3465_v29, %v3464_v9  ;;  %3318 = vst.msk [vmem:[%s6523_s18 + $0x98] sm:$0xff] %vm411_vm0, %v4866_v42  ;;  %v3365_v44 = vadd.f32 %v3364_v11, %v3363_v49  ;;  %v3421_v28 = vmul.f32 %v4866_v42, %v4866_v42  ;;  %v3368_v59 = vsel %vm411_vm0, %v4866_v42, 0.0 }
 0x212   : > { %3317 = vst.msk [vmem:[%s6523_s18 + $0x90] sm:$0xff] %vm411_vm0, %v4867_v7  ;;  %v3366_v47 = vsel %vm411_vm0, %v4867_v7, 0.0  ;;  %v3420_v46 = vmul.f32 %v4867_v7, %v4867_v7  ;;  %v4535_v41 = vpop.f32.mrb[22].mxu1  ;;  %v4756_v52 = vpop.f32.mrb[20].mxu0 }
 0x213   : > { %v3367_v62 = vadd.f32 %v3366_v47, %v3365_v44  ;;  %v3468_v54 = vadd.f32 %v3467_v3, %v3466_v43  ;;  %v4868_v14 = vadd.f32 %v4756_v52, %v4532_v23  ;;  %v2136_v63 = vpop.f32.mrb[23].mxu1  ;;  %v3208_v32 = vpop.f32.mrb[21].mxu0  ;;  %v3471_v24 = vsel %vm411_vm0, %v3421_v28, 0.0 }
 0x214   : > { %v3469_v51 = vsel %vm411_vm0, %v3420_v46, 0.0  ;;  %v4869_v1 = vadd.f32 %v3208_v32, %v2126_v53 }
 0x215   : > { %v3470_v36 = vadd.f32 %v3469_v51, %v3468_v54  ;;  %3320 = vst.msk [vmem:[%s6523_s18 + $0xa8] sm:$0xff] %vm411_vm0, %v4868_v14  ;;  %v3369_v56 = vadd.f32 %v3368_v59, %v3367_v62  ;;  %v3423_v25 = vmul.f32 %v4868_v14, %v4868_v14  ;;  %v3372_v31 = vsel %vm411_vm0, %v4868_v14, 0.0 }
 0x216   : > { %3319 = vst.msk [vmem:[%s6523_s18 + $0xa0] sm:$0xff] %vm411_vm0, %v4869_v1  ;;  %v3370_v38 = vsel %vm411_vm0, %v4869_v1, 0.0  ;;  %v3422_v50 = vmul.f32 %v4869_v1, %v4869_v1  ;;  %v4538_v27 = vpop.f32.mrb[24].mxu1  ;;  %v4759_v40 = vpop.f32.mrb[22].mxu0 }
 0x217   : > { %v3371_v4 = vadd.f32 %v3370_v38, %v3369_v56  ;;  %v3472_v26 = vadd.f32 %v3471_v24, %v3470_v36  ;;  %v4870_v45 = vadd.f32 %v4759_v40, %v4535_v41  ;;  %v2146_v15 = vpop.f32.mrb[25].mxu1  ;;  %v3218_v16 = vpop.f32.mrb[23].mxu0  ;;  %v3475_v39 = vsel %vm411_vm0, %v3423_v25, 0.0 }
 0x218   : > { %v3473_v34 = vsel %vm411_vm0, %v3422_v50, 0.0  ;;  %v4871_v61 = vadd.f32 %v3218_v16, %v2136_v63 }
 0x219   : > { %v3474_v0 = vadd.f32 %v3473_v34, %v3472_v26  ;;  %3322 = vst.msk [vmem:[%s6523_s18 + $0xb8] sm:$0xff] %vm411_vm0, %v4870_v45  ;;  %v3373_v21 = vadd.f32 %v3372_v31, %v3371_v4  ;;  %v3425_v55 = vmul.f32 %v4870_v45, %v4870_v45  ;;  %v3376_v35 = vsel %vm411_vm0, %v4870_v45, 0.0 }
 0x21a   : > { %3321 = vst.msk [vmem:[%s6523_s18 + $0xb0] sm:$0xff] %vm411_vm0, %v4871_v61  ;;  %v3374_v12 = vsel %vm411_vm0, %v4871_v61, 0.0  ;;  %v3424_v57 = vmul.f32 %v4871_v61, %v4871_v61  ;;  %v4541_v37 = vpop.f32.mrb[26].mxu1  ;;  %v4762_v10 = vpop.f32.mrb[24].mxu0 }
 0x21b   : > { %v3375_v2 = vadd.f32 %v3374_v12, %v3373_v21  ;;  %v3476_v5 = vadd.f32 %v3475_v39, %v3474_v0  ;;  %v4872_v22 = vadd.f32 %v4762_v10, %v4538_v27  ;;  %v2156_v48 = vpop.f32.mrb[27].mxu1  ;;  %v3228_v20 = vpop.f32.mrb[25].mxu0  ;;  %v3479_v13 = vsel %vm411_vm0, %v3425_v55, 0.0 }
 0x21c   : > { %v3477_v18 = vsel %vm411_vm0, %v3424_v57, 0.0  ;;  %v4873_v8 = vadd.f32 %v3228_v20, %v2146_v15 }
 0x21d   : > { %v3478_v17 = vadd.f32 %v3477_v18, %v3476_v5  ;;  %3324 = vst.msk [vmem:[%s6523_s18 + $0xc8] sm:$0xff] %vm411_vm0, %v4872_v22  ;;  %v3377_v19 = vadd.f32 %v3376_v35, %v3375_v2  ;;  %v3427_v30 = vmul.f32 %v4872_v22, %v4872_v22  ;;  %v3380_v11 = vsel %vm411_vm0, %v4872_v22, 0.0 }
 0x21e   : > { %3323 = vst.msk [vmem:[%s6523_s18 + $0xc0] sm:$0xff] %vm411_vm0, %v4873_v8  ;;  %v3378_v33 = vsel %vm411_vm0, %v4873_v8, 0.0  ;;  %v3426_v58 = vmul.f32 %v4873_v8, %v4873_v8  ;;  %v4544_v23 = vpop.f32.mrb[28].mxu1  ;;  %v4765_v6 = vpop.f32.mrb[26].mxu0 }
 0x21f   : > { %v3379_v49 = vadd.f32 %v3378_v33, %v3377_v19  ;;  %v3480_v9 = vadd.f32 %v3479_v13, %v3478_v17  ;;  %v4874_v42 = vadd.f32 %v4765_v6, %v4541_v37  ;;  %v2166_v53 = vpop.f32.mrb[29].mxu1  ;;  %v3238_v60 = vpop.f32.mrb[27].mxu0  ;;  %v3483_v3 = vsel %vm411_vm0, %v3427_v30, 0.0 }
 0x220   : > { %v3481_v29 = vsel %vm411_vm0, %v3426_v58, 0.0  ;;  %v4875_v7 = vadd.f32 %v3238_v60, %v2156_v48 }
 0x221   : > { %v3482_v43 = vadd.f32 %v3481_v29, %v3480_v9  ;;  %3326 = vst.msk [vmem:[%s6523_s18 + $0xd8] sm:$0xff] %vm411_vm0, %v4874_v42  ;;  %v3381_v44 = vadd.f32 %v3380_v11, %v3379_v49  ;;  %v3429_v28 = vmul.f32 %v4874_v42, %v4874_v42  ;;  %v3384_v59 = vsel %vm411_vm0, %v4874_v42, 0.0 }
 0x222   : > { %3325 = vst.msk [vmem:[%s6523_s18 + $0xd0] sm:$0xff] %vm411_vm0, %v4875_v7  ;;  %v3382_v47 = vsel %vm411_vm0, %v4875_v7, 0.0  ;;  %v3428_v46 = vmul.f32 %v4875_v7, %v4875_v7  ;;  %v4547_v41 = vpop.f32.mrb[30].mxu1  ;;  %v4768_v52 = vpop.f32.mrb[28].mxu0 }
 0x223   : > { %v3383_v62 = vadd.f32 %v3382_v47, %v3381_v44  ;;  %v3484_v54 = vadd.f32 %v3483_v3, %v3482_v43  ;;  %v4876_v14 = vadd.f32 %v4768_v52, %v4544_v23  ;;  %v2176_v63 = vpop.f32.mrb[31].mxu1  ;;  %v3248_v32 = vpop.f32.mrb[29].mxu0  ;;  %v3487_v24 = vsel %vm411_vm0, %v3429_v28, 0.0 }
 0x224   : > { %v3485_v51 = vsel %vm411_vm0, %v3428_v46, 0.0  ;;  %v4877_v1 = vadd.f32 %v3248_v32, %v2166_v53 }
 0x225   : > { %v3486_v36 = vadd.f32 %v3485_v51, %v3484_v54  ;;  %3328 = vst.msk [vmem:[%s6523_s18 + $0xe8] sm:$0xff] %vm411_vm0, %v4876_v14  ;;  %v3385_v56 = vadd.f32 %v3384_v59, %v3383_v62  ;;  %v3431_v25 = vmul.f32 %v4876_v14, %v4876_v14  ;;  %v3388_v15 = vsel %vm411_vm0, %v4876_v14, 0.0 }
 0x226   : > { %3327 = vst.msk [vmem:[%s6523_s18 + $0xe0] sm:$0xff] %vm411_vm0, %v4877_v1  ;;  %v3386_v38 = vsel %vm411_vm0, %v4877_v1, 0.0  ;;  %v3430_v50 = vmul.f32 %v4877_v1, %v4877_v1  ;;  %v4771_v27 = vpop.f32.mrb[30].mxu0 }
 0x227   : > { %v3387_v40 = vadd.f32 %v3386_v38, %v3385_v56  ;;  %v3488_v4 = vadd.f32 %v3487_v24, %v3486_v36  ;;  %v4878_v26 = vadd.f32 %v4771_v27, %v4547_v41  ;;  %v3258_v45 = vpop.f32.mrb[31].mxu0  ;;  %v3491_v0 = vsel %vm411_vm0, %v3431_v25, 0.0 }
 0x228   : > { %v3489_v16 = vsel %vm411_vm0, %v3430_v50, 0.0  ;;  %v4879_v31 = vadd.f32 %v3258_v45, %v2176_v63 }
 0x229   : > { %v3490_v34 = vadd.f32 %v3489_v16, %v3488_v4  ;;  %3330 = vst.msk [vmem:[%s6523_s18 + $0xf8] sm:$0xff] %vm411_vm0, %v4878_v26  ;;  %v3389_v61 = vadd.f32 %v3388_v15, %v3387_v40  ;;  %v3433_v21 = vmul.f32 %v4878_v26, %v4878_v26  ;;  %v3392_v37 = vsel %vm411_vm0, %v4878_v26, 0.0 }
 0x22a   : > { %3329 = vst.msk [vmem:[%s6523_s18 + $0xf0] sm:$0xff] %vm411_vm0, %v4879_v31  ;;  %v3390_v39 = vsel %vm411_vm0, %v4879_v31, 0.0  ;;  %v3432_v55 = vmul.f32 %v4879_v31, %v4879_v31 }
 0x22b   : > { %v3391_v12 = vadd.f32 %v3390_v39, %v3389_v61  ;;  %v3492_v57 = vadd.f32 %v3491_v0, %v3490_v34  ;;  %v3495_v22 = vsel %vm411_vm0, %v3433_v21, 0.0 }
 0x22c   : > { %v3493_v10 = vsel %vm411_vm0, %v3432_v55, 0.0 }
 0x22d   : > { %v3393_v2 = vadd.f32 %v3392_v37, %v3391_v12  ;;  %v3494_v5 = vadd.f32 %v3493_v10, %v3492_v57 }
 0x22f   : > { %v3394_v48 = vrot.slane %v3393_v2, 4  ;;  %v3496_v20 = vadd.f32 %v3495_v22, %v3494_v5 }
 0x231   : > { %v3395_v35 = vadd.f32 %v3394_v48, %v3393_v2  ;;  %v3497_v18 = vrot.slane %v3496_v20, 4 }
 0x233   : > { %v3396_v8 = vrot.slane %v3395_v35, 2  ;;  %v3498_v17 = vadd.f32 %v3497_v18, %v3496_v20 }
 0x235   : > { %v3397_v19 = vadd.f32 %v3396_v8, %v3395_v35  ;;  %v3499_v13 = vrot.slane %v3498_v17, 2 }
 0x237   : > { %v3398_v30 = vrot.slane %v3397_v19, 1  ;;  %v3500_v33 = vadd.f32 %v3499_v13, %v3498_v17 }
 0x239   : > { %v3399_v58 = vadd.f32 %v3398_v30, %v3397_v19  ;;  %v3501_v23 = vrot.slane %v3500_v33, 1 }
 0x23b   : > { %3401 = vst.msk [vmem:[%s265_s20] sm:$0x1] %vm3400_vm4, %v3399_v58  ;;  %v3502_v6 = vadd.f32 %v3501_v23, %v3500_v33 }
 0x23d   : > { %3503 = vst.msk [vmem:[%s268_s25] sm:$0x1] %vm3400_vm4, %v3502_v6 }
 0x23e PF: > { %s17_s21 = sadd.s32 1, %s5129_s21  }
 0x23f   : > { %p14_p4 = scmp.ge.s32.totalorder %s17_s21, 4  }
 0x241   :  { %16 = sbr.rel (!%p14_p4) target bundleno = 1 (0x1), region = 99 }

</bundles_post_ra>
